<compile_context>
chip_gen: v6e
topology: v6e:2x2x1
jax: 0.10.0
libtpu: 0.0.40
codegen_flags: <defaults>
</compile_context>

<pallas_src>
import functools
import math

import jax
import jax.numpy as jnp
from jax import lax
from jax.experimental import pallas as pl
from jax.experimental.pallas import tpu as pltpu

# ----------------------------- synthetic config ------------------------------
INPUT_DIM = 6                      # cfg.MODEL.CALIBNET.DECODER.INPUT_CHANNELS
IN_CH = INPUT_DIM + 2              # +2 coordinate channels
CONV_DIM = 16                      # cfg...DECODER.CONV_DIM
NUM_KERNELS = 8                    # cfg...DECODER.NUM_KERNELS
NUM_GROUPS = 4
MASK_DIM = 16                      # cfg...FUSION_DECODER.MASK_DIM
NUM_CLASSES = 8                    # cfg...NUM_CLASSES
SCALE_FACTOR = 1                   # cfg...DECODER.SCALE_FACTOR
N_KER_TOTAL = NUM_KERNELS * NUM_GROUPS      # 32
EXPAND_DIM = CONV_DIM * NUM_GROUPS          # 64
HEAD_DIM = NUM_CLASSES + MASK_DIM + 1       # fused [score | mask | objectness]


def _const_spec(shape):
    nd = len(shape)
    return pl.BlockSpec(shape, lambda b, _nd=nd: (0,) * _nd)


# --------------------------- in-kernel 3x3 conv -------------------------------
def _conv3x3_flat(a, w_t, b, wp2, lpad):
    """3x3 conv (padding=1 semantics) on a zero-padded, flattened spatial map.

    a   : (Cin, Lpad) -- padded image flattened; ring + tail positions are 0.
    w_t : (Cout, 9*Cin), column index (ky*3 + kx)*Cin + ci.
    b   : (Cout, 1)
    Returns pre-activation (Cout, Lpad); only interior positions hold the true
    conv values (ring/tail get masked by the caller before further use).
    """
    taps = []
    for ky in range(3):
        for kx in range(3):
            delta = (ky - 1) * wp2 + (kx - 1)
            if delta == 0:
                taps.append(a)
            else:
                # taps[p] = a[p + delta]; circular wrap only pollutes ring/tail
                # outputs, which are masked downstream.
                taps.append(pltpu.roll(a, shift=(-delta) % lpad, axis=1))
    t = jnp.concatenate(taps, axis=0)                      # (9*Cin, Lpad)
    return jnp.dot(w_t, t, preferred_element_type=jnp.float32) + b


# ------------------------------ fused kernel ----------------------------------
def _decoder_kernel(xr_ref, xd_ref, mf_ref, cz_ref, vm_ref,
                    wcr_ref, bcr_ref, wcd_ref, bcd_ref,
                    wir_ref, bir_ref, wid_ref, bid_ref,
                    wkr_ref, bkr_ref, wkd_ref, bkd_ref,
                    wsq_ref, bsq_ref, wfc_ref, bfc_ref, whd_ref, bhd_ref,
                    scores_ref, masks_ref, obj_ref, *, wp2, lpad):
    xr = xr_ref[0]                     # (IN_CH, Lpad)  [rgb feats | coords]
    xdc = xd_ref[0]                    # (IN_CH, Lpad)  [depth feats | coords]
    m = vm_ref[...]                    # (1, Lpad) valid-pixel mask
    cz = cz_ref[...]                   # (IN_CH, Lpad) coords-only (zeros elsewhere)

    x = xr[:INPUT_DIM, :]              # raw rgb features
    xd = xdc[:INPUT_DIM, :]            # raw depth features

    # --- depth-similarity assessment: 1x1 convs + cosine over valid pixels ---
    a = (jnp.dot(wcr_ref[...], x, preferred_element_type=jnp.float32) + bcr_ref[...]) * m
    c = (jnp.dot(wcd_ref[...], xd, preferred_element_type=jnp.float32) + bcd_ref[...]) * m
    num = jnp.sum(a * c, axis=1, keepdims=True)                             # (1, 1)
    na = jnp.maximum(jnp.sqrt(jnp.sum(a * a, axis=1, keepdims=True)), 1e-8)
    nc = jnp.maximum(jnp.sqrt(jnp.sum(c * c, axis=1, keepdims=True)), 1e-8)
    sim = (1.0 + num / (na * nc)) * 0.5                                     # == 1 - (1-cos)/2

    # depth branch input: scale feature channels by sim, keep coord channels
    in_dep = xdc * sim + cz * (1.0 - sim)

    # --- inst convs (3x3 + ReLU), lane-dense (Cout, Lpad) outputs ---
    f_rgb = jnp.maximum(_conv3x3_flat(xr, wir_ref[...], bir_ref[...], wp2, lpad), 0.0) * m
    f_dep = jnp.maximum(_conv3x3_flat(in_dep, wid_ref[...], bid_ref[...], wp2, lpad), 0.0) * m

    # --- grouped kernel convs (block-diagonal dense weights) + sigmoid ---
    kf_rgb = jax.nn.sigmoid(_conv3x3_flat(f_rgb, wkr_ref[...], bkr_ref[...], wp2, lpad)) * m
    kf_dep = jax.nn.sigmoid(_conv3x3_flat(f_dep, wkd_ref[...], bkd_ref[...], wp2, lpad)) * m

    # --- normalized attention pooling against rgb features (single dot) ---
    kf = jnp.concatenate([kf_rgb, kf_dep], axis=0)                          # (2N, Lpad)
    denom = jnp.maximum(jnp.sum(kf, axis=1, keepdims=True), 1e-6)
    kf = kf / denom
    inst = lax.dot_general(kf, f_rgb, (((1,), (1,)), ((), ())),
                           preferred_element_type=jnp.float32)              # (2N, D)

    # --- group interleave: (2N, D) -> (2K, G*D) ---
    two_k = 2 * NUM_KERNELS
    inst_g = jnp.concatenate(
        [inst[g * two_k:(g + 1) * two_k, :] for g in range(NUM_GROUPS)], axis=1)

    # --- squeeze -> fc -> fused heads (one matmul, sliced) ---
    x1 = jnp.maximum(
        jnp.dot(wsq_ref[...], inst_g, preferred_element_type=jnp.float32) + bsq_ref[...], 0.0)
    x2 = jnp.maximum(
        jnp.dot(x1, wfc_ref[...], preferred_element_type=jnp.float32) + bfc_ref[...], 0.0)
    h = jnp.dot(x2, whd_ref[...], preferred_element_type=jnp.float32) + bhd_ref[...]
    scores_ref[0] = h[:, :NUM_CLASSES]
    pred_kernel = h[:, NUM_CLASSES:NUM_CLASSES + MASK_DIM]
    obj_ref[0] = h[:, NUM_CLASSES + MASK_DIM:]

    # --- final mask bmm (pred_kernel consumed in VMEM) ---
    masks_ref[0] = jnp.dot(pred_kernel, mf_ref[0], preferred_element_type=jnp.float32)


# ------------------------------- parameters ----------------------------------
def _to_wt(w_oihw):
    # (Cout, Cin, 3, 3) -> (Cout, 9*Cin), column index (ky*3 + kx)*Cin + ci
    cout, cin = w_oihw.shape[0], w_oihw.shape[1]
    return jnp.transpose(w_oihw, (0, 2, 3, 1)).reshape(cout, 9 * cin)


def _grouped_to_dense(w_grouped):
    # torch grouped-conv weight (G*K, CONV_DIM//G, 3, 3) -> dense block-diagonal
    cin_g = CONV_DIM // NUM_GROUPS
    full = jnp.zeros((N_KER_TOTAL, CONV_DIM, 3, 3), jnp.float32)
    for g in range(NUM_GROUPS):
        o0, i0 = g * NUM_KERNELS, g * cin_g
        full = full.at[o0:o0 + NUM_KERNELS, i0:i0 + cin_g].set(
            w_grouped[o0:o0 + NUM_KERNELS])
    return full


def init_params(key):
    keys = jax.random.split(key, 16)
    bias_val = -math.log((1.0 - 0.01) / 0.01)
    p = {}
    # 1x1 similarity convs (kaiming normal, zero bias)
    p['w_cos_rgb'] = jax.random.normal(keys[0], (1, INPUT_DIM), jnp.float32) * math.sqrt(2.0 / INPUT_DIM)
    p['b_cos_rgb'] = jnp.zeros((1, 1), jnp.float32)
    p['w_cos_dep'] = jax.random.normal(keys[1], (1, INPUT_DIM), jnp.float32) * math.sqrt(2.0 / INPUT_DIM)
    p['b_cos_dep'] = jnp.zeros((1, 1), jnp.float32)
    # inst conv stacks (msra fill, zero bias)
    std = math.sqrt(2.0 / (IN_CH * 9))
    p['w_inst_rgb'] = _to_wt(jax.random.normal(keys[2], (CONV_DIM, IN_CH, 3, 3), jnp.float32) * std)
    p['b_inst_rgb'] = jnp.zeros((CONV_DIM, 1), jnp.float32)
    p['w_inst_dep'] = _to_wt(jax.random.normal(keys[3], (CONV_DIM, IN_CH, 3, 3), jnp.float32) * std)
    p['b_inst_dep'] = jnp.zeros((CONV_DIM, 1), jnp.float32)
    # grouped kernel convs (std=0.01, bias=bias_val) -> block-diagonal dense
    wg = jax.random.normal(keys[4], (N_KER_TOTAL, CONV_DIM // NUM_GROUPS, 3, 3), jnp.float32) * 0.01
    p['w_kc_rgb'] = _to_wt(_grouped_to_dense(wg))
    p['b_kc_rgb'] = jnp.full((N_KER_TOTAL, 1), bias_val, jnp.float32)
    wg = jax.random.normal(keys[5], (N_KER_TOTAL, CONV_DIM // NUM_GROUPS, 3, 3), jnp.float32) * 0.01
    p['w_kc_dep'] = _to_wt(_grouped_to_dense(wg))
    p['b_kc_dep'] = jnp.full((N_KER_TOTAL, 1), bias_val, jnp.float32)
    # squeeze: Linear(2K -> K)
    lim = math.sqrt(1.0 / (2 * NUM_KERNELS))
    p['w_sq'] = jax.random.uniform(keys[6], (NUM_KERNELS, 2 * NUM_KERNELS), jnp.float32, -lim, lim)
    p['b_sq'] = jnp.zeros((NUM_KERNELS, 1), jnp.float32)
    # fc: Linear(EXPAND -> EXPAND), stored pre-transposed
    lim = math.sqrt(1.0 / EXPAND_DIM)
    p['w_fc_t'] = jax.random.uniform(keys[7], (EXPAND_DIM, EXPAND_DIM), jnp.float32, -lim, lim)
    p['b_fc'] = jnp.zeros((1, EXPAND_DIM), jnp.float32)
    # fused heads [score | mask | objectness], stored pre-transposed
    w_score_t = jax.random.normal(keys[8], (EXPAND_DIM, NUM_CLASSES), jnp.float32) * 0.01
    b_score = jnp.full((1, NUM_CLASSES), bias_val, jnp.float32)
    w_mask_t = jax.random.normal(keys[9], (EXPAND_DIM, MASK_DIM), jnp.float32) * 0.01
    b_mask = jnp.zeros((1, MASK_DIM), jnp.float32)
    w_obj_t = jax.random.normal(keys[10], (EXPAND_DIM, 1), jnp.float32) * math.sqrt(1.0 / EXPAND_DIM)
    b_obj = jnp.zeros((1, 1), jnp.float32)
    p['w_heads'] = jnp.concatenate([w_score_t, w_mask_t, w_obj_t], axis=1)   # (64, 25)
    p['b_heads'] = jnp.concatenate([b_score, b_mask, b_obj], axis=1)         # (1, 25)
    return p


# -------------------------------- forward ------------------------------------
def calibnet_decoder_forward(params, features, features_depth, mask_features):
    """features/features_depth: (B, INPUT_DIM, H, W) NCHW; mask_features: (B, MASK_DIM, Hm, Wm)."""
    B, Cf, H, W = features.shape
    Hp, Wp = H + 2, W + 2
    Lp = Hp * Wp
    Lpad = ((Lp + 127) // 128) * 128

    def pad_flat(x_nchw):
        # zero-pad spatially by 1 (Conv2d padding ring), flatten, pad lanes to Lpad
        n, ch = x_nchw.shape[0], x_nchw.shape[1]
        xp = jnp.pad(x_nchw, ((0, 0), (0, 0), (1, 1), (1, 1)))
        return jnp.pad(xp.reshape(n, ch, Lp), ((0, 0), (0, 0), (0, Lpad - Lp)))

    # coordinate channels [x_loc, y_loc]
    y_loc = -1.0 + 2.0 * jnp.arange(H, dtype=jnp.float32) / (H - 1)
    x_loc = -1.0 + 2.0 * jnp.arange(W, dtype=jnp.float32) / (W - 1)
    yy, xx = jnp.meshgrid(y_loc, x_loc, indexing='ij')
    coords = jnp.stack([xx, yy], axis=0)[None]                               # (1, 2, H, W)

    in_rgb = pad_flat(jnp.concatenate(
        [features, jnp.broadcast_to(coords, (B, 2, H, W))], axis=1))         # (B, IN_CH, Lpad)
    in_dep = pad_flat(jnp.concatenate(
        [features_depth, jnp.broadcast_to(coords, (B, 2, H, W))], axis=1))   # (B, IN_CH, Lpad)
    coords_only = pad_flat(jnp.concatenate(
        [jnp.zeros((1, INPUT_DIM, H, W), jnp.float32), coords], axis=1))[0]  # (IN_CH, Lpad)
    vmask = pad_flat(jnp.ones((1, 1, H, W), jnp.float32))[0]                 # (1, Lpad)

    Bm, Cm, Hm, Wm = mask_features.shape
    HWm = Hm * Wm
    mf_flat = mask_features.reshape(Bm, Cm, HWm)

    kern = functools.partial(_decoder_kernel, wp2=Wp, lpad=Lpad)
    grid_spec = pltpu.PrefetchScalarGridSpec(
        num_scalar_prefetch=0,
        grid=(B,),
        in_specs=[
            pl.BlockSpec((1, IN_CH, Lpad), lambda b: (b, 0, 0)),
            pl.BlockSpec((1, IN_CH, Lpad), lambda b: (b, 0, 0)),
            pl.BlockSpec((1, Cm, HWm), lambda b: (b, 0, 0)),
            _const_spec((IN_CH, Lpad)),
            _const_spec((1, Lpad)),
            _const_spec(params['w_cos_rgb'].shape), _const_spec(params['b_cos_rgb'].shape),
            _const_spec(params['w_cos_dep'].shape), _const_spec(params['b_cos_dep'].shape),
            _const_spec(params['w_inst_rgb'].shape), _const_spec(params['b_inst_rgb'].shape),
            _const_spec(params['w_inst_dep'].shape), _const_spec(params['b_inst_dep'].shape),
            _const_spec(params['w_kc_rgb'].shape), _const_spec(params['b_kc_rgb'].shape),
            _const_spec(params['w_kc_dep'].shape), _const_spec(params['b_kc_dep'].shape),
            _const_spec(params['w_sq'].shape), _const_spec(params['b_sq'].shape),
            _const_spec(params['w_fc_t'].shape), _const_spec(params['b_fc'].shape),
            _const_spec(params['w_heads'].shape), _const_spec(params['b_heads'].shape),
        ],
        out_specs=[
            pl.BlockSpec((1, NUM_KERNELS, NUM_CLASSES), lambda b: (b, 0, 0)),
            pl.BlockSpec((1, NUM_KERNELS, HWm), lambda b: (b, 0, 0)),
            pl.BlockSpec((1, NUM_KERNELS, 1), lambda b: (b, 0, 0)),
        ])

    scores, masks, obj = pl.pallas_call(
        kern,
        out_shape=(jax.ShapeDtypeStruct((B, NUM_KERNELS, NUM_CLASSES), jnp.float32),
                   jax.ShapeDtypeStruct((B, NUM_KERNELS, HWm), jnp.float32),
                   jax.ShapeDtypeStruct((B, NUM_KERNELS, 1), jnp.float32)),
        grid_spec=grid_spec,
        compiler_params=pltpu.CompilerParams(dimension_semantics=("parallel",)),
    )(in_rgb, in_dep, mf_flat, coords_only, vmask,
      params['w_cos_rgb'], params['b_cos_rgb'], params['w_cos_dep'], params['b_cos_dep'],
      params['w_inst_rgb'], params['b_inst_rgb'], params['w_inst_dep'], params['b_inst_dep'],
      params['w_kc_rgb'], params['b_kc_rgb'], params['w_kc_dep'], params['b_kc_dep'],
      params['w_sq'], params['b_sq'], params['w_fc_t'], params['b_fc'],
      params['w_heads'], params['b_heads'])

    pred_masks = masks.reshape(B, NUM_KERNELS, Hm, Wm)
    # TODO(synk): F.interpolate(bilinear) for SCALE_FACTOR != 1 not implemented; SCALE_FACTOR == 1 here.
    return {'pred_logits': scores, 'pred_masks': pred_masks, 'pred_scores': obj}


if __name__ == "__main__":
    key = jax.random.PRNGKey(0)
    kp, k1, k2, k3 = jax.random.split(key, 4)
    params = init_params(kp)
    B, H, W = 2, 16, 16
    features = jax.random.normal(k1, (B, INPUT_DIM, H, W), jnp.float32)
    features_depth = jax.random.normal(k2, (B, INPUT_DIM, H, W), jnp.float32)
    mask_features = jax.random.normal(k3, (B, MASK_DIM, H, W), jnp.float32)

    out = jax.jit(calibnet_decoder_forward)(params, features, features_depth, mask_features)
    out = jax.tree_util.tree_map(jax.block_until_ready, out)

    assert out['pred_logits'].shape == (B, NUM_KERNELS, NUM_CLASSES)
    assert out['pred_masks'].shape == (B, NUM_KERNELS, H, W)
    assert out['pred_scores'].shape == (B, NUM_KERNELS, 1)
    assert bool(jnp.all(jnp.isfinite(out['pred_masks'])))
    print("KERNEL_OK")
</pallas_src>

<mosaic_0001>
module attributes {stable_mosaic.version = 11 : i64} {
  func.func @_decoder_kernel(%arg0: i32, %arg1: memref<1x8x384xf32, #tpu.memory_space<vmem>>, %arg2: memref<1x8x384xf32, #tpu.memory_space<vmem>>, %arg3: memref<1x16x256xf32, #tpu.memory_space<vmem>>, %arg4: memref<8x384xf32, #tpu.memory_space<vmem>>, %arg5: memref<1x384xf32, #tpu.memory_space<vmem>>, %arg6: memref<1x6xf32, #tpu.memory_space<vmem>>, %arg7: memref<1x1xf32, #tpu.memory_space<vmem>>, %arg8: memref<1x6xf32, #tpu.memory_space<vmem>>, %arg9: memref<1x1xf32, #tpu.memory_space<vmem>>, %arg10: memref<16x72xf32, #tpu.memory_space<vmem>>, %arg11: memref<16x1xf32, #tpu.memory_space<vmem>>, %arg12: memref<16x72xf32, #tpu.memory_space<vmem>>, %arg13: memref<16x1xf32, #tpu.memory_space<vmem>>, %arg14: memref<32x144xf32, #tpu.memory_space<vmem>>, %arg15: memref<32x1xf32, #tpu.memory_space<vmem>>, %arg16: memref<32x144xf32, #tpu.memory_space<vmem>>, %arg17: memref<32x1xf32, #tpu.memory_space<vmem>>, %arg18: memref<8x16xf32, #tpu.memory_space<vmem>>, %arg19: memref<8x1xf32, #tpu.memory_space<vmem>>, %arg20: memref<64x64xf32, #tpu.memory_space<vmem>>, %arg21: memref<1x64xf32, #tpu.memory_space<vmem>>, %arg22: memref<64x25xf32, #tpu.memory_space<vmem>>, %arg23: memref<1x25xf32, #tpu.memory_space<vmem>>, %arg24: memref<1x8x8xf32, #tpu.memory_space<vmem>>, %arg25: memref<1x8x256xf32, #tpu.memory_space<vmem>>, %arg26: memref<1x8x1xf32, #tpu.memory_space<vmem>>) attributes {dimension_semantics = [#tpu.dimension_semantics<parallel>], iteration_bounds = array<i64: 2>, scalar_prefetch = 0 : i64, scratch_operands = 0 : i64, tpu.core_type = #tpu.core_type<tc>, window_params = [{transform_indices = @transform_0, window_bounds = array<i64: 1, 8, 384>}, {transform_indices = @transform_1, window_bounds = array<i64: 1, 8, 384>}, {transform_indices = @transform_2, window_bounds = array<i64: 1, 16, 256>}, {pipeline_mode = #tpu.pipeline_mode<synchronous>, transform_indices = @transform_3, window_bounds = array<i64: 8, 384>}, {pipeline_mode = #tpu.pipeline_mode<synchronous>, transform_indices = @transform_4, window_bounds = array<i64: 1, 384>}, {pipeline_mode = #tpu.pipeline_mode<synchronous>, transform_indices = @transform_5, window_bounds = array<i64: 1, 6>}, {pipeline_mode = #tpu.pipeline_mode<synchronous>, transform_indices = @transform_6, window_bounds = array<i64: 1, 1>}, {pipeline_mode = #tpu.pipeline_mode<synchronous>, transform_indices = @transform_7, window_bounds = array<i64: 1, 6>}, {pipeline_mode = #tpu.pipeline_mode<synchronous>, transform_indices = @transform_8, window_bounds = array<i64: 1, 1>}, {pipeline_mode = #tpu.pipeline_mode<synchronous>, transform_indices = @transform_9, window_bounds = array<i64: 16, 72>}, {pipeline_mode = #tpu.pipeline_mode<synchronous>, transform_indices = @transform_10, window_bounds = array<i64: 16, 1>}, {pipeline_mode = #tpu.pipeline_mode<synchronous>, transform_indices = @transform_11, window_bounds = array<i64: 16, 72>}, {pipeline_mode = #tpu.pipeline_mode<synchronous>, transform_indices = @transform_12, window_bounds = array<i64: 16, 1>}, {pipeline_mode = #tpu.pipeline_mode<synchronous>, transform_indices = @transform_13, window_bounds = array<i64: 32, 144>}, {pipeline_mode = #tpu.pipeline_mode<synchronous>, transform_indices = @transform_14, window_bounds = array<i64: 32, 1>}, {pipeline_mode = #tpu.pipeline_mode<synchronous>, transform_indices = @transform_15, window_bounds = array<i64: 32, 144>}, {pipeline_mode = #tpu.pipeline_mode<synchronous>, transform_indices = @transform_16, window_bounds = array<i64: 32, 1>}, {pipeline_mode = #tpu.pipeline_mode<synchronous>, transform_indices = @transform_17, window_bounds = array<i64: 8, 16>}, {pipeline_mode = #tpu.pipeline_mode<synchronous>, transform_indices = @transform_18, window_bounds = array<i64: 8, 1>}, {pipeline_mode = #tpu.pipeline_mode<synchronous>, transform_indices = @transform_19, window_bounds = array<i64: 64, 64>}, {pipeline_mode = #tpu.pipeline_mode<synchronous>, transform_indices = @transform_20, window_bounds = array<i64: 1, 64>}, {pipeline_mode = #tpu.pipeline_mode<synchronous>, transform_indices = @transform_21, window_bounds = array<i64: 64, 25>}, {pipeline_mode = #tpu.pipeline_mode<synchronous>, transform_indices = @transform_22, window_bounds = array<i64: 1, 25>}, {transform_indices = @transform_23, window_bounds = array<i64: 1, 8, 8>}, {transform_indices = @transform_24, window_bounds = array<i64: 1, 8, 256>}, {transform_indices = @transform_25, window_bounds = array<i64: 1, 8, 1>}]} {
    %c0 = arith.constant 0 : index
    %c0_0 = arith.constant 0 : index
    %c0_1 = arith.constant 0 : index
    %0 = vector.load %arg1[%c0, %c0_0, %c0_1] : memref<1x8x384xf32, #tpu.memory_space<vmem>>, vector<1x8x384xf32>
    %1 = vector.shape_cast %0 : vector<1x8x384xf32> to vector<8x384xf32>
    %c0_2 = arith.constant 0 : index
    %c0_3 = arith.constant 0 : index
    %c0_4 = arith.constant 0 : index
    %2 = vector.load %arg2[%c0_2, %c0_3, %c0_4] : memref<1x8x384xf32, #tpu.memory_space<vmem>>, vector<1x8x384xf32>
    %3 = vector.shape_cast %2 : vector<1x8x384xf32> to vector<8x384xf32>
    %c0_5 = arith.constant 0 : index
    %c0_6 = arith.constant 0 : index
    %4 = vector.load %arg5[%c0_5, %c0_6] : memref<1x384xf32, #tpu.memory_space<vmem>>, vector<1x384xf32>
    %c0_7 = arith.constant 0 : index
    %c0_8 = arith.constant 0 : index
    %5 = vector.load %arg4[%c0_7, %c0_8] : memref<8x384xf32, #tpu.memory_space<vmem>>, vector<8x384xf32>
    %6 = vector.extract_strided_slice %1 {offsets = [0, 0], sizes = [6, 384], strides = [1, 1]} : vector<8x384xf32> to vector<6x384xf32>
    %7 = vector.extract_strided_slice %3 {offsets = [0, 0], sizes = [6, 384], strides = [1, 1]} : vector<8x384xf32> to vector<6x384xf32>
    %c0_9 = arith.constant 0 : index
    %c0_10 = arith.constant 0 : index
    %8 = vector.load %arg6[%c0_9, %c0_10] : memref<1x6xf32, #tpu.memory_space<vmem>>, vector<1x6xf32>
    %cst = arith.constant dense<0.000000e+00> : vector<1x384xf32>
    %9 = tpu.matmul %8, %6, %cst {dimension_numbers = #tpu.dot_dimension_numbers<[1], [0], [0], [1], [0, 0, 1, 1], [], []>} : vector<1x6xf32>, vector<6x384xf32>, vector<1x384xf32> -> vector<1x384xf32>
    %c0_11 = arith.constant 0 : index
    %c0_12 = arith.constant 0 : index
    %10 = vector.load %arg7[%c0_11, %c0_12] : memref<1x1xf32, #tpu.memory_space<vmem>>, vector<1x1xf32>
    %11 = vector.broadcast %10 : vector<1x1xf32> to vector<1x384xf32>
    %12 = arith.addf %9, %11 : vector<1x384xf32>
    %13 = arith.mulf %12, %4 : vector<1x384xf32>
    %c0_13 = arith.constant 0 : index
    %c0_14 = arith.constant 0 : index
    %14 = vector.load %arg8[%c0_13, %c0_14] : memref<1x6xf32, #tpu.memory_space<vmem>>, vector<1x6xf32>
    %cst_15 = arith.constant dense<0.000000e+00> : vector<1x384xf32>
    %15 = tpu.matmul %14, %7, %cst_15 {dimension_numbers = #tpu.dot_dimension_numbers<[1], [0], [0], [1], [0, 0, 1, 1], [], []>} : vector<1x6xf32>, vector<6x384xf32>, vector<1x384xf32> -> vector<1x384xf32>
    %c0_16 = arith.constant 0 : index
    %c0_17 = arith.constant 0 : index
    %16 = vector.load %arg9[%c0_16, %c0_17] : memref<1x1xf32, #tpu.memory_space<vmem>>, vector<1x1xf32>
    %17 = vector.broadcast %16 : vector<1x1xf32> to vector<1x384xf32>
    %18 = arith.addf %15, %17 : vector<1x384xf32>
    %19 = arith.mulf %18, %4 : vector<1x384xf32>
    %20 = arith.mulf %13, %19 : vector<1x384xf32>
    %cst_18 = arith.constant dense<0.000000e+00> : vector<1xf32>
    %21 = vector.multi_reduction <add>, %20, %cst_18 [1] : vector<1x384xf32> to vector<1xf32>
    %22 = vector.shape_cast %21 : vector<1xf32> to vector<1x1xf32>
    %23 = arith.mulf %13, %13 : vector<1x384xf32>
    %cst_19 = arith.constant dense<0.000000e+00> : vector<1xf32>
    %24 = vector.multi_reduction <add>, %23, %cst_19 [1] : vector<1x384xf32> to vector<1xf32>
    %25 = vector.shape_cast %24 : vector<1xf32> to vector<1x1xf32>
    %26 = math.sqrt %25 : vector<1x1xf32>
    %cst_20 = arith.constant 9.99999993E-9 : f32
    %27 = vector.broadcast %cst_20 : f32 to vector<1x1xf32>
    %28 = arith.maximumf %26, %27 : vector<1x1xf32>
    %29 = arith.mulf %19, %19 : vector<1x384xf32>
    %cst_21 = arith.constant dense<0.000000e+00> : vector<1xf32>
    %30 = vector.multi_reduction <add>, %29, %cst_21 [1] : vector<1x384xf32> to vector<1xf32>
    %31 = vector.shape_cast %30 : vector<1xf32> to vector<1x1xf32>
    %32 = math.sqrt %31 : vector<1x1xf32>
    %cst_22 = arith.constant 9.99999993E-9 : f32
    %33 = vector.broadcast %cst_22 : f32 to vector<1x1xf32>
    %34 = arith.maximumf %32, %33 : vector<1x1xf32>
    %35 = arith.mulf %28, %34 : vector<1x1xf32>
    %36 = arith.divf %22, %35 : vector<1x1xf32>
    %cst_23 = arith.constant 1.000000e+00 : f32
    %37 = vector.broadcast %cst_23 : f32 to vector<1x1xf32>
    %38 = arith.addf %37, %36 : vector<1x1xf32>
    %cst_24 = arith.constant 5.000000e-01 : f32
    %39 = vector.broadcast %cst_24 : f32 to vector<1x1xf32>
    %40 = arith.mulf %38, %39 : vector<1x1xf32>
    %41 = vector.broadcast %40 : vector<1x1xf32> to vector<8x384xf32>
    %42 = arith.mulf %3, %41 : vector<8x384xf32>
    %cst_25 = arith.constant 1.000000e+00 : f32
    %43 = vector.broadcast %cst_25 : f32 to vector<1x1xf32>
    %44 = arith.subf %43, %40 : vector<1x1xf32>
    %45 = vector.broadcast %44 : vector<1x1xf32> to vector<8x384xf32>
    %46 = arith.mulf %5, %45 : vector<8x384xf32>
    %47 = arith.addf %42, %46 : vector<8x384xf32>
    %c0_26 = arith.constant 0 : index
    %c0_27 = arith.constant 0 : index
    %48 = vector.load %arg10[%c0_26, %c0_27] : memref<16x72xf32, #tpu.memory_space<vmem>>, vector<16x72xf32>
    %c0_28 = arith.constant 0 : index
    %c0_29 = arith.constant 0 : index
    %49 = vector.load %arg11[%c0_28, %c0_29] : memref<16x1xf32, #tpu.memory_space<vmem>>, vector<16x1xf32>
    %c19_i32 = arith.constant 19 : i32
    %50 = tpu.dynamic_rotate %1 by %c19_i32 dim 1 : vector<8x384xf32>, i32 -> vector<8x384xf32>
    %c18_i32 = arith.constant 18 : i32
    %51 = tpu.dynamic_rotate %1 by %c18_i32 dim 1 : vector<8x384xf32>, i32 -> vector<8x384xf32>
    %c17_i32 = arith.constant 17 : i32
    %52 = tpu.dynamic_rotate %1 by %c17_i32 dim 1 : vector<8x384xf32>, i32 -> vector<8x384xf32>
    %c1_i32 = arith.constant 1 : i32
    %53 = tpu.dynamic_rotate %1 by %c1_i32 dim 1 : vector<8x384xf32>, i32 -> vector<8x384xf32>
    %c383_i32 = arith.constant 383 : i32
    %54 = tpu.dynamic_rotate %1 by %c383_i32 dim 1 : vector<8x384xf32>, i32 -> vector<8x384xf32>
    %c367_i32 = arith.constant 367 : i32
    %55 = tpu.dynamic_rotate %1 by %c367_i32 dim 1 : vector<8x384xf32>, i32 -> vector<8x384xf32>
    %c366_i32 = arith.constant 366 : i32
    %56 = tpu.dynamic_rotate %1 by %c366_i32 dim 1 : vector<8x384xf32>, i32 -> vector<8x384xf32>
    %c365_i32 = arith.constant 365 : i32
    %57 = tpu.dynamic_rotate %1 by %c365_i32 dim 1 : vector<8x384xf32>, i32 -> vector<8x384xf32>
    %58 = tpu.concatenate %50, %51, %52, %53, %1, %54, %55, %56, %57 in 0 : vector<8x384xf32>, vector<8x384xf32>, vector<8x384xf32>, vector<8x384xf32>, vector<8x384xf32>, vector<8x384xf32>, vector<8x384xf32>, vector<8x384xf32>, vector<8x384xf32> -> vector<72x384xf32>
    %cst_30 = arith.constant dense<0.000000e+00> : vector<16x384xf32>
    %59 = tpu.matmul %48, %58, %cst_30 {dimension_numbers = #tpu.dot_dimension_numbers<[1], [0], [0], [1], [0, 0, 1, 1], [], []>} : vector<16x72xf32>, vector<72x384xf32>, vector<16x384xf32> -> vector<16x384xf32>
    %60 = vector.broadcast %49 : vector<16x1xf32> to vector<16x384xf32>
    %61 = arith.addf %59, %60 : vector<16x384xf32>
    %cst_31 = arith.constant 0.000000e+00 : f32
    %62 = vector.broadcast %cst_31 : f32 to vector<16x384xf32>
    %63 = arith.maximumf %61, %62 : vector<16x384xf32>
    %64 = vector.broadcast %4 : vector<1x384xf32> to vector<16x384xf32>
    %65 = arith.mulf %63, %64 : vector<16x384xf32>
    %c0_32 = arith.constant 0 : index
    %c0_33 = arith.constant 0 : index
    %66 = vector.load %arg12[%c0_32, %c0_33] : memref<16x72xf32, #tpu.memory_space<vmem>>, vector<16x72xf32>
    %c0_34 = arith.constant 0 : index
    %c0_35 = arith.constant 0 : index
    %67 = vector.load %arg13[%c0_34, %c0_35] : memref<16x1xf32, #tpu.memory_space<vmem>>, vector<16x1xf32>
    %c19_i32_36 = arith.constant 19 : i32
    %68 = tpu.dynamic_rotate %47 by %c19_i32_36 dim 1 : vector<8x384xf32>, i32 -> vector<8x384xf32>
    %c18_i32_37 = arith.constant 18 : i32
    %69 = tpu.dynamic_rotate %47 by %c18_i32_37 dim 1 : vector<8x384xf32>, i32 -> vector<8x384xf32>
    %c17_i32_38 = arith.constant 17 : i32
    %70 = tpu.dynamic_rotate %47 by %c17_i32_38 dim 1 : vector<8x384xf32>, i32 -> vector<8x384xf32>
    %c1_i32_39 = arith.constant 1 : i32
    %71 = tpu.dynamic_rotate %47 by %c1_i32_39 dim 1 : vector<8x384xf32>, i32 -> vector<8x384xf32>
    %c383_i32_40 = arith.constant 383 : i32
    %72 = tpu.dynamic_rotate %47 by %c383_i32_40 dim 1 : vector<8x384xf32>, i32 -> vector<8x384xf32>
    %c367_i32_41 = arith.constant 367 : i32
    %73 = tpu.dynamic_rotate %47 by %c367_i32_41 dim 1 : vector<8x384xf32>, i32 -> vector<8x384xf32>
    %c366_i32_42 = arith.constant 366 : i32
    %74 = tpu.dynamic_rotate %47 by %c366_i32_42 dim 1 : vector<8x384xf32>, i32 -> vector<8x384xf32>
    %c365_i32_43 = arith.constant 365 : i32
    %75 = tpu.dynamic_rotate %47 by %c365_i32_43 dim 1 : vector<8x384xf32>, i32 -> vector<8x384xf32>
    %76 = tpu.concatenate %68, %69, %70, %71, %47, %72, %73, %74, %75 in 0 : vector<8x384xf32>, vector<8x384xf32>, vector<8x384xf32>, vector<8x384xf32>, vector<8x384xf32>, vector<8x384xf32>, vector<8x384xf32>, vector<8x384xf32>, vector<8x384xf32> -> vector<72x384xf32>
    %cst_44 = arith.constant dense<0.000000e+00> : vector<16x384xf32>
    %77 = tpu.matmul %66, %76, %cst_44 {dimension_numbers = #tpu.dot_dimension_numbers<[1], [0], [0], [1], [0, 0, 1, 1], [], []>} : vector<16x72xf32>, vector<72x384xf32>, vector<16x384xf32> -> vector<16x384xf32>
    %78 = vector.broadcast %67 : vector<16x1xf32> to vector<16x384xf32>
    %79 = arith.addf %77, %78 : vector<16x384xf32>
    %cst_45 = arith.constant 0.000000e+00 : f32
    %80 = vector.broadcast %cst_45 : f32 to vector<16x384xf32>
    %81 = arith.maximumf %79, %80 : vector<16x384xf32>
    %82 = vector.broadcast %4 : vector<1x384xf32> to vector<16x384xf32>
    %83 = arith.mulf %81, %82 : vector<16x384xf32>
    %c0_46 = arith.constant 0 : index
    %c0_47 = arith.constant 0 : index
    %84 = vector.load %arg14[%c0_46, %c0_47] : memref<32x144xf32, #tpu.memory_space<vmem>>, vector<32x144xf32>
    %c0_48 = arith.constant 0 : index
    %c0_49 = arith.constant 0 : index
    %85 = vector.load %arg15[%c0_48, %c0_49] : memref<32x1xf32, #tpu.memory_space<vmem>>, vector<32x1xf32>
    %c19_i32_50 = arith.constant 19 : i32
    %86 = tpu.dynamic_rotate %65 by %c19_i32_50 dim 1 : vector<16x384xf32>, i32 -> vector<16x384xf32>
    %c18_i32_51 = arith.constant 18 : i32
    %87 = tpu.dynamic_rotate %65 by %c18_i32_51 dim 1 : vector<16x384xf32>, i32 -> vector<16x384xf32>
    %c17_i32_52 = arith.constant 17 : i32
    %88 = tpu.dynamic_rotate %65 by %c17_i32_52 dim 1 : vector<16x384xf32>, i32 -> vector<16x384xf32>
    %c1_i32_53 = arith.constant 1 : i32
    %89 = tpu.dynamic_rotate %65 by %c1_i32_53 dim 1 : vector<16x384xf32>, i32 -> vector<16x384xf32>
    %c383_i32_54 = arith.constant 383 : i32
    %90 = tpu.dynamic_rotate %65 by %c383_i32_54 dim 1 : vector<16x384xf32>, i32 -> vector<16x384xf32>
    %c367_i32_55 = arith.constant 367 : i32
    %91 = tpu.dynamic_rotate %65 by %c367_i32_55 dim 1 : vector<16x384xf32>, i32 -> vector<16x384xf32>
    %c366_i32_56 = arith.constant 366 : i32
    %92 = tpu.dynamic_rotate %65 by %c366_i32_56 dim 1 : vector<16x384xf32>, i32 -> vector<16x384xf32>
    %c365_i32_57 = arith.constant 365 : i32
    %93 = tpu.dynamic_rotate %65 by %c365_i32_57 dim 1 : vector<16x384xf32>, i32 -> vector<16x384xf32>
    %94 = tpu.concatenate %86, %87, %88, %89, %65, %90, %91, %92, %93 in 0 : vector<16x384xf32>, vector<16x384xf32>, vector<16x384xf32>, vector<16x384xf32>, vector<16x384xf32>, vector<16x384xf32>, vector<16x384xf32>, vector<16x384xf32>, vector<16x384xf32> -> vector<144x384xf32>
    %cst_58 = arith.constant dense<0.000000e+00> : vector<32x384xf32>
    %95 = tpu.matmul %84, %94, %cst_58 {dimension_numbers = #tpu.dot_dimension_numbers<[1], [0], [0], [1], [0, 0, 1, 1], [], []>} : vector<32x144xf32>, vector<144x384xf32>, vector<32x384xf32> -> vector<32x384xf32>
    %96 = vector.broadcast %85 : vector<32x1xf32> to vector<32x384xf32>
    %97 = arith.addf %95, %96 : vector<32x384xf32>
    %98 = arith.negf %97 : vector<32x384xf32>
    %99 = math.exp %98 : vector<32x384xf32>
    %cst_59 = arith.constant 1.000000e+00 : f32
    %100 = vector.broadcast %cst_59 : f32 to vector<32x384xf32>
    %101 = arith.addf %100, %99 : vector<32x384xf32>
    %102 = arith.divf %100, %101 : vector<32x384xf32>
    %103 = vector.broadcast %4 : vector<1x384xf32> to vector<32x384xf32>
    %104 = arith.mulf %102, %103 : vector<32x384xf32>
    %c0_60 = arith.constant 0 : index
    %c0_61 = arith.constant 0 : index
    %105 = vector.load %arg16[%c0_60, %c0_61] : memref<32x144xf32, #tpu.memory_space<vmem>>, vector<32x144xf32>
    %c0_62 = arith.constant 0 : index
    %c0_63 = arith.constant 0 : index
    %106 = vector.load %arg17[%c0_62, %c0_63] : memref<32x1xf32, #tpu.memory_space<vmem>>, vector<32x1xf32>
    %c19_i32_64 = arith.constant 19 : i32
    %107 = tpu.dynamic_rotate %83 by %c19_i32_64 dim 1 : vector<16x384xf32>, i32 -> vector<16x384xf32>
    %c18_i32_65 = arith.constant 18 : i32
    %108 = tpu.dynamic_rotate %83 by %c18_i32_65 dim 1 : vector<16x384xf32>, i32 -> vector<16x384xf32>
    %c17_i32_66 = arith.constant 17 : i32
    %109 = tpu.dynamic_rotate %83 by %c17_i32_66 dim 1 : vector<16x384xf32>, i32 -> vector<16x384xf32>
    %c1_i32_67 = arith.constant 1 : i32
    %110 = tpu.dynamic_rotate %83 by %c1_i32_67 dim 1 : vector<16x384xf32>, i32 -> vector<16x384xf32>
    %c383_i32_68 = arith.constant 383 : i32
    %111 = tpu.dynamic_rotate %83 by %c383_i32_68 dim 1 : vector<16x384xf32>, i32 -> vector<16x384xf32>
    %c367_i32_69 = arith.constant 367 : i32
    %112 = tpu.dynamic_rotate %83 by %c367_i32_69 dim 1 : vector<16x384xf32>, i32 -> vector<16x384xf32>
    %c366_i32_70 = arith.constant 366 : i32
    %113 = tpu.dynamic_rotate %83 by %c366_i32_70 dim 1 : vector<16x384xf32>, i32 -> vector<16x384xf32>
    %c365_i32_71 = arith.constant 365 : i32
    %114 = tpu.dynamic_rotate %83 by %c365_i32_71 dim 1 : vector<16x384xf32>, i32 -> vector<16x384xf32>
    %115 = tpu.concatenate %107, %108, %109, %110, %83, %111, %112, %113, %114 in 0 : vector<16x384xf32>, vector<16x384xf32>, vector<16x384xf32>, vector<16x384xf32>, vector<16x384xf32>, vector<16x384xf32>, vector<16x384xf32>, vector<16x384xf32>, vector<16x384xf32> -> vector<144x384xf32>
    %cst_72 = arith.constant dense<0.000000e+00> : vector<32x384xf32>
    %116 = tpu.matmul %105, %115, %cst_72 {dimension_numbers = #tpu.dot_dimension_numbers<[1], [0], [0], [1], [0, 0, 1, 1], [], []>} : vector<32x144xf32>, vector<144x384xf32>, vector<32x384xf32> -> vector<32x384xf32>
    %117 = vector.broadcast %106 : vector<32x1xf32> to vector<32x384xf32>
    %118 = arith.addf %116, %117 : vector<32x384xf32>
    %119 = arith.negf %118 : vector<32x384xf32>
    %120 = math.exp %119 : vector<32x384xf32>
    %cst_73 = arith.constant 1.000000e+00 : f32
    %121 = vector.broadcast %cst_73 : f32 to vector<32x384xf32>
    %122 = arith.addf %121, %120 : vector<32x384xf32>
    %123 = arith.divf %121, %122 : vector<32x384xf32>
    %124 = vector.broadcast %4 : vector<1x384xf32> to vector<32x384xf32>
    %125 = arith.mulf %123, %124 : vector<32x384xf32>
    %126 = tpu.concatenate %104, %125 in 0 : vector<32x384xf32>, vector<32x384xf32> -> vector<64x384xf32>
    %cst_74 = arith.constant dense<0.000000e+00> : vector<64xf32>
    %127 = vector.multi_reduction <add>, %126, %cst_74 [1] : vector<64x384xf32> to vector<64xf32>
    %128 = vector.shape_cast %127 : vector<64xf32> to vector<64x1xf32>
    %cst_75 = arith.constant 9.99999997E-7 : f32
    %129 = vector.broadcast %cst_75 : f32 to vector<64x1xf32>
    %130 = arith.maximumf %128, %129 : vector<64x1xf32>
    %131 = vector.broadcast %130 : vector<64x1xf32> to vector<64x384xf32>
    %132 = arith.divf %126, %131 : vector<64x384xf32>
    %cst_76 = arith.constant dense<0.000000e+00> : vector<64x16xf32>
    %133 = tpu.matmul %132, %65, %cst_76 {dimension_numbers = #tpu.dot_dimension_numbers<[1], [1], [0], [0], [0, 0, 1, 0], [], []>} : vector<64x384xf32>, vector<16x384xf32>, vector<64x16xf32> -> vector<64x16xf32>
    %134 = vector.extract_strided_slice %133 {offsets = [0, 0], sizes = [16, 16], strides = [1, 1]} : vector<64x16xf32> to vector<16x16xf32>
    %135 = vector.extract_strided_slice %133 {offsets = [16, 0], sizes = [16, 16], strides = [1, 1]} : vector<64x16xf32> to vector<16x16xf32>
    %136 = vector.extract_strided_slice %133 {offsets = [32, 0], sizes = [16, 16], strides = [1, 1]} : vector<64x16xf32> to vector<16x16xf32>
    %137 = vector.extract_strided_slice %133 {offsets = [48, 0], sizes = [16, 16], strides = [1, 1]} : vector<64x16xf32> to vector<16x16xf32>
    %138 = tpu.concatenate %134, %135, %136, %137 in 1 : vector<16x16xf32>, vector<16x16xf32>, vector<16x16xf32>, vector<16x16xf32> -> vector<16x64xf32>
    %c0_77 = arith.constant 0 : index
    %c0_78 = arith.constant 0 : index
    %139 = vector.load %arg18[%c0_77, %c0_78] : memref<8x16xf32, #tpu.memory_space<vmem>>, vector<8x16xf32>
    %cst_79 = arith.constant dense<0.000000e+00> : vector<8x64xf32>
    %140 = tpu.matmul %139, %138, %cst_79 {dimension_numbers = #tpu.dot_dimension_numbers<[1], [0], [0], [1], [0, 0, 1, 1], [], []>} : vector<8x16xf32>, vector<16x64xf32>, vector<8x64xf32> -> vector<8x64xf32>
    %c0_80 = arith.constant 0 : index
    %c0_81 = arith.constant 0 : index
    %141 = vector.load %arg19[%c0_80, %c0_81] : memref<8x1xf32, #tpu.memory_space<vmem>>, vector<8x1xf32>
    %142 = vector.broadcast %141 : vector<8x1xf32> to vector<8x64xf32>
    %143 = arith.addf %140, %142 : vector<8x64xf32>
    %cst_82 = arith.constant 0.000000e+00 : f32
    %144 = vector.broadcast %cst_82 : f32 to vector<8x64xf32>
    %145 = arith.maximumf %143, %144 : vector<8x64xf32>
    %c0_83 = arith.constant 0 : index
    %c0_84 = arith.constant 0 : index
    %146 = vector.load %arg20[%c0_83, %c0_84] : memref<64x64xf32, #tpu.memory_space<vmem>>, vector<64x64xf32>
    %cst_85 = arith.constant dense<0.000000e+00> : vector<8x64xf32>
    %147 = tpu.matmul %145, %146, %cst_85 {dimension_numbers = #tpu.dot_dimension_numbers<[1], [0], [0], [1], [0, 0, 1, 1], [], []>} : vector<8x64xf32>, vector<64x64xf32>, vector<8x64xf32> -> vector<8x64xf32>
    %c0_86 = arith.constant 0 : index
    %c0_87 = arith.constant 0 : index
    %148 = vector.load %arg21[%c0_86, %c0_87] : memref<1x64xf32, #tpu.memory_space<vmem>>, vector<1x64xf32>
    %149 = vector.broadcast %148 : vector<1x64xf32> to vector<8x64xf32>
    %150 = arith.addf %147, %149 : vector<8x64xf32>
    %cst_88 = arith.constant 0.000000e+00 : f32
    %151 = vector.broadcast %cst_88 : f32 to vector<8x64xf32>
    %152 = arith.maximumf %150, %151 : vector<8x64xf32>
    %c0_89 = arith.constant 0 : index
    %c0_90 = arith.constant 0 : index
    %153 = vector.load %arg22[%c0_89, %c0_90] : memref<64x25xf32, #tpu.memory_space<vmem>>, vector<64x25xf32>
    %cst_91 = arith.constant dense<0.000000e+00> : vector<8x25xf32>
    %154 = tpu.matmul %152, %153, %cst_91 {dimension_numbers = #tpu.dot_dimension_numbers<[1], [0], [0], [1], [0, 0, 1, 1], [], []>} : vector<8x64xf32>, vector<64x25xf32>, vector<8x25xf32> -> vector<8x25xf32>
    %c0_92 = arith.constant 0 : index
    %c0_93 = arith.constant 0 : index
    %155 = vector.load %arg23[%c0_92, %c0_93] : memref<1x25xf32, #tpu.memory_space<vmem>>, vector<1x25xf32>
    %156 = vector.broadcast %155 : vector<1x25xf32> to vector<8x25xf32>
    %157 = arith.addf %154, %156 : vector<8x25xf32>
    %158 = vector.extract_strided_slice %157 {offsets = [0, 0], sizes = [8, 8], strides = [1, 1]} : vector<8x25xf32> to vector<8x8xf32>
    %c0_94 = arith.constant 0 : index
    %c0_95 = arith.constant 0 : index
    %c0_96 = arith.constant 0 : index
    %159 = vector.load %arg24[%c0_94, %c0_95, %c0_96] : memref<1x8x8xf32, #tpu.memory_space<vmem>>, vector<1x8x8xf32>
    %160 = vector.shape_cast %159 : vector<1x8x8xf32> to vector<8x8xf32>
    %161 = vector.shape_cast %158 : vector<8x8xf32> to vector<1x8x8xf32>
    tpu.vector_store %arg24[%c0_94, %c0_95, %c0_96], %161 {strides = array<i32>} : memref<1x8x8xf32, #tpu.memory_space<vmem>>, vector<1x8x8xf32>,
    %162 = vector.extract_strided_slice %157 {offsets = [0, 8], sizes = [8, 16], strides = [1, 1]} : vector<8x25xf32> to vector<8x16xf32>
    %163 = vector.extract_strided_slice %157 {offsets = [0, 24], sizes = [8, 1], strides = [1, 1]} : vector<8x25xf32> to vector<8x1xf32>
    %c0_97 = arith.constant 0 : index
    %c0_98 = arith.constant 0 : index
    %c0_99 = arith.constant 0 : index
    %164 = vector.load %arg26[%c0_97, %c0_98, %c0_99] : memref<1x8x1xf32, #tpu.memory_space<vmem>>, vector<1x8x1xf32>
    %165 = vector.shape_cast %164 : vector<1x8x1xf32> to vector<8x1xf32>
    %166 = vector.shape_cast %163 : vector<8x1xf32> to vector<1x8x1xf32>
    tpu.vector_store %arg26[%c0_97, %c0_98, %c0_99], %166 {strides = array<i32>} : memref<1x8x1xf32, #tpu.memory_space<vmem>>, vector<1x8x1xf32>,
    %c0_100 = arith.constant 0 : index
    %c0_101 = arith.constant 0 : index
    %c0_102 = arith.constant 0 : index
    %167 = vector.load %arg3[%c0_100, %c0_101, %c0_102] : memref<1x16x256xf32, #tpu.memory_space<vmem>>, vector<1x16x256xf32>
    %168 = vector.shape_cast %167 : vector<1x16x256xf32> to vector<16x256xf32>
    %cst_103 = arith.constant dense<0.000000e+00> : vector<8x256xf32>
    %169 = tpu.matmul %162, %168, %cst_103 {dimension_numbers = #tpu.dot_dimension_numbers<[1], [0], [0], [1], [0, 0, 1, 1], [], []>} : vector<8x16xf32>, vector<16x256xf32>, vector<8x256xf32> -> vector<8x256xf32>
    %c0_104 = arith.constant 0 : index
    %c0_105 = arith.constant 0 : index
    %c0_106 = arith.constant 0 : index
    %170 = vector.load %arg25[%c0_104, %c0_105, %c0_106] : memref<1x8x256xf32, #tpu.memory_space<vmem>>, vector<1x8x256xf32>
    %171 = vector.shape_cast %170 : vector<1x8x256xf32> to vector<8x256xf32>
    %172 = vector.shape_cast %169 : vector<8x256xf32> to vector<1x8x256xf32>
    tpu.vector_store %arg25[%c0_104, %c0_105, %c0_106], %172 {strides = array<i32>} : memref<1x8x256xf32, #tpu.memory_space<vmem>>, vector<1x8x256xf32>,
    return
  }
  func.func @transform_0(%arg0: i32) -> (i32, i32, i32) {
    %c0_i32 = arith.constant 0 : i32
    %c0_i32_0 = arith.constant 0 : i32
    %c0_i32_1 = arith.constant 0 : i32
    return %arg0, %c0_i32, %c0_i32_0 : i32, i32, i32
  }
  func.func @transform_1(%arg0: i32) -> (i32, i32, i32) {
    %c0_i32 = arith.constant 0 : i32
    %c0_i32_0 = arith.constant 0 : i32
    %c0_i32_1 = arith.constant 0 : i32
    return %arg0, %c0_i32, %c0_i32_0 : i32, i32, i32
  }
  func.func @transform_2(%arg0: i32) -> (i32, i32, i32) {
    %c0_i32 = arith.constant 0 : i32
    %c0_i32_0 = arith.constant 0 : i32
    %c0_i32_1 = arith.constant 0 : i32
    return %arg0, %c0_i32, %c0_i32_0 : i32, i32, i32
  }
  func.func @transform_3(%arg0: i32) -> (i32, i32) {
    %c0_i32 = arith.constant 0 : i32
    %c0_i32_0 = arith.constant 0 : i32
    %c0_i32_1 = arith.constant 0 : i32
    return %c0_i32, %c0_i32_0 : i32, i32
  }
  func.func @transform_4(%arg0: i32) -> (i32, i32) {
    %c0_i32 = arith.constant 0 : i32
    %c0_i32_0 = arith.constant 0 : i32
    %c0_i32_1 = arith.constant 0 : i32
    return %c0_i32, %c0_i32_0 : i32, i32
  }
  func.func @transform_5(%arg0: i32) -> (i32, i32) {
    %c0_i32 = arith.constant 0 : i32
    %c0_i32_0 = arith.constant 0 : i32
    %c0_i32_1 = arith.constant 0 : i32
    return %c0_i32, %c0_i32_0 : i32, i32
  }
  func.func @transform_6(%arg0: i32) -> (i32, i32) {
    %c0_i32 = arith.constant 0 : i32
    %c0_i32_0 = arith.constant 0 : i32
    %c0_i32_1 = arith.constant 0 : i32
    return %c0_i32, %c0_i32_0 : i32, i32
  }
  func.func @transform_7(%arg0: i32) -> (i32, i32) {
    %c0_i32 = arith.constant 0 : i32
    %c0_i32_0 = arith.constant 0 : i32
    %c0_i32_1 = arith.constant 0 : i32
    return %c0_i32, %c0_i32_0 : i32, i32
  }
  func.func @transform_8(%arg0: i32) -> (i32, i32) {
    %c0_i32 = arith.constant 0 : i32
    %c0_i32_0 = arith.constant 0 : i32
    %c0_i32_1 = arith.constant 0 : i32
    return %c0_i32, %c0_i32_0 : i32, i32
  }
  func.func @transform_9(%arg0: i32) -> (i32, i32) {
    %c0_i32 = arith.constant 0 : i32
    %c0_i32_0 = arith.constant 0 : i32
    %c0_i32_1 = arith.constant 0 : i32
    return %c0_i32, %c0_i32_0 : i32, i32
  }
  func.func @transform_10(%arg0: i32) -> (i32, i32) {
    %c0_i32 = arith.constant 0 : i32
    %c0_i32_0 = arith.constant 0 : i32
    %c0_i32_1 = arith.constant 0 : i32
    return %c0_i32, %c0_i32_0 : i32, i32
  }
  func.func @transform_11(%arg0: i32) -> (i32, i32) {
    %c0_i32 = arith.constant 0 : i32
    %c0_i32_0 = arith.constant 0 : i32
    %c0_i32_1 = arith.constant 0 : i32
    return %c0_i32, %c0_i32_0 : i32, i32
  }
  func.func @transform_12(%arg0: i32) -> (i32, i32) {
    %c0_i32 = arith.constant 0 : i32
    %c0_i32_0 = arith.constant 0 : i32
    %c0_i32_1 = arith.constant 0 : i32
    return %c0_i32, %c0_i32_0 : i32, i32
  }
  func.func @transform_13(%arg0: i32) -> (i32, i32) {
    %c0_i32 = arith.constant 0 : i32
    %c0_i32_0 = arith.constant 0 : i32
    %c0_i32_1 = arith.constant 0 : i32
    return %c0_i32, %c0_i32_0 : i32, i32
  }
  func.func @transform_14(%arg0: i32) -> (i32, i32) {
    %c0_i32 = arith.constant 0 : i32
    %c0_i32_0 = arith.constant 0 : i32
    %c0_i32_1 = arith.constant 0 : i32
    return %c0_i32, %c0_i32_0 : i32, i32
  }
  func.func @transform_15(%arg0: i32) -> (i32, i32) {
    %c0_i32 = arith.constant 0 : i32
    %c0_i32_0 = arith.constant 0 : i32
    %c0_i32_1 = arith.constant 0 : i32
    return %c0_i32, %c0_i32_0 : i32, i32
  }
  func.func @transform_16(%arg0: i32) -> (i32, i32) {
    %c0_i32 = arith.constant 0 : i32
    %c0_i32_0 = arith.constant 0 : i32
    %c0_i32_1 = arith.constant 0 : i32
    return %c0_i32, %c0_i32_0 : i32, i32
  }
  func.func @transform_17(%arg0: i32) -> (i32, i32) {
    %c0_i32 = arith.constant 0 : i32
    %c0_i32_0 = arith.constant 0 : i32
    %c0_i32_1 = arith.constant 0 : i32
    return %c0_i32, %c0_i32_0 : i32, i32
  }
  func.func @transform_18(%arg0: i32) -> (i32, i32) {
    %c0_i32 = arith.constant 0 : i32
    %c0_i32_0 = arith.constant 0 : i32
    %c0_i32_1 = arith.constant 0 : i32
    return %c0_i32, %c0_i32_0 : i32, i32
  }
  func.func @transform_19(%arg0: i32) -> (i32, i32) {
    %c0_i32 = arith.constant 0 : i32
    %c0_i32_0 = arith.constant 0 : i32
    %c0_i32_1 = arith.constant 0 : i32
    return %c0_i32, %c0_i32_0 : i32, i32
  }
  func.func @transform_20(%arg0: i32) -> (i32, i32) {
    %c0_i32 = arith.constant 0 : i32
    %c0_i32_0 = arith.constant 0 : i32
    %c0_i32_1 = arith.constant 0 : i32
    return %c0_i32, %c0_i32_0 : i32, i32
  }
  func.func @transform_21(%arg0: i32) -> (i32, i32) {
    %c0_i32 = arith.constant 0 : i32
    %c0_i32_0 = arith.constant 0 : i32
    %c0_i32_1 = arith.constant 0 : i32
    return %c0_i32, %c0_i32_0 : i32, i32
  }
  func.func @transform_22(%arg0: i32) -> (i32, i32) {
    %c0_i32 = arith.constant 0 : i32
    %c0_i32_0 = arith.constant 0 : i32
    %c0_i32_1 = arith.constant 0 : i32
    return %c0_i32, %c0_i32_0 : i32, i32
  }
  func.func @transform_23(%arg0: i32) -> (i32, i32, i32) {
    %c0_i32 = arith.constant 0 : i32
    %c0_i32_0 = arith.constant 0 : i32
    %c0_i32_1 = arith.constant 0 : i32
    return %arg0, %c0_i32, %c0_i32_0 : i32, i32, i32
  }
  func.func @transform_24(%arg0: i32) -> (i32, i32, i32) {
    %c0_i32 = arith.constant 0 : i32
    %c0_i32_0 = arith.constant 0 : i32
    %c0_i32_1 = arith.constant 0 : i32
    return %arg0, %c0_i32, %c0_i32_0 : i32, i32, i32
  }
  func.func @transform_25(%arg0: i32) -> (i32, i32, i32) {
    %c0_i32 = arith.constant 0 : i32
    %c0_i32_0 = arith.constant 0 : i32
    %c0_i32_1 = arith.constant 0 : i32
    return %arg0, %c0_i32, %c0_i32_0 : i32, i32, i32
  }
}

</mosaic_0001>

<bundles_post_ra>
// kernel: calibnet_decoder_forward.1
= control target key start
LH: loop header
LB: loop body
LE: loop exit
PB: predicated region body
PF: predicated region fallthrough
CT: control target
= control target key end

     0   :  { %s5454_s0 = inlined_call_operand.vmem [shape: f32[2,8,384], index: 0, kind: input, shape index: {}]   ;;  %s5455_s1 = inlined_call_operand.vmem [shape: f32[2,8,384], index: 1, kind: input, shape index: {}]   ;;  %s5456_s2 = inlined_call_operand.vmem [shape: f32[2,16,256], index: 2, kind: input, shape index: {}]   ;;  %s5457_s3 = inlined_call_operand.vmem [shape: f32[8,384], index: 3, kind: input, shape index: {}]   ;;  %s5458_s4 = inlined_call_operand.vmem [shape: f32[1,384], index: 4, kind: input, shape index: {}]   ;;  %s5459_s5 = inlined_call_operand.vmem [shape: f32[1,6], index: 5, kind: input, shape index: {}]   ;;  %s5460_s6 = inlined_call_operand.<no memory space> [shape: f32[1,1], index: 6, kind: input, shape index: {}]   ;;  %s5461_s7 = inlined_call_operand.vmem [shape: f32[1,6], index: 7, kind: input, shape index: {}]   ;;  %s5462_s9 = inlined_call_operand.vmem [shape: f32[16,72], index: 9, kind: input, shape index: {}]   ;;  %s5463_s10 = inlined_call_operand.vmem [shape: f32[16,1], index: 10, kind: input, shape index: {}]   ;;  %s5464_s11 = inlined_call_operand.vmem [shape: f32[16,72], index: 11, kind: input, shape index: {}]   ;;  %s5465_s12 = inlined_call_operand.vmem [shape: f32[16,1], index: 12, kind: input, shape index: {}]   ;;  %s5466_s13 = inlined_call_operand.vmem [shape: f32[32,144], index: 13, kind: input, shape index: {}]   ;;  %s5467_s14 = inlined_call_operand.vmem [shape: f32[32,1], index: 14, kind: input, shape index: {}]   ;;  %s5468_s15 = inlined_call_operand.vmem [shape: f32[32,144], index: 15, kind: input, shape index: {}]   ;;  %s5469_s16 = inlined_call_operand.vmem [shape: f32[32,1], index: 16, kind: input, shape index: {}]   ;;  %s5470_s17 = inlined_call_operand.vmem [shape: f32[8,16], index: 17, kind: input, shape index: {}]   ;;  %s5471_s18 = inlined_call_operand.vmem [shape: f32[8,1], index: 18, kind: input, shape index: {}]   ;;  %s5472_s19 = inlined_call_operand.vmem [shape: f32[64,64], index: 19, kind: input, shape index: {}]   ;;  %s5473_s20 = inlined_call_operand.vmem [shape: f32[1,64], index: 20, kind: input, shape index: {}]   ;;  %s5474_s21 = inlined_call_operand.vmem [shape: f32[64,25], index: 21, kind: input, shape index: {}]   ;;  %s5475_s22 = inlined_call_operand.vmem [shape: f32[1,25], index: 22, kind: input, shape index: {}]   ;;  %s5476_s23 = inlined_call_operand.hbm [shape: f32[2,8,8], index: 23, kind: output, shape index: {0}]   ;;  %s5477_s24 = inlined_call_operand.vmem [shape: f32[2,8,256], index: 24, kind: output, shape index: {1}]   ;;  %s5478_s25 = inlined_call_operand.vmem [shape: f32[2,8,1], index: 25, kind: output, shape index: {2}]   ;;  %s5479_s8 = inlined_call_operand.<no memory space> [shape: f32[1,1], index: 8, kind: input, shape index: {}]  }
   0x1   :  { %5509 = sst [smem:[#allocation13_spill]] %s5454_s0  ;;  %v33_v1 = vstv %s5479_s8 }
   0x2   :  { %5510 = sst [smem:[#allocation14_spill]] %s5455_s1  ;;  %34 = vst [vmem:[#allocation3] sm:$0x1] %v33_v1 }
   0x3   :  { %5511 = sst [smem:[#allocation15_spill]] %s5456_s2 }
   0x4   :  { %5512 = sst [smem:[#allocation16_spill]] %s5457_s3 }
   0x5   :  { %5513 = sst [smem:[#allocation17_spill]] %s5458_s4 }
   0x6   :  { %5514 = sst [smem:[#allocation18_spill]] %s5459_s5 }
   0x7   :  { %5515 = sst [smem:[#allocation19_spill]] %s5460_s6 }
   0x8   :  { %5516 = sst [smem:[#allocation20_spill]] %s5461_s7 }
   0x9   :  { %5517 = sst [smem:[#allocation21_spill]] %s5462_s9 }
   0xa   :  { %5518 = sst [smem:[#allocation22_spill]] %s5463_s10 }
   0xb   :  { %5519 = sst [smem:[#allocation23_spill]] %s5476_s23 }
   0xc   :  { %5520 = sst [smem:[#allocation24_spill]] %s5477_s24 }
   0xd   :  { %s5521_s6 = sld [smem:[#allocation19_spill]] }
  0x13   :  { %v31_v0 = vstv %s5521_s6 }
  0x14   :  { %32 = vst [vmem:[#allocation2] sm:$0x1] %v31_v0 }
  0x15   :  { %35 = vsyncpa [#allocation5], 0 }
  0x16   :  { %37 = vsyncpa [#allocation5 + $0x1], 0  ;;  %s4144_s3 = smov 0   ;;  %s4146_s26 = smov 0  }
  0x17   :  { %s4148_s1 = smov 0   ;;  %s4150_s9 = smov 0  }
  0x18 LB: > { %5522 = sst [smem:[#allocation7_spill]] %s3977_s3  ;;  %s4165_s8 = sadd.s32 4294967295, %s3989_s9   ;;  %s3989_s9 = sphi %s4150_s9, %s5553_s9   ;;  %s3985_s1 = sphi %s4148_s1, %s5555_s1   ;;  %s3981_s26 = sphi %s4146_s26, %s5557_s26   ;;  %s3977_s3 = sphi %s4144_s3, %s5556_s3  }
  0x19   : > { %5523 = sst [smem:[#allocation8_spill]] %s3985_s1  ;;  %s3501_s27 = sadd.s32 4294967294, %s3989_s9  }
  0x1a   : > { %5524 = sst [smem:[#allocation9_spill]] %s3989_s9  ;;  %s4169_s4 = sadd.s32 1, %s3989_s9  }
  0x1b   : > { %5525 = sst [smem:[#allocation10_spill]] %s4169_s4  ;;  %s548_s28 = sadd.s32 1, %s3985_s1 }
  0x1c   : > { %s545_s10 = ssub.s32 %s3989_s9, %s4169_s4  ;;  %p558_p0 = scmp.ne.s32.totalorder %s3985_s1, %s3981_s26 }
  0x1d   : > { %p546_p1 = scmp.eq.s32.totalorder %s545_s10, 0  ;;  %p559_p2 = scmp.eq.s32.totalorder %s4165_s8, 1 }
  0x1e   : > { %p564_p3 = scmp.ne.s32.totalorder %s3981_s26, %s3977_s3  ;;  %p565_p4 = scmp.eq.s32.totalorder %s3501_s27, 1 }
  0x1f   : > { %s4180_s5 = scalar_select %p546_p1, %s3985_s1, %s548_s28  }
  0x20   : > { %p4182_p5 = por %p559_p2, %p558_p0  ;;  %p4186_p6 = por %p565_p4, %p564_p3 }
  0x21   : > { %5526 = sst [smem:[#allocation11_spill]] %s4180_s5  ;;  %p3504_p7 = scmp.ge.s32.totalorder %s3989_s9, 1 }
  0x22   : > { %s5528_s29 = scalar_select %p4186_p6, 1, 0 }
  0x23   : > { %p719_p8 = scmp.lt.s32.totalorder %s3989_s9, 3 }
  0x24   : > { %5529 = sst [smem:[#allocation12_spill]] %s5528_s29 }
  0x25   : > { %p720_p9 = pnand %p3504_p7, %p719_p8 }
  0x26   : > { %p806_p10 = scmp.lt.s32.totalorder (!%p720_p9), %s4165_s8, 1  ;;  %s5530_s27 = sld [smem:[#allocation13_spill]] (!%p720_p9) }
  0x27   : > { %723 = sbr.rel (%p720_p9) target bundleno = 2645 (0xa55), region = 112  ;;  %s5531_s1 = sld [smem:[#allocation18_spill]] (!%p720_p9) }
  0x28   : > { %s5532_s3 = sld [smem:[#allocation14_spill]] (!%p720_p9)  ;;  %s5503_s5 = smov (!%p720_p9), 110  }
  0x29   : > { %s5533_s4 = sld [smem:[#allocation20_spill]] (!%p720_p9)  ;;  %s5499_s7 = smov (!%p720_p9), 127  }
  0x2a   : > { %s5534_s30 = sld [smem:[#allocation17_spill]] (!%p720_p9)  ;;  %s5493_s10 = smov (!%p720_p9), 17  }
  0x2b   : > { %s5536_s29 = sld [smem:[#allocation16_spill]] (!%p720_p9)  ;;  %s4003_s24 = smov (!%p720_p9), 32  }
  0x2c   : > { %v3991_v2 = vmov 0.0   ;;  %vm3992_vm0 = vmmov 0   ;;  %v841_v3 = vld [vmem:[#allocation2] sm:$0x1]  ;;  %s4197_s2 = scalar_select %p806_p10, %s4165_s8, 1  ;;  %v3993_v4 = vmov 0   ;;  %v847_v14 = vlaneseq }
  0x2d   : > { %3640 = vmatprep.subr.mxu1 %v3991_v2  ;;  %3642 = vmatprep.mubr.msk.f32.mxu1 %vm3992_vm0, %v3991_v2  ;;  %v1026_v5 = vld [vmem:[#allocation3] sm:$0x1]  ;;  %vm855_vm1 = vcmask 1045504   ;;  %v840_v6 = vld [vmem:[%s5531_s1] sm:$0x1]  ;;  %vm851_vm2 = vcmask 48128  }
  0x2e   : > { %929 = vmatprep.mubr.f32.mxu0 %v3991_v2  ;;  %3809 = vset.pattern.permute.xlu0 %v3993_v4  ;;  %s3753_s6 = smul.u32 24, %s4197_s2  ;;  %v4254_v16 = vand.u32 127, %v847_v14  ;;  %v848_v19 = vshrl.u32 %v847_v14, 7  ;;  %vm1195_vm4 = vcmask 1040384   ;;  %s5489_s1 = smov 19   ;;  %vm1358_vm5 = vcmask 588800  }
  0x2f   : > { %844 = vperm.xlu0 %3809, %v841_v3   ;;  %3810 = vset.pattern.permute.xlu1 %v3993_v4  ;;  %v1025_v13 = vld [vmem:[%s5533_s4] sm:$0x1]  ;;  %s4006_s23 = smov 120  }
  0x30   : > { %s810_s28 = scalar_lea.vmem %s5530_s27, %s3753_s6  ;;  %s815_s9 = scalar_lea.vmem %s5532_s3, %s3753_s6  ;;  %vm1344_vm3 = vcmp.lt.s32.totalorder %v4254_v16, 109  ;;  %v4263_v21 = vsub.s32 0, %v848_v19  ;;  %v1017_v22 = vsub.s32 2, %v848_v19  ;;  %v836_v23 = vld [vmem:[%s5534_s30] sm:$0x7]  ;;  %v1013_v24 = vsub.s32 1, %v848_v19 }
  0x31   : > { %v4210_v7 = vld [vmem:[%s810_s28 + $0x8] sm:$0xff]  ;;  %v4212_v8 = vld [vmem:[%s810_s28 + $0x10] sm:$0xff]  ;;  %v4214_v9 = vld [vmem:[%s810_s28] sm:$0xff]  ;;  %s5495_s27 = smov 1   ;;  %s5501_s28 = smov 111   ;;  %vm1334_vm6 = vcmp.lt.s32.totalorder %v4254_v16, 110 }
  0x32   : > { %3513 = vmatprep.subr.msk.mxu0 %vm855_vm1, %v4210_v7  ;;  %3641 = vmatpush3.msk.msra.mxu1 %vm855_vm1, %v4212_v8  ;;  %v4220_v10 = vld [vmem:[%s815_s9 + $0x8] sm:$0xff]  ;;  %v4222_v11 = vld [vmem:[%s815_s9 + $0x10] sm:$0xff]  ;;  %v4227_v12 = vld [vmem:[%s815_s9] sm:$0xff]  ;;  %s5497_s9 = smov 109   ;;  %v4269_v27 = vrot.slane %v836_v23, %v1017_v22  ;;  %v4272_v28 = vrot.slane %v836_v23, %v4263_v21  ;;  %v4275_v33 = vrot.slane %v836_v23, %v1013_v24  ;;  %s5491_s3 = smov 18   ;;  %vm1324_vm11 = vcmp.lt.s32.totalorder %v4254_v16, 111 }
  0x33   : > { %1029 = vperm.xlu0 %3809, %v1026_v5   ;;  %3514 = vmatpush1.msk.msra.mxu0 %vm855_vm1, %v4214_v9  ;;  %s5535_s6 = sld [smem:[#allocation21_spill]]  ;;  %vm1314_vm12 = vcmp.lt.s32.totalorder %v4254_v16, 127  ;;  %vm1304_vm13 = vcmp.lt.s32.totalorder %v4254_v16, 1  ;;  %vm1294_vm14 = vcmp.lt.s32.totalorder %v4254_v16, 17  ;;  %vm1284_vm15 = vcmp.lt.s32.totalorder %v4254_v16, 18  ;;  %s790_s30 = sand.u32 1, %s3981_s26  }
  0x34   : > { %3643 = vmatmul.mubr.msk.f32.vlgmr.msra.gmra.mxu1 %vm851_vm2, %v840_v6  ;;  %3515 = vmatmul.mubr.msk.f32.vlgmr.msra.gmra.mxu0 %vm851_vm2, %v840_v6  ;;  %s3505_s4 = sshll.u32 %s790_s30, 3 }
  0x35   : > { %3645 = vmatprep.subr.mxu1 %v3991_v2  ;;  %3518 = vmatprep.subr.msk.mxu0 %vm855_vm1, %v4220_v10 }
  0x36   : > { %3646 = vmatpush3.msk.msra.mxu1 %vm855_vm1, %v4222_v11  ;;  %3647 = vmatprep.mubr.msk.f32.mxu1 %vm3992_vm0, %v3991_v2 }
  0x37   : > { %3519 = vmatpush1.msk.msra.mxu0 %vm855_vm1, %v4227_v12  ;;  %1112 = vmatprep.mubr.f32.mxu0 %v3991_v2  ;;  %vm1274_vm1 = vcmp.lt.s32.totalorder %v4254_v16, 19  ;;  %v2234_v16 = vld [vmem:[%s5468_s15 + $0x10] sm:$0xff] }
  0x38   : > { %3648 = vmatmul.mubr.msk.f32.vlgmr.msra.gmra.mxu1 %vm851_vm2, %v1025_v13  ;;  %3520 = vmatmul.mubr.msk.f32.vlgmr.msra.gmra.mxu0 %vm851_vm2, %v1025_v13  ;;  %vm1961_vm2 = vcmask 130048  }
  0x39   : > { %1340 = vrot.lane.b32.xlu1 %v4210_v7, %s5497_s9  ;;  %1328 = vrot.lane.b32.xlu0 %v4214_v9, %s5503_s5  ;;  %v4335_v22 = vld [vmem:[%s5535_s6] sm:$0xff] }
  0x3a   : > { %1429 = vmatprep.mubr.f32.mxu0 %v3991_v2  ;;  %3668 = vmatprep.mubr.msk.f32.mxu1 %vm1358_vm5, %v4335_v22 }
  0x3d   : > { %1342 = vrot.lane.b32.xlu1 %v4212_v8, %s5497_s9 }
  0xaa   : > { %v845_v20 = vpop.permute.xlu0 %844 }
  0xab   : > { %v4252_v15 = vpop.permute.xlu1 %1340  ;;  %v850_v25 = vrot.slane %v845_v20, %v4263_v21 }
  0xae   : > { %v1030_v26 = vpop.permute.xlu0 %1029 }
  0xaf   : > { %v4257_v17 = vpop.permute.xlu1 %1342  ;;  %v1035_v31 = vrot.slane %v1030_v26, %v4263_v21 }
  0xb0   : > { %v1345_v18 = vsel %vm1344_vm3, %v4252_v15, %v4257_v17 }
  0xb1   : > { %1379 = vmatprep.subr.mxu0 %v1345_v18 }
  0xf4   : > { %v1002_v29 = vpop.f32.mrf.mxu1  ;;  %v931_v32 = vpop.f32.mrf.mxu0 }
  0xf5   : > { %v1003_v30 = vadd.f32 %v1002_v29, %v850_v25  ;;  %v932_v34 = vadd.f32 %v931_v32, %v850_v25  ;;  %v1329_v32 = vpop.permute.xlu0 %1328 }
  0xf6   : > { %v3644_v35 = vpop.f32.mrf.mxu1  ;;  %v933_v37 = vpop.f32.mrf.mxu0 }
  0xf7   : > { %v1024_v36 = vmul.f32 %v4269_v27, %v1003_v30  ;;  %v1022_v38 = vmul.f32 %v4272_v28, %v932_v34  ;;  %v934_v39 = vadd.f32 %v933_v37, %v850_v25 }
  0xf8   : > { %v1185_v40 = vpop.f32.mrf.mxu1  ;;  %v1114_v42 = vpop.f32.mrf.mxu0 }
  0xf9   : > { %v1186_v41 = vadd.f32 %v1185_v40, %v1035_v31  ;;  %v1203_v43 = vmul.f32 %v1022_v38, %v1022_v38  ;;  %v1023_v44 = vmul.f32 %v4275_v33, %v934_v39  ;;  %v1115_v45 = vadd.f32 %v1114_v42, %v1035_v31 }
  0xfa   : > { %v3649_v46 = vpop.f32.mrf.mxu1  ;;  %v1116_v47 = vpop.f32.mrf.mxu0  ;;  %v1205_v48 = vmul.f32 %v1024_v36, %v1024_v36 }
  0xfb   : > { %v1204_v49 = vmul.f32 %v1023_v44, %v1023_v44  ;;  %v1191_v50 = vmul.f32 %v1186_v41, %v4269_v27  ;;  %v1189_v51 = vmul.f32 %v1115_v45, %v4272_v28  ;;  %v1117_v52 = vadd.f32 %v1116_v47, %v1035_v31 }
  0xfc   : > { %v1206_v53 = vsel %vm1195_vm4, %v1203_v43, 0.0  ;;  %v1209_v59 = vsel %vm1195_vm4, %v1205_v48, 0.0 }
  0xfd   : > { %v1192_v54 = vmul.f32 %v1189_v51, %v1022_v38  ;;  %v1221_v55 = vmul.f32 %v1189_v51, %v1189_v51  ;;  %v1190_v56 = vmul.f32 %v1117_v52, %v4275_v33  ;;  %v1207_v57 = vsel %vm1195_vm4, %v1204_v49, 0.0 }
  0xfe   : > { %v1208_v58 = vadd.f32 %v1207_v57, %v1206_v53  ;;  %v1223_v62 = vmul.f32 %v1191_v50, %v1191_v50  ;;  %v1194_v63 = vmul.f32 %v1191_v50, %v1024_v36 }
  0xff   : > { %v1193_v60 = vmul.f32 %v1190_v56, %v1023_v44  ;;  %v1222_v61 = vmul.f32 %v1190_v56, %v1190_v56  ;;  %v1224_v1 = vsel %vm1195_vm4, %v1221_v55, 0.0  ;;  %v1196_v4 = vsel %vm1195_vm4, %v1192_v54, 0.0 }
 0x100   : > { %v1210_v0 = vadd.f32 %v1209_v59, %v1208_v58  ;;  %v1227_v14 = vsel %vm1195_vm4, %v1223_v62, 0.0  ;;  %v1199_v18 = vsel %vm1195_vm4, %v1194_v63, 0.0 }
 0x101   : > { %v1225_v3 = vsel %vm1195_vm4, %v1222_v61, 0.0  ;;  %v1197_v5 = vsel %vm1195_vm4, %v1193_v60, 0.0  ;;  %vm2989_vm4 = vcmask 392192  }
 0x102   : > { %1211 = vadd.xlane.f32.xlu1 %v1210_v0  ;;  %v1226_v6 = vadd.f32 %v1225_v3, %v1224_v1  ;;  %v1198_v13 = vadd.f32 %v1197_v5, %v1196_v4 }
 0x104   : > { %v1228_v19 = vadd.f32 %v1227_v14, %v1226_v6  ;;  %v1200_v20 = vadd.f32 %v1199_v18, %v1198_v13 }
 0x106   : > { %1229 = vadd.xlane.f32.xlu1 %v1228_v19  ;;  %1201 = vadd.xlane.f32.xlu0 %v1200_v20  ;;  %v838_v19 = vld [vmem:[%s5536_s29 + $0x8] sm:$0xff]  ;;  %v839_v20 = vld [vmem:[%s5536_s29 + $0x10] sm:$0xff] }
 0x117   : > { %1338 = vrot.lane.b32.xlu1 %v4214_v9, %s5497_s9 }
 0x11b   : > { %1330 = vrot.lane.b32.xlu1 %v4210_v7, %s5503_s5 }
 0x11c   : > { %1308 = vrot.lane.b32.xlu0 %v4214_v9, %s5499_s7 }
 0x11f   : > { %1332 = vrot.lane.b32.xlu1 %v4212_v8, %s5503_s5 }
 0x120   : > { %1300 = vrot.lane.b32.xlu0 %v4210_v7, %s5495_s27 }
 0x123   : > { %1320 = vrot.lane.b32.xlu1 %v4210_v7, %s5501_s28 }
 0x124   : > { %1288 = vrot.lane.b32.xlu0 %v4214_v9, %s5493_s10 }
 0x127   : > { %1322 = vrot.lane.b32.xlu1 %v4212_v8, %s5501_s28 }
 0x128   : > { %1292 = vrot.lane.b32.xlu0 %v4212_v8, %s5493_s10 }
 0x12b   : > { %1318 = vrot.lane.b32.xlu1 %v4214_v9, %s5501_s28 }
 0x12c   : > { %1280 = vrot.lane.b32.xlu0 %v4210_v7, %s5491_s3 }
 0x12f   : > { %1310 = vrot.lane.b32.xlu1 %v4210_v7, %s5499_s7 }
 0x130   : > { %1266 = vrot.lane.b32.xlu0 %v4214_v9, %s5489_s1 }
 0x133   : > { %1312 = vrot.lane.b32.xlu1 %v4212_v8, %s5499_s7 }
 0x134   : > { %1270 = vrot.lane.b32.xlu0 %v4212_v8, %s5489_s1 }
 0x137   : > { %1298 = vrot.lane.b32.xlu1 %v4214_v9, %s5495_s27 }
 0x13b   : > { %1302 = vrot.lane.b32.xlu1 %v4212_v8, %s5495_s27  ;;  %s5539_s27 = smov 18  }
 0x13f   : > { %1290 = vrot.lane.b32.xlu1 %v4210_v7, %s5493_s10  ;;  %s5540_s10 = smov 19  }
 0x143   : > { %1278 = vrot.lane.b32.xlu1 %v4214_v9, %s5491_s3 }
 0x147   : > { %1282 = vrot.lane.b32.xlu1 %v4212_v8, %s5491_s3  ;;  %s5537_s3 = smov 1  }
 0x14b   : > { %1268 = vrot.lane.b32.xlu1 %v4210_v7, %s5489_s1  ;;  %s5538_s1 = smov 17  }
 0x18b   : > { %v1212_v23 = vpop.xlane.xlu1 %1211 }
 0x18c   : > { %3811 = vrsqrt.f32 %v1212_v23  ;;  %vm1215_vm7 = vcmp.eq.f32.partialorder %v1212_v23, inf  ;;  %vm1217_vm8 = vcmp.eq.f32.partialorder %v1212_v23, 0.0 }
 0x18f   : > { %v1230_v24 = vpop.xlane.xlu1 %1229  ;;  %v1202_v39 = vpop.xlane.xlu0 %1201 }
 0x190   : > { %3813 = vrsqrt.f32 %v1230_v24  ;;  %vm1233_vm9 = vcmp.eq.f32.partialorder %v1230_v24, inf  ;;  %v1236_v43 = vand.u32 2147483648, %v1230_v24  ;;  %vm1235_vm10 = vcmp.eq.f32.partialorder %v1230_v24, 0.0 }
 0x193   : > { %v1339_v25 = vpop.permute.xlu1 %1338  ;;  %v1309_v47 = vpop.permute.xlu0 %1308 }
 0x194   : > { %v1346_v26 = vsel %vm1344_vm3, %v1339_v25, %v4252_v15  ;;  %v1347_v29 = vsel %vm1344_vm3, %v4257_v17, %v1339_v25  ;;  %v1218_v17 = vand.u32 2147483648, %v1212_v23 }
 0x195   : > { %1380 = vmatpush1.msra.mxu0 %v1346_v26  ;;  %3650 = vmatprep.subr.mxu1 %v1347_v29  ;;  %v837_v26 = vld [vmem:[%s5536_s29] sm:$0xff] }
 0x196   : > { %3651 = vmatpush3.msra.mxu1 %v1347_v29 }
 0x197   : > { %v1331_v30 = vpop.permute.xlu1 %1330  ;;  %v1301_v54 = vpop.permute.xlu0 %1300 }
 0x198   : > { %v1336_v40 = vsel %vm1334_vm6, %v1329_v32, %v1331_v30 }
 0x199   : > { %v3812_v31 = vpop.eup %3811 }
 0x19a   : > { %v1214_v34 = vmul.f32 %v3812_v31, %v1212_v23 }
 0x19b   : > { %v1333_v35 = vpop.permute.xlu1 %1332  ;;  %v1289_v58 = vpop.permute.xlu0 %1288 }
 0x19c   : > { %v1216_v36 = vsel %vm1215_vm7, %v1212_v23, %v1214_v34  ;;  %v1335_v37 = vsel %vm1334_vm6, %v1331_v30, %v1333_v35  ;;  %v1337_v15 = vsel %vm1334_vm6, %v1333_v35, %v1329_v32 }
 0x19d   : > { %v3814_v38 = vpop.eup %3813  ;;  %1381 = vmatprep.subr.mxu0 %v1335_v37  ;;  %3652 = vmatprep.subr.mxu1 %v1337_v15  ;;  %v1219_v42 = vsel %vm1217_vm8, %v1218_v17, %v1216_v36 }
 0x19e   : > { %v1232_v41 = vmul.f32 %v3814_v38, %v1230_v24  ;;  %1382 = vmatpush1.msra.mxu0 %v1336_v40  ;;  %3653 = vmatpush3.msra.mxu1 %v1337_v15  ;;  %v1220_v48 = vmax.f32 %v1219_v42, 1e-08 }
 0x19f   : > { %v1321_v44 = vpop.permute.xlu1 %1320  ;;  %v1293_v1 = vpop.permute.xlu0 %1292 }
 0x1a0   : > { %v1234_v45 = vsel %vm1233_vm9, %v1230_v24, %v1232_v41  ;;  %v1297_v25 = vsel %vm1294_vm14, %v1293_v1, %v1289_v58 }
 0x1a1   : > { %v1237_v46 = vsel %vm1235_vm10, %v1236_v43, %v1234_v45 }
 0x1a2   : > { %v1238_v49 = vmax.f32 %v1237_v46, 1e-08  ;;  %v1263_v46 = vld [vmem:[%s5535_s6 + $0x8] sm:$0xff]  ;;  %s5546_s6 = smov 109  }
 0x1a3   : > { %v1323_v50 = vpop.permute.xlu1 %1322  ;;  %v1281_v18 = vpop.permute.xlu0 %1280 }
 0x1a4   : > { %v1239_v51 = vmul.f32 %v1238_v49, %v1220_v48  ;;  %v1325_v52 = vsel %vm1324_vm11, %v1321_v44, %v1323_v50  ;;  %v1531_v49 = vld [vmem:[%s5465_s12] sm:$0xff] }
 0x1a5   : > { %1383 = vmatprep.subr.mxu0 %v1325_v52 }
 0x1a6   : > { %3815 = vrcp.f32 %v1239_v51 }
 0x1a7   : > { %v1319_v53 = vpop.permute.xlu1 %1318  ;;  %v1267_v36 = vpop.permute.xlu0 %1266 }
 0x1a8   : > { %v1327_v55 = vsel %vm1324_vm11, %v1323_v50, %v1319_v53  ;;  %v1326_v56 = vsel %vm1324_vm11, %v1319_v53, %v1321_v44  ;;  %v1532_v50 = vld [vmem:[%s5465_s12 + $0x8] sm:$0xff] }
 0x1a9   : > { %3654 = vmatprep.subr.mxu1 %v1327_v55  ;;  %1384 = vmatpush1.msra.mxu0 %v1326_v56 }
 0x1aa   : > { %3655 = vmatpush3.msra.mxu1 %v1327_v55 }
 0x1ab   : > { %v1311_v57 = vpop.permute.xlu1 %1310  ;;  %v1271_v42 = vpop.permute.xlu0 %1270 }
 0x1ac   : > { %v1316_v60 = vsel %vm1314_vm12, %v1309_v47, %v1311_v57  ;;  %v1277_v45 = vsel %vm1274_vm1, %v1271_v42, %v1267_v36 }
 0x1af   : > { %v1313_v59 = vpop.permute.xlu1 %1312 }
 0x1b0   : > { %v1315_v61 = vsel %vm1314_vm12, %v1311_v57, %v1313_v59  ;;  %v1317_v62 = vsel %vm1314_vm12, %v1313_v59, %v1309_v47 }
 0x1b1   : > { %1385 = vmatprep.subr.mxu0 %v1315_v61  ;;  %3656 = vmatprep.subr.mxu1 %v1317_v62 }
 0x1b2   : > { %1386 = vmatpush1.msra.mxu0 %v1316_v60  ;;  %3657 = vmatpush3.msra.mxu1 %v1317_v62 }
 0x1b3   : > { %v3816_v63 = vpop.eup %3815  ;;  %v1299_v0 = vpop.permute.xlu1 %1298  ;;  %1387 = vmatprep.subr.mxu0 %v4210_v7  ;;  %3658 = vmatprep.subr.mxu1 %v4212_v8 }
 0x1b4   : > { %v1241_v3 = vmul.f32 %v3816_v63, %v1202_v39  ;;  %1388 = vmatpush1.msra.mxu0 %v4214_v9  ;;  %3659 = vmatpush3.msra.mxu1 %v4212_v8  ;;  %v1306_v4 = vsel %vm1304_vm13, %v1299_v0, %v1301_v54 }
 0x1b5   : > { %1389 = vmatprep.subr.mxu0 %v1306_v4 }
 0x1b6   : > { %v1242_v5 = vadd.f32 1.0, %v1241_v3 }
 0x1b7   : > { %v1303_v6 = vpop.permute.xlu1 %1302 }
 0x1b8   : > { %v1243_v13 = vmul.f32 0.5, %v1242_v5  ;;  %v1305_v14 = vsel %vm1304_vm13, %v1301_v54, %v1303_v6  ;;  %v1307_v7 = vsel %vm1304_vm13, %v1303_v6, %v1299_v0 }
 0x1b9   : > { %3660 = vmatprep.subr.mxu1 %v1305_v14  ;;  %1390 = vmatpush1.msra.mxu0 %v1307_v7 }
 0x1ba   : > { %v1247_v8 = vrot.slane %v1243_v13, %v4263_v21  ;;  %v1251_v9 = vsub.f32 1.0, %v1243_v13  ;;  %3661 = vmatpush3.msra.mxu1 %v1305_v14 }
 0x1bb   : > { %v1291_v23 = vpop.permute.xlu1 %1290 }
 0x1bc   : > { %v1255_v24 = vrot.slane %v1251_v9, %v4263_v21  ;;  %v1249_v29 = vmul.f32 %v1247_v8, %v4220_v10  ;;  %v1296_v30 = vsel %vm1294_vm14, %v1289_v58, %v1291_v23  ;;  %v1295_v31 = vsel %vm1294_vm14, %v1291_v23, %v1293_v1 }
 0x1bd   : > { %v1250_v32 = vmul.f32 %v1247_v8, %v4222_v11  ;;  %1391 = vmatprep.subr.mxu0 %v1296_v30  ;;  %3662 = vmatprep.subr.mxu1 %v1295_v31  ;;  %v1248_v17 = vmul.f32 %v1247_v8, %v4227_v12 }
 0x1be   : > { %v1257_v21 = vmul.f32 %v1255_v24, %v838_v19  ;;  %v1258_v34 = vmul.f32 %v1255_v24, %v839_v20  ;;  %1392 = vmatpush1.msra.mxu0 %v1297_v25  ;;  %3663 = vmatpush3.msra.mxu1 %v1295_v31  ;;  %v1256_v37 = vmul.f32 %v1255_v24, %v837_v26 }
 0x1bf   : > { %v1279_v35 = vpop.permute.xlu1 %1278 }
 0x1c0   : > { %v4400_v15 = vadd.f32 %v1257_v21, %v1249_v29  ;;  %v4402_v10 = vadd.f32 %v1258_v34, %v1250_v32  ;;  %v1286_v38 = vsel %vm1284_vm15, %v1279_v35, %v1281_v18  ;;  %v4411_v39 = vadd.f32 %v1256_v37, %v1248_v17 }
 0x1c1   : > { %1393 = vmatprep.subr.mxu0 %v1286_v38 }
 0x1c2   : > { %1600 = vrot.lane.b32.xlu0 %v4402_v10, %s5497_s9  ;;  %1598 = vrot.lane.b32.xlu1 %v4400_v15, %s5497_s9 }
 0x1c3   : > { %v1283_v11 = vpop.permute.xlu1 %1282 }
 0x1c4   : > { %v1285_v40 = vsel %vm1284_vm15, %v1281_v18, %v1283_v11  ;;  %v1287_v41 = vsel %vm1284_vm15, %v1283_v11, %v1279_v35 }
 0x1c5   : > { %3664 = vmatprep.subr.mxu1 %v1285_v40  ;;  %1394 = vmatpush1.msra.mxu0 %v1287_v41 }
 0x1c6   : > { %1589 = vrot.lane.b32.xlu0 %v4400_v15, %s5503_s5  ;;  %1596 = vrot.lane.b32.xlu1 %v4411_v39, %s5497_s9  ;;  %s5541_s9 = sld [smem:[#allocation22_spill]] }
 0x1c7   : > { %v1269_v12 = vpop.permute.xlu1 %1268  ;;  %3665 = vmatpush3.msra.mxu1 %v1285_v40 }
 0x1c8   : > { %v1276_v43 = vsel %vm1274_vm1, %v1267_v36, %v1269_v12  ;;  %v1275_v44 = vsel %vm1274_vm1, %v1269_v12, %v1271_v42  ;;  %v1530_v42 = vld [vmem:[%s5464_s11 + $0x8] sm:$0xff] }
 0x1c9   : > { %1395 = vmatprep.subr.mxu0 %v1276_v43  ;;  %3666 = vmatprep.subr.mxu1 %v1275_v44 }
 0x1ca   : > { %1587 = vrot.lane.b32.xlu0 %v4411_v39, %s5503_s5  ;;  %1591 = vrot.lane.b32.xlu1 %v4402_v10, %s5503_s5  ;;  %s5544_s5 = smov 111  }
 0x1cb   : > { %1396 = vmatpush1.msra.mxu0 %v1277_v45  ;;  %3667 = vmatpush3.msra.mxu1 %v1275_v44 }
 0x1cc   : > { %3523 = vmatmul.mubr.msk.f32.vlgmr.msra.gmra.mxu0 %vm1358_vm5, %v4335_v22  ;;  %3669 = vmatmul.mubr.msk.f32.vlgmr.msra.gmra.mxu1 %vm1358_vm5, %v1263_v46  ;;  %v4468_v22 = vld [vmem:[%s5464_s11] sm:$0xff] }
 0x1cd   : > { %1435 = vmatprep.mubr.f32.mxu0 %v3991_v2  ;;  %3689 = vmatprep.mubr.msk.f32.mxu1 %vm1358_vm5, %v4468_v22  ;;  %v1264_v47 = vld [vmem:[%s5541_s9] sm:$0xff] }
 0x1ce   : > { %1582 = vrot.lane.b32.xlu0 %v4402_v10, %s5501_s28  ;;  %1580 = vrot.lane.b32.xlu1 %v4400_v15, %s5501_s28 }
 0x1d0   : > { %3524 = vmatmul.mubr.msk.f32.gmra.mxu0 %vm1358_vm5, %v1263_v46 }
 0x1d1   : > { %1685 = vmatprep.mubr.f32.mxu0 %v3991_v2 }
 0x1d2   : > { %1571 = vrot.lane.b32.xlu0 %v4400_v15, %s5499_s7  ;;  %1578 = vrot.lane.b32.xlu1 %v4411_v39, %s5501_s28  ;;  %s5545_s28 = smov 127  }
 0x1d6   : > { %1569 = vrot.lane.b32.xlu0 %v4411_v39, %s5499_s7  ;;  %1573 = vrot.lane.b32.xlu1 %v4402_v10, %s5499_s7  ;;  %s5542_s7 = smov %s5541_s9  ;;  %s5543_s9 = smov 110  }
 0x1d7   : > { %v1265_v48 = vld [vmem:[%s5542_s7 + $0x8] sm:$0xff] }
 0x1da   : > { %1562 = vrot.lane.b32.xlu0 %v4400_v15, %s5537_s3  ;;  %1560 = vrot.lane.b32.xlu1 %v4411_v39, %s5537_s3 }
 0x1de   : > { %1551 = vrot.lane.b32.xlu0 %v4411_v39, %s5538_s1  ;;  %1564 = vrot.lane.b32.xlu1 %v4402_v10, %s5537_s3 }
 0x1e2   : > { %1555 = vrot.lane.b32.xlu0 %v4402_v10, %s5538_s1  ;;  %1553 = vrot.lane.b32.xlu1 %v4400_v15, %s5538_s1 }
 0x1e6   : > { %1544 = vrot.lane.b32.xlu0 %v4400_v15, %s5539_s27  ;;  %1542 = vrot.lane.b32.xlu1 %v4411_v39, %s5539_s27 }
 0x1ea   : > { %1533 = vrot.lane.b32.xlu0 %v4411_v39, %s5540_s10  ;;  %1546 = vrot.lane.b32.xlu1 %v4402_v10, %s5539_s27 }
 0x1ee   : > { %1537 = vrot.lane.b32.xlu0 %v4402_v10, %s5540_s10  ;;  %1535 = vrot.lane.b32.xlu1 %v4400_v15, %s5540_s10 }
 0x1f2   : > { %1350 = vperm.xlu0 %3809, %v1264_v47   ;;  %1355 = vperm.xlu1 %3810, %v1265_v48  }
 0x1f6   : > { %1607 = vperm.xlu0 %3809, %v1531_v49   ;;  %1612 = vperm.xlu1 %3810, %v1532_v50  }
 0x234   : > { %v1599_v51 = vpop.permute.xlu1 %1598  ;;  %v1601_v52 = vpop.permute.xlu0 %1600 }
 0x235   : > { %v1602_v53 = vsel %vm1344_vm3, %v1599_v51, %v1601_v52 }
 0x236   : > { %1635 = vmatprep.subr.mxu0 %v1602_v53 }
 0x238   : > { %v1597_v54 = vpop.permute.xlu1 %1596  ;;  %v1590_v55 = vpop.permute.xlu0 %1589 }
 0x239   : > { %v1603_v56 = vsel %vm1344_vm3, %v1597_v54, %v1599_v51  ;;  %v1604_v57 = vsel %vm1344_vm3, %v1601_v52, %v1597_v54 }
 0x23a   : > { %1636 = vmatpush1.msra.mxu0 %v1603_v56  ;;  %3671 = vmatprep.subr.mxu1 %v1604_v57 }
 0x23b   : > { %3672 = vmatpush3.msra.mxu1 %v1604_v57 }
 0x23c   : > { %v1592_v58 = vpop.permute.xlu1 %1591  ;;  %v1588_v59 = vpop.permute.xlu0 %1587 }
 0x23d   : > { %v1593_v60 = vsel %vm1334_vm6, %v1590_v55, %v1592_v58  ;;  %v1595_v61 = vsel %vm1334_vm6, %v1592_v58, %v1588_v59  ;;  %v1594_v62 = vsel %vm1334_vm6, %v1588_v59, %v1590_v55 }
 0x23e   : > { %1637 = vmatprep.subr.mxu0 %v1593_v60  ;;  %3673 = vmatprep.subr.mxu1 %v1595_v61 }
 0x23f   : > { %1638 = vmatpush1.msra.mxu0 %v1594_v62  ;;  %3674 = vmatpush3.msra.mxu1 %v1595_v61 }
 0x240   : > { %v1581_v63 = vpop.permute.xlu1 %1580  ;;  %v1583_v0 = vpop.permute.xlu0 %1582 }
 0x241   : > { %v1584_v1 = vsel %vm1324_vm11, %v1581_v63, %v1583_v0 }
 0x242   : > { %1639 = vmatprep.subr.mxu0 %v1584_v1 }
 0x244   : > { %v1579_v3 = vpop.permute.xlu1 %1578  ;;  %v1572_v4 = vpop.permute.xlu0 %1571 }
 0x245   : > { %v1585_v5 = vsel %vm1324_vm11, %v1579_v3, %v1581_v63  ;;  %v1586_v6 = vsel %vm1324_vm11, %v1583_v0, %v1579_v3 }
 0x246   : > { %1640 = vmatpush1.msra.mxu0 %v1585_v5  ;;  %3675 = vmatprep.subr.mxu1 %v1586_v6 }
 0x247   : > { %3676 = vmatpush3.msra.mxu1 %v1586_v6 }
 0x248   : > { %v1574_v13 = vpop.permute.xlu1 %1573  ;;  %v1570_v14 = vpop.permute.xlu0 %1569 }
 0x249   : > { %v1575_v7 = vsel %vm1314_vm12, %v1572_v4, %v1574_v13  ;;  %v1577_v18 = vsel %vm1314_vm12, %v1574_v13, %v1570_v14  ;;  %v1576_v8 = vsel %vm1314_vm12, %v1570_v14, %v1572_v4  ;;  %v1786_v4 = vld [vmem:[%s5466_s13 + $0x8] sm:$0xff] }
 0x24a   : > { %1641 = vmatprep.subr.mxu0 %v1575_v7  ;;  %3677 = vmatprep.subr.mxu1 %v1577_v18 }
 0x24b   : > { %1642 = vmatpush1.msra.mxu0 %v1576_v8  ;;  %3678 = vmatpush3.msra.mxu1 %v1577_v18 }
 0x24c   : > { %v1561_v9 = vpop.permute.xlu1 %1560  ;;  %1643 = vmatprep.subr.mxu0 %v4400_v15  ;;  %3679 = vmatprep.subr.mxu1 %v4402_v10  ;;  %v1563_v19 = vpop.permute.xlu0 %1562 }
 0x24d   : > { %1644 = vmatpush1.msra.mxu0 %v4411_v39  ;;  %3680 = vmatpush3.msra.mxu1 %v4402_v10  ;;  %v1567_v20 = vsel %vm1304_vm13, %v1561_v9, %v1563_v19 }
 0x24e   : > { %1645 = vmatprep.subr.mxu0 %v1567_v20 }
 0x250   : > { %v1565_v23 = vpop.permute.xlu1 %1564  ;;  %v1552_v24 = vpop.permute.xlu0 %1551 }
 0x251   : > { %v1568_v25 = vsel %vm1304_vm13, %v1565_v23, %v1561_v9  ;;  %v1566_v26 = vsel %vm1304_vm13, %v1563_v19, %v1565_v23 }
 0x252   : > { %1646 = vmatpush1.msra.mxu0 %v1568_v25  ;;  %3681 = vmatprep.subr.mxu1 %v1566_v26 }
 0x253   : > { %3682 = vmatpush3.msra.mxu1 %v1566_v26 }
 0x254   : > { %v1554_v29 = vpop.permute.xlu1 %1553  ;;  %v1556_v30 = vpop.permute.xlu0 %1555 }
 0x255   : > { %v1558_v31 = vsel %vm1294_vm14, %v1552_v24, %v1554_v29  ;;  %v1557_v32 = vsel %vm1294_vm14, %v1554_v29, %v1556_v30  ;;  %v1559_v21 = vsel %vm1294_vm14, %v1556_v30, %v1552_v24 }
 0x256   : > { %1647 = vmatprep.subr.mxu0 %v1558_v31  ;;  %3683 = vmatprep.subr.mxu1 %v1557_v32 }
 0x257   : > { %1648 = vmatpush1.msra.mxu0 %v1559_v21  ;;  %3684 = vmatpush3.msra.mxu1 %v1557_v32 }
 0x258   : > { %v1543_v34 = vpop.permute.xlu1 %1542  ;;  %v1545_v35 = vpop.permute.xlu0 %1544 }
 0x259   : > { %v1549_v36 = vsel %vm1284_vm15, %v1543_v34, %v1545_v35 }
 0x25a   : > { %1649 = vmatprep.subr.mxu0 %v1549_v36 }
 0x25c   : > { %v1547_v37 = vpop.permute.xlu1 %1546  ;;  %v1534_v15 = vpop.permute.xlu0 %1533 }
 0x25d   : > { %v1550_v10 = vsel %vm1284_vm15, %v1547_v37, %v1543_v34  ;;  %v1548_v38 = vsel %vm1284_vm15, %v1545_v35, %v1547_v37 }
 0x25e   : > { %1650 = vmatpush1.msra.mxu0 %v1550_v10  ;;  %3685 = vmatprep.subr.mxu1 %v1548_v38 }
 0x25f   : > { %3686 = vmatpush3.msra.mxu1 %v1548_v38 }
 0x260   : > { %v1536_v17 = vpop.permute.xlu1 %1535  ;;  %v1538_v11 = vpop.permute.xlu0 %1537 }
 0x261   : > { %v1540_v39 = vsel %vm1274_vm1, %v1534_v15, %v1536_v17  ;;  %v1539_v40 = vsel %vm1274_vm1, %v1536_v17, %v1538_v11  ;;  %v1541_v41 = vsel %vm1274_vm1, %v1538_v11, %v1534_v15 }
 0x262   : > { %1651 = vmatprep.subr.mxu0 %v1540_v39  ;;  %3687 = vmatprep.subr.mxu1 %v1539_v40 }
 0x263   : > { %1652 = vmatpush1.msra.mxu0 %v1541_v41  ;;  %3688 = vmatpush3.msra.mxu1 %v1539_v40 }
 0x264   : > { %3527 = vmatmul.mubr.msk.f32.vlgmr.msra.gmra.mxu0 %vm1358_vm5, %v4468_v22  ;;  %3690 = vmatmul.mubr.msk.f32.vlgmr.msra.gmra.mxu1 %vm1358_vm5, %v1530_v42 }
 0x265   : > { %1691 = vmatprep.mubr.f32.mxu0 %v3991_v2  ;;  %2063 = vmatprep.subr.mxu1 %v3991_v2 }
 0x266   : > { %3535 = vmatprep.mubr.msk.f32.mxu1 %vm1961_vm2, %v1786_v4 }
 0x268   : > { %3528 = vmatmul.mubr.msk.f32.gmra.mxu0 %vm1358_vm5, %v1530_v42  ;;  %vm3251_vm5 = vcmask 64512  }
 0x269   : > { %3531 = vmatprep.mubr.msk.f32.mxu0 %vm1961_vm2, %v1786_v4 }
 0x26d   : > { %v1356_v12 = vpop.permute.xlu1 %1355  ;;  %v1351_v46 = vpop.permute.xlu0 %1350 }
 0x271   : > { %v4676_v5 = vpop.permute.xlu0 %1607  ;;  %v4678_v13 = vpop.permute.xlu1 %1612 }
 0x28c   : > { %v1431_v43 = vpop.f32.mrf.mxu0  ;;  %v3670_v44 = vpop.f32.mrf.mxu1 }
 0x28d   : > { %v1514_v45 = vadd.f32 %v3670_v44, %v1356_v12  ;;  %v1432_v51 = vadd.f32 %v1431_v43, %v1351_v46 }
 0x28e   : > { %v1433_v47 = vpop.f32.mrf.mxu0  ;;  %v1508_v56 = vpop.f32.mrf.mxu1 }
 0x28f   : > { %v1522_v48 = vmax.f32 %v1514_v45, 0.0  ;;  %v1434_v49 = vadd.f32 %v1433_v47, %v1351_v46  ;;  %v1517_v57 = vmax.f32 %v1432_v51, 0.0  ;;  %v1509_v61 = vadd.f32 %v1508_v56, %v1351_v46 }
 0x290   : > { %v1437_v50 = vpop.f32.mrf.mxu0 }
 0x291   : > { %v4558_v22 = vmul.f32 %v1522_v48, %v4269_v27  ;;  %v1518_v52 = vmax.f32 %v1434_v49, 0.0  ;;  %v1438_v53 = vadd.f32 %v1437_v50, %v1356_v12  ;;  %v4571_v63 = vmul.f32 %v1517_v57, %v4272_v28 }
 0x292   : > { %v1439_v54 = vpop.f32.mrf.mxu0  ;;  %v1519_v1 = vmax.f32 %v1509_v61, 0.0 }
 0x293   : > { %v1440_v55 = vadd.f32 %v1439_v54, %v1356_v12  ;;  %1915 = vrot.lane.b32.xlu0 %v4558_v22, %s5543_s9  ;;  %v4563_v58 = vmul.f32 %v1518_v52, %v4275_v33  ;;  %v1520_v59 = vmax.f32 %v1438_v53, 0.0 }
 0x294   : > { %v4583_v3 = vmul.f32 %v1519_v1, %v4269_v27 }
 0x295   : > { %v1521_v60 = vmax.f32 %v1440_v55, 0.0  ;;  %v4574_v0 = vmul.f32 %v1520_v59, %v4272_v28 }
 0x297   : > { %v4566_v62 = vmul.f32 %v1521_v60, %v4275_v33  ;;  %1909 = vrot.lane.b32.xlu0 %v4563_v58, %s5543_s9 }
 0x299   : > { %1911 = vrot.lane.b32.xlu1 %v4566_v62, %s5543_s9 }
 0x29b   : > { %1905 = vrot.lane.b32.xlu0 %v4571_v63, %s5543_s9 }
 0x29d   : > { %1907 = vrot.lane.b32.xlu1 %v4574_v0, %s5543_s9 }
 0x29f   : > { %1897 = vrot.lane.b32.xlu0 %v4558_v22, %s5544_s5 }
 0x2a1   : > { %1913 = vrot.lane.b32.xlu1 %v4583_v3, %s5543_s9 }
 0x2a3   : > { %1891 = vrot.lane.b32.xlu0 %v4563_v58, %s5544_s5 }
 0x2a5   : > { %1893 = vrot.lane.b32.xlu1 %v4566_v62, %s5544_s5 }
 0x2a7   : > { %1887 = vrot.lane.b32.xlu0 %v4571_v63, %s5544_s5 }
 0x2a9   : > { %1889 = vrot.lane.b32.xlu1 %v4574_v0, %s5544_s5 }
 0x2ab   : > { %1879 = vrot.lane.b32.xlu0 %v4558_v22, %s5545_s28 }
 0x2ad   : > { %1895 = vrot.lane.b32.xlu1 %v4583_v3, %s5544_s5 }
 0x2af   : > { %1873 = vrot.lane.b32.xlu0 %v4563_v58, %s5545_s28 }
 0x2b1   : > { %1875 = vrot.lane.b32.xlu1 %v4566_v62, %s5545_s28 }
 0x2b3   : > { %1869 = vrot.lane.b32.xlu0 %v4571_v63, %s5545_s28 }
 0x2b5   : > { %1871 = vrot.lane.b32.xlu1 %v4574_v0, %s5545_s28 }
 0x2b7   : > { %1857 = vrot.lane.b32.xlu0 %v4566_v62, %s5537_s3 }
 0x2b9   : > { %1877 = vrot.lane.b32.xlu1 %v4583_v3, %s5545_s28 }
 0x2bb   : > { %1851 = vrot.lane.b32.xlu0 %v4571_v63, %s5537_s3 }
 0x2bd   : > { %1853 = vrot.lane.b32.xlu1 %v4574_v0, %s5537_s3 }
 0x2bf   : > { %1859 = vrot.lane.b32.xlu0 %v4583_v3, %s5537_s3 }
 0x2c1   : > { %1861 = vrot.lane.b32.xlu1 %v4558_v22, %s5537_s3 }
 0x2c3   : > { %1839 = vrot.lane.b32.xlu0 %v4566_v62, %s5538_s1 }
 0x2c5   : > { %1855 = vrot.lane.b32.xlu1 %v4563_v58, %s5537_s3 }
 0x2c7   : > { %1833 = vrot.lane.b32.xlu0 %v4571_v63, %s5538_s1 }
 0x2c9   : > { %1835 = vrot.lane.b32.xlu1 %v4574_v0, %s5538_s1 }
 0x2cb   : > { %1841 = vrot.lane.b32.xlu0 %v4583_v3, %s5538_s1 }
 0x2cd   : > { %1843 = vrot.lane.b32.xlu1 %v4558_v22, %s5538_s1 }
 0x2cf   : > { %1821 = vrot.lane.b32.xlu0 %v4566_v62, %s5539_s27 }
 0x2d1   : > { %1837 = vrot.lane.b32.xlu1 %v4563_v58, %s5538_s1 }
 0x2d3   : > { %1815 = vrot.lane.b32.xlu0 %v4571_v63, %s5539_s27 }
 0x2d5   : > { %1817 = vrot.lane.b32.xlu1 %v4574_v0, %s5539_s27 }
 0x2d7   : > { %1823 = vrot.lane.b32.xlu0 %v4583_v3, %s5539_s27 }
 0x2d9   : > { %1825 = vrot.lane.b32.xlu1 %v4558_v22, %s5539_s27 }
 0x2db   : > { %1803 = vrot.lane.b32.xlu0 %v4566_v62, %s5540_s10 }
 0x2dd   : > { %1819 = vrot.lane.b32.xlu1 %v4563_v58, %s5539_s27 }
 0x2df   : > { %1797 = vrot.lane.b32.xlu0 %v4571_v63, %s5540_s10 }
 0x2e1   : > { %1799 = vrot.lane.b32.xlu1 %v4574_v0, %s5540_s10 }
 0x2e3   : > { %1805 = vrot.lane.b32.xlu0 %v4583_v3, %s5540_s10 }
 0x2e5   : > { %1807 = vrot.lane.b32.xlu1 %v4558_v22, %s5540_s10 }
 0x2e7   : > { %1933 = vrot.lane.b32.xlu0 %v4558_v22, %s5546_s6 }
 0x2e9   : > { %1801 = vrot.lane.b32.xlu1 %v4563_v58, %s5540_s10 }
 0x2eb   : > { %1927 = vrot.lane.b32.xlu0 %v4563_v58, %s5546_s6 }
 0x2ed   : > { %1929 = vrot.lane.b32.xlu1 %v4566_v62, %s5546_s6 }
 0x2ef   : > { %1923 = vrot.lane.b32.xlu0 %v4571_v63, %s5546_s6 }
 0x2f1   : > { %1925 = vrot.lane.b32.xlu1 %v4574_v0, %s5546_s6 }
 0x2f5   : > { %1931 = vrot.lane.b32.xlu1 %v4583_v3, %s5546_s6 }
 0x305   : > { %v1916_v6 = vpop.permute.xlu0 %1915 }
 0x309   : > { %v1910_v14 = vpop.permute.xlu0 %1909 }
 0x30b   : > { %v1912_v7 = vpop.permute.xlu1 %1911 }
 0x30c   : > { %v1918_v18 = vsel %vm1334_vm6, %v1912_v7, %v1916_v6 }
 0x30d   : > { %v1906_v8 = vpop.permute.xlu0 %1905  ;;  %1974 = vmatprep.subr.mxu0 %v1918_v18 }
 0x30e   : > { %v1919_v30 = vsel %vm1334_vm6, %v1906_v8, %v1910_v14 }
 0x30f   : > { %v1908_v9 = vpop.permute.xlu1 %1907 }
 0x310   : > { %v1922_v19 = vsel %vm1334_vm6, %v1916_v6, %v1908_v9  ;;  %v1920_v20 = vsel %vm1334_vm6, %v1908_v9, %v1912_v7 }
 0x311   : > { %v1898_v23 = vpop.permute.xlu0 %1897  ;;  %2064 = vmatpush1.msra.mxu1 %v1922_v19  ;;  %1975 = vmatpush1.msra.mxu0 %v1920_v20 }
 0x312   : > { %2065 = vmatprep.subr.mxu1 %v3991_v2 }
 0x313   : > { %v1914_v24 = vpop.permute.xlu1 %1913 }
 0x314   : > { %v1917_v25 = vsel %vm1334_vm6, %v1910_v14, %v1914_v24  ;;  %v1921_v26 = vsel %vm1334_vm6, %v1914_v24, %v1906_v8 }
 0x315   : > { %1976 = vmatprep.subr.mxu0 %v1917_v25  ;;  %2066 = vmatpush1.msra.mxu1 %v1921_v26  ;;  %v1892_v29 = vpop.permute.xlu0 %1891 }
 0x316   : > { %1977 = vmatpush1.msra.mxu0 %v1919_v30  ;;  %2067 = vmatprep.subr.mxu1 %v3991_v2 }
 0x317   : > { %v1894_v31 = vpop.permute.xlu1 %1893 }
 0x318   : > { %v1900_v32 = vsel %vm1324_vm11, %v1894_v31, %v1898_v23 }
 0x319   : > { %v1888_v21 = vpop.permute.xlu0 %1887  ;;  %1978 = vmatprep.subr.mxu0 %v1900_v32 }
 0x31a   : > { %v1901_v11 = vsel %vm1324_vm11, %v1888_v21, %v1892_v29 }
 0x31b   : > { %v1890_v34 = vpop.permute.xlu1 %1889 }
 0x31c   : > { %v1904_v35 = vsel %vm1324_vm11, %v1898_v23, %v1890_v34  ;;  %v1902_v36 = vsel %vm1324_vm11, %v1890_v34, %v1894_v31 }
 0x31d   : > { %v1880_v37 = vpop.permute.xlu0 %1879  ;;  %2068 = vmatpush1.msra.mxu1 %v1904_v35  ;;  %1979 = vmatpush1.msra.mxu0 %v1902_v36 }
 0x31e   : > { %2069 = vmatprep.subr.mxu1 %v3991_v2 }
 0x31f   : > { %v1896_v15 = vpop.permute.xlu1 %1895 }
 0x320   : > { %v1899_v10 = vsel %vm1324_vm11, %v1892_v29, %v1896_v15  ;;  %v1903_v38 = vsel %vm1324_vm11, %v1896_v15, %v1888_v21 }
 0x321   : > { %1980 = vmatprep.subr.mxu0 %v1899_v10  ;;  %2070 = vmatpush1.msra.mxu1 %v1903_v38  ;;  %v1874_v17 = vpop.permute.xlu0 %1873 }
 0x322   : > { %1981 = vmatpush1.msra.mxu0 %v1901_v11  ;;  %2071 = vmatprep.subr.mxu1 %v3991_v2 }
 0x323   : > { %v1876_v39 = vpop.permute.xlu1 %1875 }
 0x324   : > { %v1687_v40 = vpop.f32.mrf.mxu0  ;;  %v3691_v41 = vpop.f32.mrf.mxu1  ;;  %v1882_v42 = vsel %vm1314_vm12, %v1876_v39, %v1880_v37 }
 0x325   : > { %v1770_v12 = vadd.f32 %v3691_v41, %v4678_v13  ;;  %v1870_v43 = vpop.permute.xlu0 %1869  ;;  %1982 = vmatprep.subr.mxu0 %v1882_v42  ;;  %v1688_v44 = vadd.f32 %v1687_v40, %v4676_v5 }
 0x326   : > { %v1764_v52 = vpop.f32.mrf.mxu1  ;;  %v1883_v57 = vsel %vm1314_vm12, %v1870_v43, %v1874_v17  ;;  %v1689_v19 = vpop.f32.mrf.mxu0 }
 0x327   : > { %v1778_v45 = vmax.f32 %v1770_v12, 0.0  ;;  %v1872_v46 = vpop.permute.xlu1 %1871  ;;  %v1773_v51 = vmax.f32 %v1688_v44, 0.0  ;;  %v1765_v60 = vadd.f32 %v1764_v52, %v4676_v5  ;;  %v1690_v29 = vadd.f32 %v1689_v19, %v4676_v5 }
 0x328   : > { %v1886_v47 = vsel %vm1314_vm12, %v1880_v37, %v1872_v46  ;;  %v1884_v48 = vsel %vm1314_vm12, %v1872_v46, %v1876_v39  ;;  %v1693_v34 = vpop.f32.mrf.mxu0 }
 0x329   : > { %v4717_v49 = vmul.f32 %v1778_v45, %v4269_v27  ;;  %v1858_v50 = vpop.permute.xlu0 %1857  ;;  %2072 = vmatpush1.msra.mxu1 %v1886_v47  ;;  %1983 = vmatpush1.msra.mxu0 %v1884_v48  ;;  %v4731_v59 = vmul.f32 %v1773_v51, %v4272_v28  ;;  %v1775_v4 = vmax.f32 %v1765_v60, 0.0  ;;  %v1774_v21 = vmax.f32 %v1690_v29, 0.0 }
 0x32a   : > { %2073 = vmatprep.subr.mxu1 %v3991_v2  ;;  %v1694_v10 = vadd.f32 %v1693_v34, %v4678_v13  ;;  %v1695_v60 = vpop.f32.mrf.mxu0 }
 0x32b   : > { %v1878_v53 = vpop.permute.xlu1 %1877  ;;  %2308 = vrot.lane.b32.xlu1 %v4717_v49, %s5537_s3  ;;  %2362 = vrot.lane.b32.xlu0 %v4717_v49, %s5543_s9  ;;  %v4758_v9 = vmul.f32 %v1775_v4, %v4269_v27  ;;  %v4788_v15 = vmul.f32 %v1774_v21, %v4275_v33  ;;  %v1785_v21 = vld [vmem:[%s5466_s13] sm:$0xff] }
 0x32c   : > { %v1881_v54 = vsel %vm1314_vm12, %v1874_v17, %v1878_v53  ;;  %v1885_v55 = vsel %vm1314_vm12, %v1878_v53, %v1870_v43  ;;  %v1776_v41 = vmax.f32 %v1694_v10, 0.0  ;;  %v1790_v10 = vld [vmem:[%s5466_s13 + $0x28] sm:$0xff] }
 0x32d   : > { %1984 = vmatprep.subr.mxu0 %v1881_v54  ;;  %2074 = vmatpush1.msra.mxu1 %v1885_v55  ;;  %v1852_v56 = vpop.permute.xlu0 %1851 }
 0x32e   : > { %1985 = vmatpush1.msra.mxu0 %v1883_v57  ;;  %2075 = vmatprep.subr.mxu1 %v3991_v2  ;;  %v4810_v44 = vmul.f32 %v1776_v41, %v4272_v28  ;;  %v1794_v41 = vld [vmem:[%s5467_s14 + $0x8] sm:$0xff] }
 0x32f   : > { %v1854_v61 = vpop.permute.xlu1 %1853  ;;  %1986 = vmatprep.subr.mxu0 %v4566_v62  ;;  %2076 = vmatpush1.msra.mxu1 %v4558_v22 }
 0x330   : > { %2290 = vrot.lane.b32.xlu1 %v4717_v49, %s5538_s1  ;;  %2352 = vrot.lane.b32.xlu0 %v4731_v59, %s5543_s9  ;;  %v1866_v6 = vsel %vm1304_vm13, %v1854_v61, %v1858_v50 }
 0x331   : > { %1987 = vmatpush1.msra.mxu0 %v4574_v0  ;;  %2077 = vmatprep.subr.mxu1 %v3991_v2  ;;  %v1860_v1 = vpop.permute.xlu0 %1859 }
 0x332   : > { %1988 = vmatprep.subr.mxu0 %v4563_v58  ;;  %2078 = vmatpush1.msra.mxu1 %v4583_v3  ;;  %v1867_v25 = vsel %vm1304_vm13, %v1860_v1, %v1852_v56 }
 0x333   : > { %1989 = vmatpush1.msra.mxu0 %v4571_v63  ;;  %v1862_v14 = vpop.permute.xlu1 %1861  ;;  %2079 = vmatprep.subr.mxu1 %v3991_v2 }
 0x334   : > { %2272 = vrot.lane.b32.xlu1 %v4717_v49, %s5539_s27  ;;  %2344 = vrot.lane.b32.xlu0 %v4717_v49, %s5544_s5  ;;  %v1864_v7 = vsel %vm1304_vm13, %v1858_v50, %v1862_v14  ;;  %v1868_v18 = vsel %vm1304_vm13, %v1862_v14, %v1854_v61 }
 0x335   : > { %v1840_v8 = vpop.permute.xlu0 %1839  ;;  %1990 = vmatprep.subr.mxu0 %v1866_v6  ;;  %2080 = vmatpush1.msra.mxu1 %v1864_v7  ;;  %v1696_v6 = vadd.f32 %v1695_v60, %v4678_v13 }
 0x336   : > { %1991 = vmatpush1.msra.mxu0 %v1868_v18  ;;  %2081 = vmatprep.subr.mxu1 %v3991_v2 }
 0x337   : > { %v1856_v20 = vpop.permute.xlu1 %1855  ;;  %v1777_v13 = vmax.f32 %v1696_v6, 0.0 }
 0x338   : > { %2360 = vrot.lane.b32.xlu1 %v4758_v9, %s5543_s9  ;;  %2334 = vrot.lane.b32.xlu0 %v4731_v59, %s5544_s5  ;;  %v1865_v23 = vsel %vm1304_vm13, %v1852_v56, %v1856_v20  ;;  %v1863_v24 = vsel %vm1304_vm13, %v1856_v20, %v1860_v1 }
 0x339   : > { %1992 = vmatprep.subr.mxu0 %v1865_v23  ;;  %2082 = vmatpush1.msra.mxu1 %v1863_v24  ;;  %v1834_v26 = vpop.permute.xlu0 %1833 }
 0x33a   : > { %1993 = vmatpush1.msra.mxu0 %v1867_v25  ;;  %2083 = vmatprep.subr.mxu1 %v3991_v2  ;;  %v4866_v25 = vmul.f32 %v1777_v13, %v4275_v33 }
 0x33b   : > { %v1836_v30 = vpop.permute.xlu1 %1835 }
 0x33c   : > { %2342 = vrot.lane.b32.xlu1 %v4758_v9, %s5544_s5  ;;  %2326 = vrot.lane.b32.xlu0 %v4717_v49, %s5545_s28  ;;  %v1848_v31 = vsel %vm1294_vm14, %v1836_v30, %v1840_v8 }
 0x33d   : > { %v1842_v32 = vpop.permute.xlu0 %1841  ;;  %1994 = vmatprep.subr.mxu0 %v1848_v31 }
 0x33e   : > { %v1849_v39 = vsel %vm1294_vm14, %v1842_v32, %v1834_v26 }
 0x33f   : > { %v1844_v35 = vpop.permute.xlu1 %1843 }
 0x340   : > { %v1846_v5 = vsel %vm1294_vm14, %v1840_v8, %v1844_v35  ;;  %v1850_v36 = vsel %vm1294_vm14, %v1844_v35, %v1836_v30  ;;  %2324 = vrot.lane.b32.xlu1 %v4758_v9, %s5545_s28  ;;  %2316 = vrot.lane.b32.xlu0 %v4731_v59, %s5545_s28 }
 0x341   : > { %1995 = vmatpush1.msra.mxu0 %v1850_v36  ;;  %2084 = vmatpush1.msra.mxu1 %v1846_v5  ;;  %v1822_v37 = vpop.permute.xlu0 %1821  ;;  %v1788_v5 = vld [vmem:[%s5466_s13 + $0x18] sm:$0xff] }
 0x342   : > { %2085 = vmatprep.subr.mxu1 %v3991_v2 }
 0x343   : > { %v1838_v38 = vpop.permute.xlu1 %1837 }
 0x344   : > { %v1845_v17 = vsel %vm1294_vm14, %v1838_v38, %v1842_v32  ;;  %2302 = vrot.lane.b32.xlu1 %v4788_v15, %s5537_s3  ;;  %2298 = vrot.lane.b32.xlu0 %v4731_v59, %s5537_s3  ;;  %v1847_v11 = vsel %vm1294_vm14, %v1834_v26, %v1838_v38  ;;  %v1789_v38 = vld [vmem:[%s5466_s13 + $0x20] sm:$0xff] }
 0x345   : > { %1996 = vmatprep.subr.mxu0 %v1847_v11  ;;  %2086 = vmatpush1.msra.mxu1 %v1845_v17  ;;  %v1816_v40 = vpop.permute.xlu0 %1815  ;;  %v1792_v17 = vld [vmem:[%s5466_s13 + $0x38] sm:$0xff]  ;;  %v1791_v11 = vld [vmem:[%s5466_s13 + $0x30] sm:$0xff] }
 0x346   : > { %1997 = vmatpush1.msra.mxu0 %v1849_v39  ;;  %2087 = vmatprep.subr.mxu1 %v3991_v2  ;;  %v2233_v39 = vld [vmem:[%s5468_s15 + $0x8] sm:$0xff] }
 0x347   : > { %v1818_v42 = vpop.permute.xlu1 %1817 }
 0x348   : > { %2284 = vrot.lane.b32.xlu1 %v4788_v15, %s5538_s1  ;;  %2280 = vrot.lane.b32.xlu0 %v4731_v59, %s5538_s1  ;;  %v1830_v12 = vsel %vm1284_vm15, %v1818_v42, %v1822_v37 }
 0x349   : > { %1998 = vmatprep.subr.mxu0 %v1830_v12  ;;  %v1824_v43 = vpop.permute.xlu0 %1823  ;;  %v1796_v12 = vld [vmem:[%s5467_s14 + $0x18] sm:$0xff] }
 0x34a   : > { %v1831_v53 = vsel %vm1284_vm15, %v1824_v43, %v1816_v40 }
 0x34b   : > { %v1826_v45 = vpop.permute.xlu1 %1825 }
 0x34c   : > { %v1828_v46 = vsel %vm1284_vm15, %v1822_v37, %v1826_v45  ;;  %v1832_v47 = vsel %vm1284_vm15, %v1826_v45, %v1818_v42  ;;  %2354 = vrot.lane.b32.xlu1 %v4810_v44, %s5543_s9  ;;  %2262 = vrot.lane.b32.xlu0 %v4731_v59, %s5539_s27  ;;  %v1787_v37 = vld [vmem:[%s5466_s13 + $0x10] sm:$0xff]  ;;  %v2241_v45 = vld [vmem:[%s5469_s16 + $0x8] sm:$0xff] }
 0x34d   : > { %1999 = vmatpush1.msra.mxu0 %v1832_v47  ;;  %2088 = vmatpush1.msra.mxu1 %v1828_v46  ;;  %v1804_v48 = vpop.permute.xlu0 %1803  ;;  %v1795_v42 = vld [vmem:[%s5467_s14 + $0x10] sm:$0xff]  ;;  %v2243_v47 = vld [vmem:[%s5469_s16 + $0x18] sm:$0xff] }
 0x34e   : > { %2089 = vmatprep.subr.mxu1 %v3991_v2  ;;  %v2242_v46 = vld [vmem:[%s5469_s16 + $0x10] sm:$0xff] }
 0x34f   : > { %v1820_v50 = vpop.permute.xlu1 %1819 }
 0x350   : > { %v1827_v51 = vsel %vm1284_vm15, %v1820_v50, %v1824_v43  ;;  %2336 = vrot.lane.b32.xlu1 %v4810_v44, %s5544_s5  ;;  %2356 = vrot.lane.b32.xlu0 %v4788_v15, %s5543_s9  ;;  %v1829_v52 = vsel %vm1284_vm15, %v1816_v40, %v1820_v50  ;;  %v1793_v40 = vld [vmem:[%s5467_s14] sm:$0xff] }
 0x351   : > { %2000 = vmatprep.subr.mxu0 %v1829_v52  ;;  %2090 = vmatpush1.msra.mxu1 %v1827_v51  ;;  %v1798_v54 = vpop.permute.xlu0 %1797  ;;  %v2240_v43 = vld [vmem:[%s5469_s16] sm:$0xff] }
 0x352   : > { %2001 = vmatpush1.msra.mxu0 %v1831_v53  ;;  %2091 = vmatprep.subr.mxu1 %v3991_v2 }
 0x353   : > { %v1800_v55 = vpop.permute.xlu1 %1799 }
 0x354   : > { %2318 = vrot.lane.b32.xlu1 %v4810_v44, %s5545_s28  ;;  %2338 = vrot.lane.b32.xlu0 %v4788_v15, %s5544_s5  ;;  %v1812_v56 = vsel %vm1274_vm1, %v1800_v55, %v1804_v48 }
 0x355   : > { %2002 = vmatprep.subr.mxu0 %v1812_v56  ;;  %v1806_v57 = vpop.permute.xlu0 %1805 }
 0x356   : > { %v1813_v19 = vsel %vm1274_vm1, %v1806_v57, %v1798_v54 }
 0x357   : > { %v1808_v61 = vpop.permute.xlu1 %1807 }
 0x358   : > { %v1810_v1 = vsel %vm1274_vm1, %v1804_v48, %v1808_v61  ;;  %v1814_v4 = vsel %vm1274_vm1, %v1808_v61, %v1800_v55  ;;  %2300 = vrot.lane.b32.xlu1 %v4810_v44, %s5537_s3  ;;  %2320 = vrot.lane.b32.xlu0 %v4788_v15, %s5545_s28 }
 0x359   : > { %2003 = vmatpush1.msra.mxu0 %v1814_v4  ;;  %2092 = vmatpush1.msra.mxu1 %v1810_v1  ;;  %v1934_v14 = vpop.permute.xlu0 %1933 }
 0x35a   : > { %2093 = vmatprep.subr.mxu1 %v3991_v2 }
 0x35b   : > { %v1802_v7 = vpop.permute.xlu1 %1801 }
 0x35c   : > { %v1809_v18 = vsel %vm1274_vm1, %v1802_v7, %v1806_v57  ;;  %2282 = vrot.lane.b32.xlu1 %v4810_v44, %s5538_s1  ;;  %2306 = vrot.lane.b32.xlu0 %v4758_v9, %s5537_s3  ;;  %v1811_v8 = vsel %vm1274_vm1, %v1798_v54, %v1802_v7 }
 0x35d   : > { %2004 = vmatprep.subr.mxu0 %v1811_v8  ;;  %2094 = vmatpush1.msra.mxu1 %v1809_v18  ;;  %v1928_v23 = vpop.permute.xlu0 %1927 }
 0x35e   : > { %2005 = vmatpush1.msra.mxu0 %v1813_v19  ;;  %2123 = vmatprep.subr.mxu1 %v3991_v2 }
 0x35f   : > { %v1930_v20 = vpop.permute.xlu1 %1929 }
 0x360   : > { %2264 = vrot.lane.b32.xlu1 %v4810_v44, %s5539_s27  ;;  %2288 = vrot.lane.b32.xlu0 %v4758_v9, %s5538_s1  ;;  %v1936_v24 = vsel %vm1344_vm3, %v1930_v20, %v1934_v14 }
 0x361   : > { %2034 = vmatprep.subr.mxu0 %v1936_v24  ;;  %v1924_v31 = vpop.permute.xlu0 %1923 }
 0x362   : > { %v1937_v36 = vsel %vm1344_vm3, %v1924_v31, %v1928_v23 }
 0x363   : > { %v1926_v26 = vpop.permute.xlu1 %1925 }
 0x364   : > { %v1938_v29 = vsel %vm1344_vm3, %v1926_v26, %v1930_v20  ;;  %v1940_v30 = vsel %vm1344_vm3, %v1934_v14, %v1926_v26  ;;  %2358 = vrot.lane.b32.xlu1 %v4866_v25, %s5543_s9  ;;  %2270 = vrot.lane.b32.xlu0 %v4758_v9, %s5539_s27 }
 0x365   : > { %2035 = vmatpush2.msra.mxu0 %v1938_v29  ;;  %2124 = vmatpush2.msra.mxu1 %v1940_v30 }
 0x366   : > { %2125 = vmatprep.subr.mxu1 %v3991_v2 }
 0x367   : > { %v1932_v32 = vpop.permute.xlu1 %1931 }
 0x368   : > { %v1939_v34 = vsel %vm1344_vm3, %v1932_v32, %v1924_v31  ;;  %2340 = vrot.lane.b32.xlu1 %v4866_v25, %s5544_s5  ;;  %2244 = vrot.lane.b32.xlu0 %v4731_v59, %s5540_s10  ;;  %v1935_v35 = vsel %vm1344_vm3, %v1928_v23, %v1932_v32  ;;  %s5547_s5 = sld [smem:[#allocation15_spill]] }
 0x369   : > { %2036 = vmatprep.subr.mxu0 %v1935_v35  ;;  %2126 = vmatpush2.msra.mxu1 %v1939_v34 }
 0x36a   : > { %2037 = vmatpush2.msra.mxu0 %v1937_v36  ;;  %2128 = vmatmul.mubr.f32.vlgmr.msra.gmra.mxu1 %v1785_v21 }
 0x36b   : > { %2039 = vmatmul.mubr.f32.vlgmr.msra.gmra.mxu0 %v1785_v21  ;;  %3536 = vmatprep.mubr.msk.f32.mxu1 %vm1961_vm2, %v1788_v5 }
 0x36c   : > { %2322 = vrot.lane.b32.xlu1 %v4866_v25, %s5545_s28  ;;  %2252 = vrot.lane.b32.xlu0 %v4758_v9, %s5540_s10  ;;  %s3581_s28 = sshll.u32 %s4197_s2, 5 }
 0x36d   : > { %3532 = vmatprep.mubr.msk.f32.mxu0 %vm1961_vm2, %v1788_v5  ;;  %2509 = vmatprep.subr.mxu1 %v3991_v2 }
 0x36e   : > { %2133 = vmatmul.mubr.f32.gmra.mxu1 %v1787_v37  ;;  %s820_s29 = scalar_lea.vmem %s5547_s5, %s3581_s28  ;;  %s3578_s5 = sshll.u32 %s4165_s8, 7 }
 0x36f   : > { %2045 = vmatmul.mubr.f32.gmra.mxu0 %v1787_v37  ;;  %3537 = vmatprep.mubr.msk.f32.mxu1 %vm1961_vm2, %v1790_v10 }
 0x370   : > { %2266 = vrot.lane.b32.xlu1 %v4788_v15, %s5539_s27  ;;  %2380 = vrot.lane.b32.xlu0 %v4717_v49, %s5546_s6 }
 0x371   : > { %3533 = vmatprep.mubr.msk.f32.mxu0 %vm1961_vm2, %v1790_v10 }
 0x372   : > { %2138 = vmatmul.mubr.f32.gmra.mxu1 %v1789_v38 }
 0x373   : > { %2051 = vmatmul.mubr.f32.gmra.mxu0 %v1789_v38  ;;  %3538 = vmatprep.mubr.msk.f32.mxu1 %vm1961_vm2, %v1792_v17 }
 0x374   : > { %2246 = vrot.lane.b32.xlu1 %v4810_v44, %s5540_s10  ;;  %2304 = vrot.lane.b32.xlu0 %v4866_v25, %s5537_s3 }
 0x375   : > { %3534 = vmatprep.mubr.msk.f32.mxu0 %vm1961_vm2, %v1792_v17 }
 0x376   : > { %2143 = vmatmul.mubr.f32.gmra.mxu1 %v1791_v11 }
 0x377   : > { %2057 = vmatmul.mubr.f32.gmra.mxu0 %v1791_v11  ;;  %3555 = vmatprep.mubr.msk.f32.mxu1 %vm1961_vm2, %v2233_v39 }
 0x378   : > { %2254 = vrot.lane.b32.xlu1 %v4717_v49, %s5540_s10  ;;  %2286 = vrot.lane.b32.xlu0 %v4866_v25, %s5538_s1 }
 0x379   : > { %3551 = vmatprep.mubr.msk.f32.mxu0 %vm1961_vm2, %v2233_v39 }
 0x37c   : > { %2248 = vrot.lane.b32.xlu1 %v4788_v15, %s5540_s10  ;;  %2268 = vrot.lane.b32.xlu0 %v4866_v25, %s5539_s27  ;;  %s4005_s27 = smov 104  }
 0x380   : > { %2372 = vrot.lane.b32.xlu1 %v4810_v44, %s5546_s6  ;;  %2250 = vrot.lane.b32.xlu0 %v4866_v25, %s5540_s10  ;;  %s4002_s10 = smov 16  }
 0x384   : > { %2376 = vrot.lane.b32.xlu1 %v4866_v25, %s5546_s6  ;;  %2374 = vrot.lane.b32.xlu0 %v4788_v15, %s5546_s6 }
 0x388   : > { %2378 = vrot.lane.b32.xlu1 %v4758_v9, %s5546_s6  ;;  %2370 = vrot.lane.b32.xlu0 %v4731_v59, %s5546_s6 }
 0x38c   : > { %1943 = vperm.xlu1 %3810, %v1793_v40   ;;  %1948 = vperm.xlu0 %3809, %v1794_v41  }
 0x390   : > { %1953 = vperm.xlu1 %3810, %v1795_v42   ;;  %1958 = vperm.xlu0 %3809, %v1796_v12  }
 0x394   : > { %2390 = vperm.xlu1 %3810, %v2240_v43   ;;  %2395 = vperm.xlu0 %3809, %v2241_v45  }
 0x398   : > { %2400 = vperm.xlu1 %3810, %v2242_v46   ;;  %2405 = vperm.xlu0 %3809, %v2243_v47  }
 0x39d   : > { %v4976_v48 = vpop.permute.xlu1 %2308  ;;  %v2363_v50 = vpop.permute.xlu0 %2362 }
 0x3a2   : > { %v4978_v51 = vpop.permute.xlu1 %2290  ;;  %v2353_v52 = vpop.permute.xlu0 %2352 }
 0x3a6   : > { %v4980_v53 = vpop.permute.xlu1 %2272  ;;  %v2345_v54 = vpop.permute.xlu0 %2344 }
 0x3aa   : > { %v2361_v55 = vpop.permute.xlu1 %2360  ;;  %v2335_v56 = vpop.permute.xlu0 %2334 }
 0x3ab   : > { %v2368_v13 = vsel %vm1334_vm6, %v2361_v55, %v2353_v52 }
 0x3ae   : > { %v2343_v57 = vpop.permute.xlu1 %2342  ;;  %v4982_v60 = vpop.permute.xlu0 %2326 }
 0x3af   : > { %v2350_v26 = vsel %vm1324_vm11, %v2343_v57, %v2335_v56 }
 0x3b2   : > { %v4984_v61 = vpop.permute.xlu1 %2324  ;;  %v4986_v1 = vpop.permute.xlu0 %2316 }
 0x3b3   : > { %v2332_v32 = vsel %vm1314_vm12, %v4984_v61, %v4986_v1 }
 0x3b6   : > { %v4988_v4 = vpop.permute.xlu1 %2302  ;;  %v4990_v6 = vpop.permute.xlu0 %2298 }
 0x3ba   : > { %v4992_v14 = vpop.permute.xlu1 %2284  ;;  %v4994_v7 = vpop.permute.xlu0 %2280 }
 0x3be   : > { %v2355_v18 = vpop.permute.xlu1 %2354  ;;  %v4996_v8 = vpop.permute.xlu0 %2262 }
 0x3bf   : > { %v2369_v19 = vsel %vm1334_vm6, %v2363_v50, %v2355_v18 }
 0x3c0   : > { %2510 = vmatpush1.msra.mxu1 %v2369_v19 }
 0x3c1   : > { %2511 = vmatprep.subr.mxu1 %v3991_v2 }
 0x3c2   : > { %v2337_v20 = vpop.permute.xlu1 %2336  ;;  %2512 = vmatpush1.msra.mxu1 %v2368_v13  ;;  %v2357_v23 = vpop.permute.xlu0 %2356 }
 0x3c3   : > { %v2351_v24 = vsel %vm1324_vm11, %v2345_v54, %v2337_v20  ;;  %2513 = vmatprep.subr.mxu1 %v3991_v2  ;;  %v2366_v11 = vsel %vm1334_vm6, %v2353_v52, %v2357_v23 }
 0x3c4   : > { %2514 = vmatpush1.msra.mxu1 %v2351_v24 }
 0x3c5   : > { %2515 = vmatprep.subr.mxu1 %v3991_v2 }
 0x3c6   : > { %v2319_v29 = vpop.permute.xlu1 %2318  ;;  %2516 = vmatpush1.msra.mxu1 %v2350_v26  ;;  %v2339_v30 = vpop.permute.xlu0 %2338 }
 0x3c7   : > { %v2333_v31 = vsel %vm1314_vm12, %v4982_v60, %v2319_v29  ;;  %2517 = vmatprep.subr.mxu1 %v3991_v2  ;;  %v2346_v12 = vsel %vm1324_vm11, %v2339_v30, %v2343_v57  ;;  %v2348_v43 = vsel %vm1324_vm11, %v2335_v56, %v2339_v30 }
 0x3c8   : > { %2518 = vmatpush1.msra.mxu1 %v2333_v31 }
 0x3c9   : > { %2519 = vmatprep.subr.mxu1 %v3991_v2 }
 0x3ca   : > { %v2301_v21 = vpop.permute.xlu1 %2300  ;;  %2520 = vmatpush1.msra.mxu1 %v2332_v32  ;;  %v2321_v34 = vpop.permute.xlu0 %2320 }
 0x3cb   : > { %2521 = vmatprep.subr.mxu1 %v3991_v2  ;;  %v2328_v52 = vsel %vm1314_vm12, %v2321_v34, %v4984_v61 }
 0x3cc   : > { %2522 = vmatpush1.msra.mxu1 %v4717_v49 }
 0x3cd   : > { %2523 = vmatprep.subr.mxu1 %v3991_v2 }
 0x3ce   : > { %v5021_v35 = vpop.permute.xlu1 %2282  ;;  %2524 = vmatpush1.msra.mxu1 %v4758_v9  ;;  %v2307_v5 = vpop.permute.xlu0 %2306  ;;  %v2364_v9 = vsel %vm1334_vm6, %v2357_v23, %v2361_v55 }
 0x3cf   : > { %2525 = vmatprep.subr.mxu1 %v3991_v2 }
 0x3d2   : > { %v5025_v36 = vpop.permute.xlu1 %2264  ;;  %v5027_v37 = vpop.permute.xlu0 %2288 }
 0x3d6   : > { %v2359_v10 = vpop.permute.xlu1 %2358  ;;  %v5029_v38 = vpop.permute.xlu0 %2270 }
 0x3d7   : > { %v2367_v17 = vsel %vm1334_vm6, %v2355_v18, %v2359_v10  ;;  %v2365_v49 = vsel %vm1334_vm6, %v2359_v10, %v2363_v50  ;;  %v2315_v18 = vsel %vm1304_vm13, %v4976_v48, %v2301_v21  ;;  %v2278_v31 = vsel %vm1284_vm15, %v5029_v38, %v4996_v8 }
 0x3d8   : > { %2420 = vmatprep.subr.mxu0 %v2365_v49  ;;  %vm3257_vm6 = vcmask 7168  }
 0x3d9   : > { %2421 = vmatpush1.msra.mxu0 %v2367_v17 }
 0x3da   : > { %v2341_v39 = vpop.permute.xlu1 %2340  ;;  %2422 = vmatprep.subr.mxu0 %v2364_v9  ;;  %v5039_v40 = vpop.permute.xlu0 %2244 }
 0x3db   : > { %v2349_v41 = vsel %vm1324_vm11, %v2337_v20, %v2341_v39  ;;  %2423 = vmatpush1.msra.mxu0 %v2366_v11  ;;  %v2347_v42 = vsel %vm1324_vm11, %v2341_v39, %v2345_v54  ;;  %v2330_v54 = vsel %vm1314_vm12, %v4986_v1, %v2321_v34  ;;  %v2294_v20 = vsel %vm1294_vm14, %v4994_v7, %v4992_v14  ;;  %v2232_v39 = vld [vmem:[%s5468_s15] sm:$0xff] }
 0x3dc   : > { %2424 = vmatprep.subr.mxu0 %v2347_v42 }
 0x3dd   : > { %2425 = vmatpush1.msra.mxu0 %v2349_v41 }
 0x3de   : > { %v2323_v45 = vpop.permute.xlu1 %2322  ;;  %2426 = vmatprep.subr.mxu0 %v2346_v12  ;;  %v5049_v46 = vpop.permute.xlu0 %2252  ;;  %v2235_v12 = vld [vmem:[%s5468_s15 + $0x18] sm:$0xff] }
 0x3df   : > { %v2331_v47 = vsel %vm1314_vm12, %v2319_v29, %v2323_v45  ;;  %2427 = vmatpush1.msra.mxu0 %v2348_v43  ;;  %v2329_v50 = vsel %vm1314_vm12, %v2323_v45, %v4982_v60  ;;  %v2237_v43 = vld [vmem:[%s5468_s15 + $0x28] sm:$0xff] }
 0x3e0   : > { %2428 = vmatprep.subr.mxu0 %v2329_v50 }
 0x3e1   : > { %2429 = vmatpush1.msra.mxu0 %v2331_v47 }
 0x3e2   : > { %v2267_v55 = vpop.permute.xlu1 %2266  ;;  %2430 = vmatprep.subr.mxu0 %v2328_v52  ;;  %v5062_v56 = vpop.permute.xlu0 %2380 }
 0x3e3   : > { %2431 = vmatpush1.msra.mxu0 %v2330_v54  ;;  %v2274_v29 = vsel %vm1284_vm15, %v2267_v55, %v5029_v38  ;;  %v2276_v30 = vsel %vm1284_vm15, %v4996_v8, %v2267_v55 }
 0x3e4   : > { %2432 = vmatprep.subr.mxu0 %v4866_v25 }
 0x3e5   : > { %2433 = vmatpush1.msra.mxu0 %v4810_v44  ;;  %v2314_v44 = vsel %vm1304_vm13, %v2307_v5, %v4990_v6 }
 0x3e6   : > { %v2247_v57 = vpop.permute.xlu1 %2246  ;;  %2434 = vmatprep.subr.mxu0 %v4788_v15  ;;  %v2305_v60 = vpop.permute.xlu0 %2304  ;;  %v2310_v15 = vsel %vm1304_vm13, %v4988_v4, %v2307_v5 }
 0x3e7   : > { %v2311_v61 = vsel %vm1304_vm13, %v2305_v60, %v4976_v48  ;;  %2435 = vmatpush1.msra.mxu0 %v4731_v59  ;;  %v2313_v1 = vsel %vm1304_vm13, %v2301_v21, %v2305_v60  ;;  %v2312_v59 = vsel %vm1304_vm13, %v4990_v6, %v4988_v4  ;;  %v2297_v4 = vsel %vm1294_vm14, %v4978_v51, %v5021_v35 }
 0x3e8   : > { %2436 = vmatprep.subr.mxu0 %v2313_v1  ;;  %2526 = vmatpush1.msra.mxu1 %v2311_v61  ;;  %v2292_v6 = vsel %vm1294_vm14, %v4992_v14, %v5027_v37 }
 0x3e9   : > { %2437 = vmatpush1.msra.mxu0 %v2315_v18  ;;  %2527 = vmatprep.subr.mxu1 %v3991_v2 }
 0x3ea   : > { %v2255_v25 = vpop.permute.xlu1 %2254  ;;  %2438 = vmatprep.subr.mxu0 %v2312_v59  ;;  %2528 = vmatpush1.msra.mxu1 %v2310_v15  ;;  %v2287_v48 = vpop.permute.xlu0 %2286 }
 0x3eb   : > { %v2293_v19 = vsel %vm1294_vm14, %v2287_v48, %v4978_v51  ;;  %2439 = vmatpush1.msra.mxu0 %v2314_v44  ;;  %2529 = vmatprep.subr.mxu1 %v3991_v2  ;;  %v2295_v13 = vsel %vm1294_vm14, %v5021_v35, %v2287_v48  ;;  %v2296_v51 = vsel %vm1294_vm14, %v5027_v37, %v4994_v7 }
 0x3ec   : > { %2440 = vmatprep.subr.mxu0 %v2295_v13  ;;  %2530 = vmatpush1.msra.mxu1 %v2293_v19  ;;  %v2279_v7 = vsel %vm1284_vm15, %v4980_v53, %v5025_v36  ;;  %v2261_v35 = vsel %vm1274_vm1, %v2255_v25, %v2247_v57 }
 0x3ed   : > { %2441 = vmatpush1.msra.mxu0 %v2297_v4  ;;  %2531 = vmatprep.subr.mxu1 %v3991_v2 }
 0x3ee   : > { %v2249_v23 = vpop.permute.xlu1 %2248  ;;  %2442 = vmatprep.subr.mxu0 %v2294_v20  ;;  %2532 = vmatpush1.msra.mxu1 %v2292_v6  ;;  %v2269_v24 = vpop.permute.xlu0 %2268 }
 0x3ef   : > { %v2275_v26 = vsel %vm1284_vm15, %v2269_v24, %v4980_v53  ;;  %2443 = vmatpush1.msra.mxu0 %v2296_v51  ;;  %2533 = vmatprep.subr.mxu1 %v3991_v2  ;;  %v2277_v14 = vsel %vm1284_vm15, %v5025_v36, %v2269_v24  ;;  %v2256_v8 = vsel %vm1274_vm1, %v2249_v23, %v5049_v46 }
 0x3f0   : > { %2444 = vmatprep.subr.mxu0 %v2277_v14  ;;  %2534 = vmatpush1.msra.mxu1 %v2275_v26  ;;  %v2258_v5 = vsel %vm1274_vm1, %v5039_v40, %v2249_v23  ;;  %v2260_v36 = vsel %vm1274_vm1, %v5049_v46, %v5039_v40 }
 0x3f1   : > { %2445 = vmatpush1.msra.mxu0 %v2279_v7  ;;  %2535 = vmatprep.subr.mxu1 %v3991_v2 }
 0x3f2   : > { %v2373_v32 = vpop.permute.xlu1 %2372  ;;  %2446 = vmatprep.subr.mxu0 %v2276_v30  ;;  %2536 = vmatpush1.msra.mxu1 %v2274_v29  ;;  %v2251_v53 = vpop.permute.xlu0 %2250 }
 0x3f3   : > { %v2257_v21 = vsel %vm1274_vm1, %v2251_v53, %v2255_v25  ;;  %2447 = vmatpush1.msra.mxu0 %v2278_v31  ;;  %2537 = vmatprep.subr.mxu1 %v3991_v2  ;;  %v2259_v34 = vsel %vm1274_vm1, %v2247_v57, %v2251_v53  ;;  %v2387_v38 = vsel %vm1344_vm3, %v5062_v56, %v2373_v32 }
 0x3f4   : > { %2448 = vmatprep.subr.mxu0 %v2259_v34  ;;  %2538 = vmatpush1.msra.mxu1 %v2257_v21 }
 0x3f5   : > { %2449 = vmatpush1.msra.mxu0 %v2261_v35  ;;  %2539 = vmatprep.subr.mxu1 %v3991_v2 }
 0x3f6   : > { %v2377_v37 = vpop.permute.xlu1 %2376  ;;  %2450 = vmatprep.subr.mxu0 %v2258_v5  ;;  %2540 = vmatpush1.msra.mxu1 %v2256_v8  ;;  %v2375_v10 = vpop.permute.xlu0 %2374 }
 0x3f7   : > { %v2385_v17 = vsel %vm1344_vm3, %v2373_v32, %v2377_v37  ;;  %2451 = vmatpush1.msra.mxu0 %v2260_v36  ;;  %2569 = vmatprep.subr.mxu1 %v3991_v2  ;;  %v2383_v49 = vsel %vm1344_vm3, %v2377_v37, %v5062_v56 }
 0x3f8   : > { %2480 = vmatprep.subr.mxu0 %v2383_v49  ;;  %2570 = vmatpush2.msra.mxu1 %v2387_v38 }
 0x3f9   : > { %2481 = vmatpush2.msra.mxu0 %v2385_v17  ;;  %2571 = vmatprep.subr.mxu1 %v3991_v2 }
 0x3fa   : > { %v2379_v9 = vpop.permute.xlu1 %2378  ;;  %v2371_v11 = vpop.permute.xlu0 %2370 }
 0x3fb   : > { %v2384_v40 = vsel %vm1344_vm3, %v2371_v11, %v2375_v10  ;;  %v2386_v41 = vsel %vm1344_vm3, %v2379_v9, %v2371_v11  ;;  %v2382_v42 = vsel %vm1344_vm3, %v2375_v10, %v2379_v9  ;;  %vm2986_vm3 = vcmask 261120  }
 0x3fc   : > { %2482 = vmatprep.subr.mxu0 %v2382_v42  ;;  %2572 = vmatpush2.msra.mxu1 %v2386_v41 }
 0x3fd   : > { %2483 = vmatpush2.msra.mxu0 %v2384_v40  ;;  %2574 = vmatmul.mubr.f32.vlgmr.msra.gmra.mxu1 %v2232_v39 }
 0x3fe   : > { %3692 = vmatprep.subr.mxu1 %v4558_v22  ;;  %2485 = vmatmul.mubr.f32.vlgmr.msra.gmra.mxu0 %v2232_v39 }
 0x3ff   : > { %2778 = vmatprep.subr.mxu0 %v4566_v62  ;;  %3693 = vmatpush3.xpose.msra.mxu1 %v4558_v22  ;;  %v2236_v22 = vld [vmem:[%s5468_s15 + $0x20] sm:$0xff]  ;;  %v2238_v62 = vld [vmem:[%s5468_s15 + $0x30] sm:$0xff] }
 0x400   : > { %2779 = vmatpush1.xpose.msra.mxu0 %v4574_v0  ;;  %3694 = vmatprep.subr.mxu1 %v4583_v3 }
 0x401   : > { %3556 = vmatprep.mubr.msk.f32.mxu1 %vm1961_vm2, %v2235_v12  ;;  %2780 = vmatprep.subr.mxu0 %v4563_v58  ;;  %v2239_v58 = vld [vmem:[%s5468_s15 + $0x38] sm:$0xff] }
 0x402   : > { %3552 = vmatprep.mubr.msk.f32.mxu0 %vm1961_vm2, %v2235_v12  ;;  %2579 = vmatmul.mubr.f32.gmra.mxu1 %v2234_v16 }
 0x403   : > { %2491 = vmatmul.mubr.f32.gmra.mxu0 %v2234_v16  ;;  %3695 = vmatpush3.xpose.msra.mxu1 %v4583_v3 }
 0x404   : > { %2781 = vmatpush1.xpose.msra.mxu0 %v4571_v63  ;;  %3557 = vmatprep.mubr.msk.f32.mxu1 %vm1961_vm2, %v2237_v43 }
 0x405   : > { %3553 = vmatprep.mubr.msk.f32.mxu0 %vm1961_vm2, %v2237_v43  ;;  %3708 = vmatprep.subr.mxu1 %v3991_v2 }
 0x406   : > { %2584 = vmatmul.mubr.f32.gmra.mxu1 %v2236_v22  ;;  %3715 = vmatprep.subr.mxu0 %v3991_v2 }
 0x407   : > { %2497 = vmatmul.mubr.f32.gmra.mxu0 %v2236_v22  ;;  %3558 = vmatprep.mubr.msk.f32.mxu1 %vm1961_vm2, %v2239_v58  ;;  %v1944_v63 = vpop.permute.xlu1 %1943  ;;  %v1949_v54 = vpop.permute.xlu0 %1948 }
 0x408   : > { %3554 = vmatprep.mubr.msk.f32.mxu0 %vm1961_vm2, %v2239_v58 }
 0x40a   : > { %2589 = vmatmul.mubr.f32.gmra.mxu1 %v2238_v62 }
 0x40b   : > { %2503 = vmatmul.mubr.f32.gmra.mxu0 %v2238_v62  ;;  %v1954_v25 = vpop.permute.xlu1 %1953  ;;  %v1959_v14 = vpop.permute.xlu0 %1958 }
 0x42a   : > { %v2129_v0 = vpop.f32.mrf.mxu1 }
 0x42b   : > { %v2130_v3 = vadd.f32 %v2129_v0, %v1944_v63  ;;  %v2040_v45 = vpop.f32.mrf.mxu0 }
 0x42c   : > { %v2041_v46 = vadd.f32 %v2040_v45, %v1944_v63  ;;  %v2131_v47 = vpop.f32.mrf.mxu1 }
 0x42d   : > { %v3541_v50 = vmul.f32 -1.442695, %v2130_v3  ;;  %v2042_v52 = vpop.f32.mrf.mxu0 }
 0x42e   : > { %v3539_v55 = vmul.f32 -1.442695, %v2041_v46  ;;  %v2043_v56 = vadd.f32 %v2042_v52, %v1944_v63  ;;  %v2134_v57 = vpop.f32.mrf.mxu1 }
 0x42f   : > { %3817 = vpow2.f32 %v3541_v50  ;;  %v2135_v60 = vadd.f32 %v2134_v57, %v1949_v54  ;;  %v2046_v61 = vpop.f32.mrf.mxu0 }
 0x430   : > { %3819 = vpow2.f32 %v3539_v55  ;;  %v3540_v1 = vmul.f32 -1.442695, %v2043_v56  ;;  %v2047_v18 = vadd.f32 %v2046_v61, %v1949_v54  ;;  %v2136_v15 = vpop.f32.mrf.mxu1 }
 0x431   : > { %v3544_v59 = vmul.f32 -1.442695, %v2135_v60  ;;  %v2048_v44 = vpop.f32.mrf.mxu0 }
 0x432   : > { %3821 = vpow2.f32 %v3540_v1  ;;  %v3542_v48 = vmul.f32 -1.442695, %v2047_v18  ;;  %v2049_v19 = vadd.f32 %v2048_v44, %v1949_v54  ;;  %v2139_v13 = vpop.f32.mrf.mxu1 }
 0x433   : > { %3823 = vpow2.f32 %v3544_v59  ;;  %v2140_v4 = vadd.f32 %v2139_v13, %v1954_v25  ;;  %v2052_v6 = vpop.f32.mrf.mxu0 }
 0x434   : > { %3825 = vpow2.f32 %v3542_v48  ;;  %v3543_v20 = vmul.f32 -1.442695, %v2049_v19  ;;  %v2053_v51 = vadd.f32 %v2052_v6, %v1954_v25  ;;  %v2141_v23 = vpop.f32.mrf.mxu1 }
 0x435   : > { %v3547_v24 = vmul.f32 -1.442695, %v2140_v4  ;;  %v2054_v26 = vpop.f32.mrf.mxu0 }
 0x436   : > { %3827 = vpow2.f32 %v3543_v20  ;;  %v3545_v7 = vmul.f32 -1.442695, %v2053_v51  ;;  %v2055_v29 = vadd.f32 %v2054_v26, %v1954_v25  ;;  %v2144_v30 = vpop.f32.mrf.mxu1 }
 0x437   : > { %3829 = vpow2.f32 %v3547_v24  ;;  %v2145_v31 = vadd.f32 %v2144_v30, %v1959_v14  ;;  %v2058_v32 = vpop.f32.mrf.mxu0 }
 0x438   : > { %3831 = vpow2.f32 %v3545_v7  ;;  %v3546_v53 = vmul.f32 -1.442695, %v2055_v29  ;;  %v2059_v21 = vadd.f32 %v2058_v32, %v1959_v14  ;;  %v2146_v34 = vpop.f32.mrf.mxu1 }
 0x439   : > { %v3550_v35 = vmul.f32 -1.442695, %v2145_v31  ;;  %v2060_v8 = vpop.f32.mrf.mxu0 }
 0x43a   : > { %3833 = vpow2.f32 %v3546_v53  ;;  %v3548_v5 = vmul.f32 -1.442695, %v2059_v21  ;;  %v2061_v36 = vadd.f32 %v2060_v8, %v1959_v14  ;;  %v2391_v8 = vpop.permute.xlu1 %2390 }
 0x43b   : > { %3835 = vpow2.f32 %v3550_v35 }
 0x43c   : > { %v3818_v37 = vpop.eup %3817  ;;  %3837 = vpow2.f32 %v3548_v5  ;;  %v3549_v10 = vmul.f32 -1.442695, %v2061_v36 }
 0x43d   : > { %v3820_v38 = vpop.eup %3819  ;;  %v2186_v17 = vadd.f32 1.0, %v3818_v37 }
 0x43e   : > { %v2184_v49 = vadd.f32 1.0, %v3820_v38  ;;  %3839 = vpow2.f32 %v3549_v10 }
 0x43f   : > { %v3822_v9 = vpop.eup %3821 }
 0x440   : > { %v3824_v11 = vpop.eup %3823  ;;  %3841 = vrcp.f32 %v2184_v49  ;;  %v2185_v39 = vadd.f32 1.0, %v3822_v9 }
 0x441   : > { %v3826_v40 = vpop.eup %3825  ;;  %3843 = vrcp.f32 %v2186_v17  ;;  %v2189_v41 = vadd.f32 1.0, %v3824_v11 }
 0x442   : > { %3845 = vrcp.f32 %v2185_v39  ;;  %v2187_v42 = vadd.f32 1.0, %v3826_v40  ;;  %v2396_v39 = vpop.permute.xlu0 %2395 }
 0x443   : > { %v3828_v12 = vpop.eup %3827 }
 0x444   : > { %v3830_v16 = vpop.eup %3829  ;;  %3847 = vrcp.f32 %v2187_v42  ;;  %v2188_v43 = vadd.f32 1.0, %v3828_v12 }
 0x445   : > { %v3832_v22 = vpop.eup %3831  ;;  %3849 = vrcp.f32 %v2189_v41  ;;  %v2192_v58 = vadd.f32 1.0, %v3830_v16 }
 0x446   : > { %3851 = vrcp.f32 %v2188_v43  ;;  %v2190_v62 = vadd.f32 1.0, %v3832_v22 }
 0x447   : > { %v3834_v63 = vpop.eup %3833 }
 0x448   : > { %v3836_v0 = vpop.eup %3835  ;;  %3853 = vrcp.f32 %v2190_v62  ;;  %v2191_v3 = vadd.f32 1.0, %v3834_v63  ;;  %v2401_v62 = vpop.permute.xlu1 %2400 }
 0x449   : > { %v3838_v45 = vpop.eup %3837  ;;  %3855 = vrcp.f32 %v2192_v58  ;;  %v2195_v46 = vadd.f32 1.0, %v3836_v0 }
 0x44a   : > { %3857 = vrcp.f32 %v2191_v3  ;;  %v2193_v47 = vadd.f32 1.0, %v3838_v45 }
 0x44b   : > { %v3840_v50 = vpop.eup %3839 }
 0x44c   : > { %3859 = vrcp.f32 %v2193_v47  ;;  %v2194_v52 = vadd.f32 1.0, %v3840_v50 }
 0x44d   : > { %v3842_v54 = vpop.eup %3841  ;;  %3861 = vrcp.f32 %v2195_v46 }
 0x44e   : > { %v3844_v55 = vpop.eup %3843  ;;  %3863 = vrcp.f32 %v2194_v52  ;;  %v5205_v57 = vmul.f32 %v3842_v54, %v4272_v28 }
 0x44f   : > { %v3846_v56 = vpop.eup %3845  ;;  %v5211_v18 = vmul.f32 %v3844_v55, %v4269_v27 }
 0x450   : > { %v5208_v60 = vmul.f32 %v3846_v56, %v4275_v33  ;;  %v2406_v56 = vpop.permute.xlu0 %2405 }
 0x451   : > { %v3848_v61 = vpop.eup %3847 }
 0x452   : > { %v3850_v1 = vpop.eup %3849  ;;  %v2678_v15 = vadd.f32 %v5208_v60, %v5205_v57  ;;  %v5217_v25 = vmul.f32 %v3848_v61, %v4272_v28 }
 0x453   : > { %v3852_v59 = vpop.eup %3851  ;;  %v5223_v4 = vmul.f32 %v3850_v1, %v4269_v27 }
 0x454   : > { %v2679_v44 = vadd.f32 %v2678_v15, %v5211_v18  ;;  %v5220_v48 = vmul.f32 %v3852_v59, %v4275_v33 }
 0x455   : > { %v3854_v19 = vpop.eup %3853 }
 0x456   : > { %v3856_v13 = vpop.eup %3855  ;;  %2680 = vadd.xlane.f32.xlu1 %v2679_v44  ;;  %v2682_v6 = vadd.f32 %v5220_v48, %v5217_v25  ;;  %v5229_v23 = vmul.f32 %v3854_v19, %v4272_v28 }
 0x457   : > { %v3858_v20 = vpop.eup %3857  ;;  %v5235_v7 = vmul.f32 %v3856_v13, %v4269_v27 }
 0x458   : > { %v2683_v51 = vadd.f32 %v2682_v6, %v5223_v4  ;;  %v5232_v24 = vmul.f32 %v3858_v20, %v4275_v33 }
 0x459   : > { %v3860_v26 = vpop.eup %3859 }
 0x45a   : > { %v3862_v14 = vpop.eup %3861  ;;  %2684 = vadd.xlane.f32.xlu0 %v2683_v51  ;;  %v2686_v29 = vadd.f32 %v5232_v24, %v5229_v23  ;;  %v5241_v32 = vmul.f32 %v3860_v26, %v4272_v28 }
 0x45b   : > { %v3864_v30 = vpop.eup %3863  ;;  %v5247_v21 = vmul.f32 %v3862_v14, %v4269_v27 }
 0x45c   : > { %v2687_v31 = vadd.f32 %v2686_v29, %v5235_v7  ;;  %v5244_v53 = vmul.f32 %v3864_v30, %v4275_v33 }
 0x45e   : > { %2688 = vadd.xlane.f32.xlu0 %v2687_v31  ;;  %v2690_v34 = vadd.f32 %v5244_v53, %v5241_v32 }
 0x460   : > { %v2691_v35 = vadd.f32 %v2690_v34, %v5247_v21 }
 0x462   : > { %2692 = vadd.xlane.f32.xlu1 %v2691_v35 }
 0x4bd   : > { %v2575_v5 = vpop.f32.mrf.mxu1 }
 0x4be   : > { %v2576_v36 = vadd.f32 %v2575_v5, %v2391_v8  ;;  %v2486_v37 = vpop.f32.mrf.mxu0 }
 0x4bf   : > { %v2487_v10 = vadd.f32 %v2486_v37, %v2391_v8  ;;  %v2577_v38 = vpop.f32.mrf.mxu1 }
 0x4c0   : > { %v3561_v17 = vmul.f32 -1.442695, %v2576_v36  ;;  %v2488_v49 = vpop.f32.mrf.mxu0 }
 0x4c1   : > { %v3559_v9 = vmul.f32 -1.442695, %v2487_v10  ;;  %v2489_v11 = vadd.f32 %v2488_v49, %v2391_v8 }
 0x4c2   : > { %3865 = vpow2.f32 %v3561_v17  ;;  %v2580_v40 = vpop.f32.mrf.mxu1 }
 0x4c3   : > { %3867 = vpow2.f32 %v3559_v9  ;;  %v3560_v41 = vmul.f32 -1.442695, %v2489_v11  ;;  %v2581_v42 = vadd.f32 %v2580_v40, %v2396_v39  ;;  %v2492_v12 = vpop.f32.mrf.mxu0 }
 0x4c4   : > { %v2493_v16 = vadd.f32 %v2492_v12, %v2396_v39  ;;  %v2582_v43 = vpop.f32.mrf.mxu1 }
 0x4c5   : > { %3869 = vpow2.f32 %v3560_v41  ;;  %v3564_v22 = vmul.f32 -1.442695, %v2581_v42  ;;  %v2494_v58 = vpop.f32.mrf.mxu0 }
 0x4c6   : > { %v3562_v63 = vmul.f32 -1.442695, %v2493_v16  ;;  %v2495_v0 = vadd.f32 %v2494_v58, %v2396_v39  ;;  %v2585_v3 = vpop.f32.mrf.mxu1 }
 0x4c7   : > { %3871 = vpow2.f32 %v3564_v22  ;;  %v2586_v45 = vadd.f32 %v2585_v3, %v2401_v62  ;;  %v2498_v46 = vpop.f32.mrf.mxu0 }
 0x4c8   : > { %3873 = vpow2.f32 %v3562_v63  ;;  %v3563_v47 = vmul.f32 -1.442695, %v2495_v0  ;;  %v2499_v50 = vadd.f32 %v2498_v46, %v2401_v62  ;;  %v2587_v52 = vpop.f32.mrf.mxu1 }
 0x4c9   : > { %v3567_v54 = vmul.f32 -1.442695, %v2586_v45  ;;  %v2500_v55 = vpop.f32.mrf.mxu0 }
 0x4ca   : > { %3875 = vpow2.f32 %v3563_v47  ;;  %v3565_v61 = vmul.f32 -1.442695, %v2499_v50  ;;  %v2501_v1 = vadd.f32 %v2500_v55, %v2401_v62  ;;  %v2590_v15 = vpop.f32.mrf.mxu1 }
 0x4cb   : > { %3877 = vpow2.f32 %v3567_v54  ;;  %v2591_v59 = vadd.f32 %v2590_v15, %v2406_v56  ;;  %v2504_v44 = vpop.f32.mrf.mxu0 }
 0x4cc   : > { %3879 = vpow2.f32 %v3565_v61  ;;  %v3566_v19 = vmul.f32 -1.442695, %v2501_v1  ;;  %v2505_v13 = vadd.f32 %v2504_v44, %v2406_v56  ;;  %v2592_v6 = vpop.f32.mrf.mxu1 }
 0x4cd   : > { %v3570_v20 = vmul.f32 -1.442695, %v2591_v59  ;;  %v2506_v51 = vpop.f32.mrf.mxu0 }
 0x4ce   : > { %3881 = vpow2.f32 %v3566_v19  ;;  %v3568_v26 = vmul.f32 -1.442695, %v2505_v13  ;;  %v2507_v14 = vadd.f32 %v2506_v51, %v2406_v56 }
 0x4cf   : > { %v3866_v29 = vpop.eup %3865  ;;  %3883 = vpow2.f32 %v3570_v20 }
 0x4d0   : > { %v3868_v30 = vpop.eup %3867  ;;  %v2632_v31 = vadd.f32 1.0, %v3866_v29  ;;  %3885 = vpow2.f32 %v3568_v26  ;;  %v3569_v34 = vmul.f32 -1.442695, %v2507_v14 }
 0x4d1   : > { %v2630_v35 = vadd.f32 1.0, %v3868_v30 }
 0x4d2   : > { %v3870_v8 = vpop.eup %3869  ;;  %3887 = vrcp.f32 %v2632_v31 }
 0x4d3   : > { %3889 = vrcp.f32 %v2630_v35  ;;  %v2631_v5 = vadd.f32 1.0, %v3870_v8 }
 0x4d4   : > { %v3872_v36 = vpop.eup %3871  ;;  %3891 = vpow2.f32 %v3569_v34 }
 0x4d5   : > { %v3874_v37 = vpop.eup %3873  ;;  %3893 = vrcp.f32 %v2631_v5  ;;  %v2635_v10 = vadd.f32 1.0, %v3872_v36 }
 0x4d6   : > { %v2633_v38 = vadd.f32 1.0, %v3874_v37 }
 0x4d7   : > { %v3876_v17 = vpop.eup %3875 }
 0x4d8   : > { %v3878_v49 = vpop.eup %3877  ;;  %3895 = vrcp.f32 %v2633_v38  ;;  %v2634_v9 = vadd.f32 1.0, %v3876_v17 }
 0x4d9   : > { %v3880_v11 = vpop.eup %3879  ;;  %3897 = vrcp.f32 %v2635_v10  ;;  %v2638_v39 = vadd.f32 1.0, %v3878_v49 }
 0x4da   : > { %3899 = vrcp.f32 %v2634_v9  ;;  %v2636_v40 = vadd.f32 1.0, %v3880_v11 }
 0x4db   : > { %v3882_v41 = vpop.eup %3881 }
 0x4dc   : > { %v3884_v42 = vpop.eup %3883  ;;  %3901 = vrcp.f32 %v2636_v40  ;;  %v2637_v12 = vadd.f32 1.0, %v3882_v41 }
 0x4dd   : > { %v3886_v16 = vpop.eup %3885  ;;  %3903 = vrcp.f32 %v2638_v39  ;;  %v2641_v58 = vadd.f32 1.0, %v3884_v42 }
 0x4de   : > { %3905 = vrcp.f32 %v2637_v12  ;;  %v2639_v43 = vadd.f32 1.0, %v3886_v16 }
 0x4df   : > { %v3888_v22 = vpop.eup %3887  ;;  %v2681_v62 = vpop.xlane.xlu1 %2680 }
 0x4e0   : > { %v3890_v63 = vpop.eup %3889  ;;  %v2710_v0 = vmax.f32 %v2681_v62, 1e-06  ;;  %3907 = vrcp.f32 %v2639_v43  ;;  %v5259_v56 = vmul.f32 %v3888_v22, %v4269_v27 }
 0x4e1   : > { %v3892_v3 = vpop.eup %3891  ;;  %v5253_v50 = vmul.f32 %v3890_v63, %v4272_v28 }
 0x4e2   : > { %v3894_v45 = vpop.eup %3893  ;;  %v2640_v46 = vadd.f32 1.0, %v3892_v3  ;;  %3909 = vrcp.f32 %v2710_v0 }
 0x4e3   : > { %3911 = vrcp.f32 %v2641_v58  ;;  %v2685_v47 = vpop.xlane.xlu0 %2684  ;;  %v5256_v52 = vmul.f32 %v3894_v45, %v4275_v33 }
 0x4e4   : > { %3913 = vrcp.f32 %v2640_v46  ;;  %v2711_v54 = vmax.f32 %v2685_v47, 1e-06 }
 0x4e5   : > { %v3896_v55 = vpop.eup %3895  ;;  %v2694_v61 = vadd.f32 %v5256_v52, %v5253_v50 }
 0x4e6   : > { %v3898_v1 = vpop.eup %3897  ;;  %3915 = vrcp.f32 %v2711_v54  ;;  %v5265_v13 = vmul.f32 %v3896_v55, %v4272_v28 }
 0x4e7   : > { %v3900_v15 = vpop.eup %3899  ;;  %v2689_v59 = vpop.xlane.xlu0 %2688  ;;  %v2695_v44 = vadd.f32 %v2694_v61, %v5259_v56  ;;  %v5271_v26 = vmul.f32 %v3898_v1, %v4269_v27 }
 0x4e8   : > { %v2712_v19 = vmax.f32 %v2689_v59, 1e-06  ;;  %v5268_v6 = vmul.f32 %v3900_v15, %v4275_v33 }
 0x4e9   : > { %v3902_v20 = vpop.eup %3901  ;;  %2696 = vadd.xlane.f32.xlu0 %v2695_v44 }
 0x4ea   : > { %v3904_v51 = vpop.eup %3903  ;;  %3917 = vrcp.f32 %v2712_v19  ;;  %v2698_v14 = vadd.f32 %v5268_v6, %v5265_v13  ;;  %v5277_v35 = vmul.f32 %v3902_v20, %v4272_v28 }
 0x4eb   : > { %v3906_v29 = vpop.eup %3905  ;;  %v2693_v30 = vpop.xlane.xlu1 %2692  ;;  %v5283_v36 = vmul.f32 %v3904_v51, %v4269_v27 }
 0x4ec   : > { %v2713_v31 = vmax.f32 %v2693_v30, 1e-06  ;;  %v2699_v34 = vadd.f32 %v2698_v14, %v5271_v26  ;;  %v5280_v8 = vmul.f32 %v3906_v29, %v4275_v33 }
 0x4ed   : > { %v3908_v5 = vpop.eup %3907 }
 0x4ee   : > { %3919 = vrcp.f32 %v2713_v31  ;;  %2700 = vadd.xlane.f32.xlu1 %v2699_v34  ;;  %v2702_v37 = vadd.f32 %v5280_v8, %v5277_v35  ;;  %v5292_v40 = vmul.f32 %v3908_v5, %v4272_v28 }
 0x4ef   : > { %v3910_v10 = vpop.eup %3909 }
 0x4f0   : > { %v3912_v38 = vpop.eup %3911  ;;  %v2703_v17 = vadd.f32 %v2702_v37, %v5283_v36  ;;  %v2720_v49 = vmul.f32 %v3910_v10, %v5208_v60  ;;  %v2721_v9 = vmul.f32 %v3910_v10, %v5211_v18  ;;  %v2719_v11 = vmul.f32 %v3910_v10, %v5205_v57 }
 0x4f1   : > { %v3914_v39 = vpop.eup %3913  ;;  %v2677_v12 = vmul.f32 %v3912_v38, %v4269_v27 }
 0x4f2   : > { %2704 = vadd.xlane.f32.xlu0 %v2703_v17  ;;  %2814 = vmatprep.mubr.f32.mxu0 %v2720_v49  ;;  %v2676_v41 = vmul.f32 %v3914_v39, %v4275_v33 }
 0x4f3   : > { %v3916_v42 = vpop.eup %3915  ;;  %3696 = vmatprep.mubr.f32.mxu1 %v2721_v9  ;;  %2815 = vmatmul.mubr.f32.vlgmr.msra.gmra.mxu0 %v2719_v11 }
 0x4f4   : > { %v2706_v16 = vadd.f32 %v2676_v41, %v5292_v40  ;;  %v2724_v60 = vmul.f32 %v3916_v42, %v5220_v48  ;;  %v2725_v18 = vmul.f32 %v3916_v42, %v5223_v4  ;;  %v2723_v57 = vmul.f32 %v3916_v42, %v5217_v25 }
 0x4f6   : > { %v2707_v43 = vadd.f32 %v2706_v16, %v2677_v12  ;;  %2819 = vmatprep.mubr.f32.mxu0 %v2724_v60  ;;  %3697 = vmatmul.mubr.f32.vlgmr.msra.gmra.mxu1 %v2725_v18  ;;  %v3080_v16 = vld [vmem:[%s5472_s19 + $0x38] sm:$0xff]  ;;  %v3079_v60 = vld [vmem:[%s5472_s19 + $0x30] sm:$0xff]  ;;  %v2993_v18 = vld [vmem:[%s5471_s18] sm:$0xff] }
 0x4f7   : > { %v3918_v28 = vpop.eup %3917  ;;  %2820 = vmatmul.mubr.f32.gmra.mxu0 %v2723_v57  ;;  %v3078_v57 = vld [vmem:[%s5472_s19 + $0x28] sm:$0xff] }
 0x4f8   : > { %2708 = vadd.xlane.f32.xlu1 %v2707_v43  ;;  %v2728_v33 = vmul.f32 %v3918_v28, %v5232_v24  ;;  %v2729_v22 = vmul.f32 %v3918_v28, %v5235_v7  ;;  %v2727_v27 = vmul.f32 %v3918_v28, %v5229_v23  ;;  %3716 = vmatpush3.msra.mxu0 %v3080_v16 }
 0x4f9   : > { %3717 = vmatprep.subr.mxu0 %v3991_v2 }
 0x4fa   : > { %2824 = vmatprep.mubr.f32.mxu0 %v2728_v33  ;;  %3699 = vmatprep.mubr.f32.mxu1 %v2729_v22  ;;  %v3077_v33 = vld [vmem:[%s5472_s19 + $0x20] sm:$0xff] }
 0x4fb   : > { %v3920_v58 = vpop.eup %3919  ;;  %2825 = vmatmul.mubr.f32.gmra.mxu0 %v2727_v27 }
 0x4fc   : > { %v2732_v48 = vmul.f32 %v3920_v58, %v5244_v53  ;;  %v2733_v25 = vmul.f32 %v3920_v58, %v5247_v21  ;;  %v2731_v4 = vmul.f32 %v3920_v58, %v5241_v32  ;;  %3718 = vmatpush3.msra.mxu0 %v3079_v60 }
 0x4fd   : > { %3719 = vmatprep.subr.mxu0 %v3991_v2 }
 0x4fe   : > { %2829 = vmatprep.mubr.f32.mxu0 %v2732_v48  ;;  %3700 = vmatmul.mubr.f32.gmra.mxu1 %v2733_v25  ;;  %v3076_v48 = vld [vmem:[%s5472_s19 + $0x18] sm:$0xff] }
 0x4ff   : > { %2830 = vmatmul.mubr.f32.gmra.mxu0 %v2731_v4 }
 0x500   : > { %3720 = vmatpush3.msra.mxu0 %v3078_v57 }
 0x501   : > { %3721 = vmatprep.subr.mxu0 %v3991_v2 }
 0x502   : > { %3722 = vmatpush3.msra.mxu0 %v3077_v33 }
 0x503   : > { %3723 = vmatprep.subr.mxu0 %v3991_v2 }
 0x504   : > { %3724 = vmatpush3.msra.mxu0 %v3076_v48 }
 0x505   : > { %3725 = vmatprep.subr.mxu0 %v3991_v2 }
 0x572   : > { %v2697_v62 = vpop.xlane.xlu0 %2696 }
 0x573   : > { %v2714_v63 = vmax.f32 %v2697_v62, 1e-06 }
 0x575   : > { %3921 = vrcp.f32 %v2714_v63 }
 0x577   : > { %v2701_v24 = vpop.xlane.xlu1 %2700 }
 0x578   : > { %v2715_v7 = vmax.f32 %v2701_v24, 1e-06 }
 0x57a   : > { %3923 = vrcp.f32 %v2715_v7 }
 0x57b   : > { %v2705_v23 = vpop.xlane.xlu0 %2704 }
 0x57c   : > { %v2716_v0 = vmax.f32 %v2705_v23, 1e-06 }
 0x57e   : > { %3925 = vrcp.f32 %v2716_v0 }
 0x581   : > { %v2709_v3 = vpop.xlane.xlu1 %2708 }
 0x582   : > { %v3922_v45 = vpop.eup %3921  ;;  %v2717_v46 = vmax.f32 %v2709_v3, 1e-06 }
 0x583   : > { %v2736_v53 = vmul.f32 %v3922_v45, %v5256_v52  ;;  %v2737_v21 = vmul.f32 %v3922_v45, %v5259_v56  ;;  %v2735_v32 = vmul.f32 %v3922_v45, %v5253_v50 }
 0x584   : > { %3927 = vrcp.f32 %v2717_v46 }
 0x585   : > { %2834 = vmatprep.mubr.f32.mxu0 %v2736_v53  ;;  %3702 = vmatprep.mubr.f32.mxu1 %v2737_v21  ;;  %v2992_v21 = vld [vmem:[%s5470_s17] sm:$0xff] }
 0x586   : > { %2835 = vmatmul.mubr.f32.gmra.mxu0 %v2735_v32 }
 0x587   : > { %v3924_v47 = vpop.eup %3923 }
 0x588   : > { %v2740_v54 = vmul.f32 %v3924_v47, %v5268_v6  ;;  %v2741_v55 = vmul.f32 %v3924_v47, %v5271_v26  ;;  %v2739_v61 = vmul.f32 %v3924_v47, %v5265_v13  ;;  %v3075_v47 = vld [vmem:[%s5472_s19 + $0x10] sm:$0xff] }
 0x589   : > { %3726 = vmatpush3.msra.mxu0 %v3075_v47 }
 0x58a   : > { %2839 = vmatprep.mubr.f32.mxu0 %v2740_v54  ;;  %3703 = vmatmul.mubr.f32.gmra.mxu1 %v2741_v55  ;;  %v3074_v54 = vld [vmem:[%s5472_s19 + $0x8] sm:$0xff]  ;;  %v3073_v55 = vld [vmem:[%s5472_s19] sm:$0xff] }
 0x58b   : > { %v3926_v1 = vpop.eup %3925  ;;  %2840 = vmatmul.mubr.f32.gmra.mxu0 %v2739_v61  ;;  %3727 = vmatprep.subr.mxu0 %v3991_v2  ;;  %v3170_v61 = vld [vmem:[%s5474_s21 + $0x38] sm:$0xff] }
 0x58c   : > { %v2744_v52 = vmul.f32 %v3926_v1, %v5280_v8  ;;  %v2745_v56 = vmul.f32 %v3926_v1, %v5283_v36  ;;  %v2743_v50 = vmul.f32 %v3926_v1, %v5277_v35  ;;  %3728 = vmatpush3.msra.mxu0 %v3074_v54  ;;  %v3169_v1 = vld [vmem:[%s5474_s21 + $0x30] sm:$0xff] }
 0x58d   : > { %3729 = vmatprep.subr.mxu0 %v3991_v2 }
 0x58e   : > { %2844 = vmatprep.mubr.f32.mxu0 %v2744_v52  ;;  %3705 = vmatprep.mubr.f32.mxu1 %v2745_v56  ;;  %v3168_v52 = vld [vmem:[%s5474_s21 + $0x28] sm:$0xff]  ;;  %v3167_v56 = vld [vmem:[%s5474_s21 + $0x20] sm:$0xff] }
 0x58f   : > { %2845 = vmatmul.mubr.f32.gmra.mxu0 %v2743_v50  ;;  %v3166_v50 = vld [vmem:[%s5474_s21 + $0x18] sm:$0xff] }
 0x590   : > { %3730 = vmatpush3.msra.mxu0 %v3073_v55 }
 0x591   : > { %v3928_v15 = vpop.eup %3927 }
 0x592   : > { %v2748_v59 = vmul.f32 %v3928_v15, %v2676_v41  ;;  %v2749_v44 = vmul.f32 %v3928_v15, %v2677_v12  ;;  %v2747_v19 = vmul.f32 %v3928_v15, %v5292_v40 }
 0x594   : > { %2849 = vmatprep.mubr.f32.mxu0 %v2748_v59  ;;  %3706 = vmatmul.mubr.f32.gmra.mxu1 %v2749_v44 }
 0x595   : > { %2850 = vmatmul.mubr.f32.gmra.mxu0 %v2747_v19  ;;  %3712 = vmatprep.mubr.msk.f32.mxu1 %vm3992_vm0, %v3991_v2 }
 0x596   : > { %3731 = vmatprep.mubr.msk.f32.mxu0 %vm3992_vm0, %v3991_v2 }
 0x5b3   : > { %v2816_v13 = vpop.f32.mrf.mxu0 }
 0x5b5   : > { %v2818_v6 = vpop.f32.mrf.mxu0 }
 0x5b6   : > { %v3698_v20 = vpop.f32.mrf.mxu1  ;;  %v3165_v6 = vld [vmem:[%s5474_s21 + $0x10] sm:$0xff] }
 0x5b7   : > { %v2821_v51 = vpop.f32.mrf.mxu0 }
 0x5b8   : > { %v2927_v26 = vadd.f32 %v3698_v20, %v2821_v51  ;;  %v2921_v14 = vpop.f32.mrf.mxu1  ;;  %v3164_v20 = vld [vmem:[%s5474_s21 + $0x8] sm:$0xff]  ;;  %v3163_v51 = vld [vmem:[%s5474_s21] sm:$0xff] }
 0x5b9   : > { %v5320_v29 = vadd.f32 %v2921_v14, %v2816_v13  ;;  %v2823_v30 = vpop.f32.mrf.mxu0 }
 0x5bb   : > { %v2826_v31 = vpop.f32.mrf.mxu0 }
 0x5bd   : > { %v2828_v34 = vpop.f32.mrf.mxu0 }
 0x5be   : > { %v3701_v35 = vpop.f32.mrf.mxu1  ;;  %v3261_v34 = vld [vmem:[%s820_s29 + $0x10] sm:$0xff] }
 0x5bf   : > { %v2831_v8 = vpop.f32.mrf.mxu0 }
 0x5c0   : > { %v2937_v5 = vadd.f32 %v3701_v35, %v2831_v8  ;;  %v2931_v36 = vpop.f32.mrf.mxu1  ;;  %v3260_v35 = vld [vmem:[%s820_s29 + $0x8] sm:$0xff]  ;;  %v3259_v8 = vld [vmem:[%s820_s29] sm:$0xff] }
 0x5c1   : > { %v2932_v37 = vadd.f32 %v2931_v36, %v2826_v31  ;;  %v2833_v10 = vpop.f32.mrf.mxu0 }
 0x5c2   : > { %2964 = vrot.lane.b32.xlu0 %v2937_v5, %s4002_s10  ;;  %v3574_v5 = vld [vmem:[%s5475_s22] ss:$0 sm:$0xff] }
 0x5c3   : > { %2962 = vrot.lane.b32.xlu1 %v2932_v37, %s4002_s10  ;;  %s792_s10 = scalar_lea.vmem [#allocation4], %s3505_s4  ;;  %s3341_s4 = scalar_lea.sflag [#allocation5], %s790_s30 }
 0x634   : > { %v2965_v63 = vpop.permute.xlu0 %2964 }
 0x635   : > { %v2963_v4 = vpop.permute.xlu1 %2962  ;;  %v2985_v24 = vsel %vm1961_vm2, %v2927_v26, %v2965_v63  ;;  %v3572_v26 = vld [vmem:[%s5473_s20] ss:$0 sm:$0xff] }
 0x636   : > { %v2984_v45 = vsel %vm1961_vm2, %v5320_v29, %v2963_v4 }
 0x646   : > { %v2836_v38 = vpop.f32.mrf.mxu0 }
 0x648   : > { %v2838_v17 = vpop.f32.mrf.mxu0 }
 0x64a   : > { %v3704_v49 = vpop.f32.mrf.mxu1 }
 0x64b   : > { %v2841_v9 = vpop.f32.mrf.mxu0 }
 0x64c   : > { %v2947_v11 = vadd.f32 %v3704_v49, %v2841_v9  ;;  %v2941_v39 = vpop.f32.mrf.mxu1 }
 0x64d   : > { %v2843_v40 = vpop.f32.mrf.mxu0  ;;  %v2942_v42 = vadd.f32 %v2941_v39, %v2836_v38 }
 0x64e   : > { %2972 = vrot.lane.b32.xlu1 %v2947_v11, %s4003_s24 }
 0x64f   : > { %v2846_v41 = vpop.f32.mrf.mxu0 }
 0x651   : > { %v2848_v12 = vpop.f32.mrf.mxu0 }
 0x652   : > { %2970 = vrot.lane.b32.xlu1 %v2942_v42, %s4003_s24  ;;  %s4004_s24 = smov 48  }
 0x654   : > { %v3707_v43 = vpop.f32.mrf.mxu1 }
 0x655   : > { %v2851_v28 = vpop.f32.mrf.mxu0 }
 0x656   : > { %v2957_v22 = vadd.f32 %v3707_v43, %v2851_v28  ;;  %2996 = vperm.xlu1 %3810, %v2993_v18   ;;  %v2951_v27 = vpop.f32.mrf.mxu1 }
 0x657   : > { %v2853_v58 = vpop.f32.mrf.mxu0  ;;  %v2952_v25 = vadd.f32 %v2951_v27, %v2846_v41 }
 0x658   : > { %2980 = vrot.lane.b32.xlu0 %v2957_v22, %s4004_s24 }
 0x65c   : > { %2978 = vrot.lane.b32.xlu0 %v2952_v25, %s4004_s24  ;;  %s3512_s24 = sshll.u32 %s4197_s2, 3 }
 0x65d   : > { %s829_s6 = scalar_lea.vmem %s5478_s25, %s3512_s24  ;;  %s4007_s24 = smov [#allocation4]  }
 0x65e   : > { %s3933_s28 = sshll.u32 %s4007_s24, 4  ;;  %s3934_s28 = int_to_ptr.vmem [resolvable:$false] %s3933_s28 }
 0x65f   : > { %s3935_s9 = scalar_lea.vmem %s3934_s28, 256 }
 0x6c0   : > { %v2973_v62 = vpop.permute.xlu1 %2972 }
 0x6c1   : > { %v2988_v7 = vsel %vm2986_vm3, %v2985_v24, %v2973_v62 }
 0x6c4   : > { %v2971_v0 = vpop.permute.xlu1 %2970 }
 0x6c5   : > { %v2987_v46 = vsel %vm2986_vm3, %v2984_v45, %v2971_v0 }
 0x6ca   : > { %v2981_v23 = vpop.permute.xlu0 %2980 }
 0x6cb   : > { %v2991_v3 = vsel %vm2989_vm4, %v2988_v7, %v2981_v23 }
 0x6cc   : > { %3709 = vmatpush3.msra.mxu1 %v2991_v3 }
 0x6cd   : > { %3710 = vmatprep.subr.mxu1 %v3991_v2 }
 0x6ce   : > { %v2979_v53 = vpop.permute.xlu0 %2978 }
 0x6cf   : > { %v2990_v32 = vsel %vm2989_vm4, %v2987_v46, %v2979_v53 }
 0x6d0   : > { %3711 = vmatpush3.msra.mxu1 %v2990_v32 }
 0x6d1   : > { %3713 = vmatmul.mubr.msk.f32.vlgmr.msra.gmra.mxu1 %vm1961_vm2, %v2992_v21  ;;  %3734 = vmatprep.subr.mxu1 %v3991_v2  ;;  %v2997_v15 = vpop.permute.xlu1 %2996 }
 0x6d2   : > { %3750 = vmatprep.mubr.msk.f32.mxu1 %vm3992_vm0, %v3991_v2  ;;  %3735 = vmatpush3.msra.mxu1 %v3170_v61  ;;  %vm3088_vm0 = vcmask 523264  }
 0x6d3   : > { %3736 = vmatprep.subr.mxu1 %v3991_v2 }
 0x6d4   : > { %3737 = vmatpush3.msra.mxu1 %v3169_v1 }
 0x6d5   : > { %3738 = vmatprep.subr.mxu1 %v3991_v2 }
 0x6d6   : > { %3739 = vmatpush3.msra.mxu1 %v3168_v52 }
 0x6d7   : > { %3740 = vmatprep.subr.mxu1 %v3991_v2 }
 0x6d8   : > { %3741 = vmatpush3.msra.mxu1 %v3167_v56 }
 0x6d9   : > { %3742 = vmatprep.subr.mxu1 %v3991_v2 }
 0x6da   : > { %3743 = vmatpush3.msra.mxu1 %v3166_v50 }
 0x6db   : > { %3744 = vmatprep.subr.mxu1 %v3991_v2 }
 0x6dc   : > { %3745 = vmatpush3.msra.mxu1 %v3165_v6 }
 0x6dd   : > { %3746 = vmatprep.subr.mxu1 %v3991_v2 }
 0x6de   : > { %3747 = vmatpush3.msra.mxu1 %v3164_v20 }
 0x6df   : > { %3748 = vmatprep.subr.mxu1 %v3991_v2 }
 0x6e0   : > { %3749 = vmatpush3.msra.mxu1 %v3163_v51 }
 0x791   : > { %v3068_v59 = vpop.f32.mrf.mxu1 }
 0x792   : > { %v3069_v44 = vadd.f32 %v3068_v59, %v2997_v15 }
 0x793   : > { %v3714_v19 = vpop.f32.mrf.mxu1 }
 0x794   : > { %v3072_v13 = vmax.f32 %v3069_v44, 0.0 }
 0x796   : > { %3732 = vmatmul.mubr.msk.f32.vlgmr.msra.gmra.mxu0 %vm3088_vm0, %v3072_v13 }
 0x797   : > { %3331 = vmatprep.mubr.f32.mxu0 %v3991_v2  ;;  %v3262_v2 = vld [vmem:[%s820_s29 + $0x18] sm:$0xff]  ;;  %s3363_s29 = sshll.u32 %s792_s10, 4  ;;  %s3364_s29 = int_to_ptr.vmem [resolvable:$true] %s3363_s29 }
 0x798   : > { %3295 = vmatprep.subr.mxu0 %v3262_v2  ;;  %s3929_s7 = scalar_lea.vmem %s3364_s29, 128  ;;  %p3936_p0 = scmp.lt.s32.totalorder %s3364_s29, %s3934_s28 }
 0x799   : > { %3296 = vmatpush1.msra.mxu0 %v3261_v34  ;;  %p3930_p11 = scmp.ne.s32.totalorder %s3364_s29, %s3929_s7  ;;  %p3937_p1 = scmp.lt.s32.totalorder %s3935_s9, %s3929_s7 }
 0x79a   : > { %3297 = vmatprep.subr.mxu0 %v3260_v35 }
 0x79b   : > { %3298 = vmatpush1.msra.mxu0 %v3259_v8  ;;  %p3931_p12 = pnand %p3930_p11, %p4182_p5  ;;  %p3938_p2 = por %p3937_p1, %p3936_p0 }
 0x79d   : > { %p3932_p13 = pneg %p3931_p12 }
 0x79f   : > { %p3939_p3 = pnand %p3938_p2, %p3932_p13 }
 0x856   : > { %v3158_v14 = vpop.f32.mrf.mxu0 }
 0x857   : > { %v3159_v29 = vadd.f32 %v3572_v26, %v3158_v14 }
 0x858   : > { %v3733_v30 = vpop.f32.mrf.mxu0 }
 0x859   : > { %v3162_v31 = vmax.f32 %v3159_v29, 0.0 }
 0x85b   : > { %3751 = vmatmul.mubr.msk.f32.vlgmr.msra.gmra.mxu1 %vm3088_vm0, %v3162_v31 }
 0x91b   : > { %v3247_v36 = vpop.f32.mrf.mxu1 }
 0x91c   : > { %v3248_v37 = vadd.f32 %v3574_v5, %v3247_v36 }
 0x91d   : > { %v3752_v10 = vpop.f32.mrf.mxu1 }
 0x91e   : > { %3254 = vrot.lane.b32.xlu1 %v3248_v37, %s4005_s27  ;;  %3263 = vrot.lane.b32.xlu0 %v3248_v37, %s4006_s23  ;;  %3252 = vst.msk [vmem:[%s792_s10] sm:$0xff] %vm3251_vm5, %v3248_v37  ;;  %s5548_s27 = sld [smem:[#allocation23_spill]] }
 0x924   : > { %s3361_s23 = scalar_lea.hbm %s5548_s27, %s3578_s5 }
 0x990   : > { %v3255_v38 = vpop.permute.xlu1 %3254  ;;  %v3264_v17 = vpop.permute.xlu0 %3263 }
 0x991   : > { %3258 = vst.msk [vmem:[%s829_s6] sm:$0xff] %vm3257_vm6, %v3255_v38  ;;  %3576 = vmatmul.mubr.msk.f32.vlgmr.msra.gmra.mxu0 %vm1961_vm2, %v3264_v17 }
 0x992   : > { %3942 = shalt.err (!%p3939_p3)
}
 0x993   : > { %s3943_s8 = scalar_lea.hbm %s3361_s23, 128  ;;  %s3947_s6 = scalar_lea.hbm %s5548_s27, 256 }
 0x994   : > { %p3944_p4 = scmp.ne.s32.totalorder %s3361_s23, %s3943_s8  ;;  %p3948_p9 = scmp.lt.s32.totalorder %s3361_s23, %s5548_s27 }
 0x995   : > { %p3949_p10 = scmp.lt.s32.totalorder %s3947_s6, %s3943_s8 }
 0x996   : > { %p3945_p7 = pnand %p3944_p4, %p4182_p5 }
 0x997   : > { %p3950_p11 = por %p3949_p10, %p3948_p9 }
 0x998   : > { %p3946_p8 = pneg %p3945_p7 }
 0x99a   : > { %p3951_p12 = pnand %p3950_p11, %p3946_p8 }
 0x99c   : > { %3954 = shalt.err (!%p3951_p12)
}
 0x99d   : > { %3754 = dma.vmem_to_hbm [thread:$0]  (%p4182_p5), %s3364_s29, 128, %s3361_s23, %s3341_s4  }
 0x99e   : > { %s3582_s7 = sshll.u32 %s4197_s2, 4  ;;  %s5549_s28 = sld [smem:[#allocation24_spill]] }
 0x9a4   : > { %s825_s9 = scalar_lea.vmem %s5549_s28, %s3582_s7 }
 0xa51   : > { %v3333_v49 = vpop.f32.mrf.mxu0 }
 0xa52   : > { %3338 = vst [vmem:[%s825_s9] sm:$0xff] %v3333_v49 }
 0xa53   : > { %v3335_v9 = vpop.f32.mrf.mxu0 }
 0xa54   : > { %3339 = vst [vmem:[%s825_s9 + $0x8] sm:$0xff] %v3335_v9 }
 0xa55 PF: > { %s5550_s30 = sld [smem:[#allocation9_spill]] }
 0xa56   : > { %s5551_s10 = sld [smem:[#allocation7_spill]] }
 0xa5b   : > { %p3760_p13 = scmp.ge.s32.totalorder %s5550_s30, 2 }
 0xa5c   : > { %s3381_s6 = sand.u32 1, %s5551_s10  }
 0xa5d   : > { %p3757_p0 = pnand %p3760_p13, %p4186_p6  ;;  %s3382_s0 = scalar_lea.sflag [#allocation5], %s3381_s6 }
 0xa5f   : > { %p3758_p1 = pneg %p3757_p0 }
 0xa61   : > { %3972 = dma.done.wait (%p3758_p1), %s3382_s0, 128  }
 0xa62   : > { %3974 = vsyncadd (%p3758_p1), %s3382_s0, 4294967168  ;;  %s5553_s9 = sld [smem:[#allocation10_spill]]  ;;  %s5556_s3 = smov %s3981_s26 }
 0xa63   : > { %s5554_s2 = sld [smem:[#allocation8_spill]] }
 0xa64   : > { %s5555_s1 = sld [smem:[#allocation11_spill]] }
 0xa68   : > { %p40_p5 = scmp.ge.s32.totalorder %s5553_s9, 4  }
 0xa69   : > { %s5557_s26 = smov %s5554_s2 }
 0xa6a   :  { %42 = sbr.rel (!%p40_p5) target bundleno = 24 (0x18), region = 177 }
 0xa6f   :  { %3402 = vsyncpa [#allocation5], 1 }
 0xa70   :  { %3404 = vsyncpa [#allocation5 + $0x1], 1 }

</bundles_post_ra>
